<compile_context>
chip_gen: v5e
topology: v5e:2x2
jax: 0.10.0
libtpu: 0.0.40
codegen_flags: <defaults>
</compile_context>

<pallas_src>
import functools

import jax
import jax.numpy as jnp
from jax import lax
from jax.experimental import pallas as pl
from jax.experimental.pallas import tpu as pltpu


# ----------------------------------------------------------------------------
# In-kernel helpers: build im2col tap stacks in the (C, H*W) lane-dense layout.
# ----------------------------------------------------------------------------
def _shift_rows(xf, dy, H, W, replicate):
    """t[:, y*W+x] = xf[:, (y+dy)*W + x], zero or replicate padded at the rows."""
    if dy == 0:
        return xf
    HW = H * W
    if dy > 0:
        body = xf[:, W:]
        edge = xf[:, (H - 1) * W:] if replicate else jnp.zeros_like(xf[:, :W])
        return jnp.concatenate([body, edge], axis=1)
    body = xf[:, :HW - W]
    edge = xf[:, :W] if replicate else jnp.zeros_like(xf[:, :W])
    return jnp.concatenate([edge, body], axis=1)


def _shift_cols(r, dx, replicate, ok_mask):
    """t[:, y*W+x] = r[:, y*W + (x+dx)], zero or replicate padded at the cols."""
    if dx == 0:
        return r
    # circular lane shift: shifted[:, i] = r[:, (i + dx) mod HW]  (dx = +-1)
    shifted = jnp.concatenate([r[:, dx:], r[:, :dx]], axis=1)
    if replicate:
        return jnp.where(ok_mask, shifted, r)
    return jnp.where(ok_mask, shifted, 0.0)


def _taps(xf, H, W, replicate, right_ok, left_ok):
    """im2col tap stack: (9*C, H*W), ordered (ky, kx, cin) -- tap major."""
    pieces = []
    for dy in (-1, 0, 1):
        r = _shift_rows(xf, dy, H, W, replicate)
        for dx in (-1, 0, 1):
            if dx == 0:
                pieces.append(r)
            else:
                pieces.append(
                    _shift_cols(r, dx, replicate, right_ok if dx > 0 else left_ok))
    return jnp.concatenate(pieces, axis=0)


# ----------------------------------------------------------------------------
# The fused kernel: whole RRDBNet forward for one image of the batch.
# ----------------------------------------------------------------------------
def _rrdbnet_kernel(x_ref, *refs, nb, H, W):
    prefs = refs[:-1]      # flat (w_src0, [w_src1, ...], bias) groups, in order
    o_ref = refs[-1]
    HW = H * W

    # Hoisted once: pixel-column index along lanes + validity masks for dx=+-1.
    col = lax.broadcasted_iota(jnp.int32, (1, HW), 1) % W
    right_ok = col <= (W - 2)    # x+1 in bounds
    left_ok = col >= 1           # x-1 in bounds

    cursor = [0]

    def conv(tap_list, act):
        """Conv over several concatenated sources = sum of per-source matmuls."""
        n = len(tap_list)
        ws = [prefs[cursor[0] + i] for i in range(n)]      # (Cout, 9*C_s) each
        b = prefs[cursor[0] + n]                           # (Cout, 1)
        cursor[0] += n + 1
        y = jnp.dot(ws[0][...], tap_list[0], preferred_element_type=jnp.float32)
        for w, t in zip(ws[1:], tap_list[1:]):
            y = y + jnp.dot(w[...], t, preferred_element_type=jnp.float32)
        y = y + b[...]
        return jnp.maximum(y, 0.2 * y) if act else y       # LeakyReLU(0.2)

    def zp(v):   # zero-padded 'same' taps
        return _taps(v, H, W, False, right_ok, left_ok)

    def rp(v):   # replicate-padded 'same' taps (conv1 of each dense block)
        return _taps(v, H, W, True, right_ok, left_ok)

    x = x_ref[0]                                  # (Cin_pad, H*W)

    fea = conv([zp(x)], act=False)                # conv_first (no activation)

    trunk = fea
    for _ in range(nb):                           # RRDB trunk
        rrdb_in = trunk
        cur = trunk
        for _ in range(3):                        # ResidualDenseBlock_3C x3
            x0 = cur
            x1 = conv([rp(x0)], act=True)                 # conv1 (replicate pad)
            t0 = zp(x0)
            t1 = zp(x1)
            x2 = conv([t0, t1], act=True)                 # conv2 (cat(x, x1))
            t2 = zp(x2)
            x3 = conv([t0, t1, t2], act=True)             # conv3 (cat(x, x1, x2))
            cur = x3 * 0.4 + x0
        trunk = cur * 0.2 + rrdb_in

    trunk = conv([zp(trunk)], act=False)          # trunk_conv
    fea = fea + trunk
    h = conv([zp(fea)], act=True)                 # HRconv + lrelu
    out = conv([zp(h)], act=False)                # conv_last
    o_ref[0] = out.astype(o_ref.dtype)


# ----------------------------------------------------------------------------
# Host-side weight prep + wrapper
# ----------------------------------------------------------------------------
def _prep_conv(w_oihw, b, splits):
    """OIHW conv weight -> list of per-source (Cout, 9*C_s) matmul weights + bias.

    Each source's contraction axis is ordered (ky, kx, cin), matching the
    in-kernel tap-major im2col stack.  Splitting over the concatenated input
    sources lets the kernel sum per-source matmuls instead of concatenating
    activations.
    """
    cout = w_oihw.shape[0]
    out, off = [], 0
    for c in splits:
        ws = w_oihw[:, off:off + c]                                  # (Cout, c, 3, 3)
        out.append(jnp.transpose(ws, (0, 2, 3, 1))
                   .reshape(cout, 9 * c).astype(jnp.float32))
        off += c
    out.append(b.reshape(cout, 1).astype(jnp.float32))
    return out


def _flatten_params(params, in_nc_pad):
    conv_first = params["conv_first"]
    nf = conv_first["w"].shape[0]
    in_nc = conv_first["w"].shape[1]
    gc = params["rrdb"][0]["rdb1"]["conv1"]["w"].shape[0] if params["rrdb"] else nf

    flat = []
    w_first = jnp.pad(conv_first["w"],
                      ((0, 0), (0, in_nc_pad - in_nc), (0, 0), (0, 0)))
    flat += _prep_conv(w_first, conv_first["b"], [in_nc_pad])
    for blk in params["rrdb"]:
        for name in ("rdb1", "rdb2", "rdb3"):
            rdb = blk[name]
            flat += _prep_conv(rdb["conv1"]["w"], rdb["conv1"]["b"], [nf])
            flat += _prep_conv(rdb["conv2"]["w"], rdb["conv2"]["b"], [nf, gc])
            flat += _prep_conv(rdb["conv3"]["w"], rdb["conv3"]["b"], [nf, gc, gc])
    flat += _prep_conv(params["trunk_conv"]["w"], params["trunk_conv"]["b"], [nf])
    flat += _prep_conv(params["HRconv"]["w"], params["HRconv"]["b"], [nf])
    flat += _prep_conv(params["conv_last"]["w"], params["conv_last"]["b"], [nf])
    return flat


def rrdbnet_forward(x_nchw, params):
    """RRDBNet_padding_same.forward, NCHW in / NCHW out (PyTorch convention)."""
    N, in_nc, H, W = x_nchw.shape
    HW = H * W
    nb = len(params["rrdb"])
    nf = params["conv_first"]["w"].shape[0]
    out_nc = params["conv_last"]["w"].shape[0]
    gc = params["rrdb"][0]["rdb1"]["conv1"]["w"].shape[0] if nb else nf

    # Layout requirements of this whole-image fully fused kernel.
    assert HW % 128 == 0, "H*W must be a multiple of 128 (lane-dense layout)"
    assert nf % 8 == 0 and gc % 8 == 0, "nf, gc must be sublane aligned (x8)"

    # Pad input channels up to a sublane multiple (weights padded to match).
    in_nc_pad = (in_nc + 7) // 8 * 8
    x_flat = x_nchw.reshape(N, in_nc, HW).astype(jnp.float32)
    if in_nc_pad != in_nc:
        x_flat = jnp.pad(x_flat, ((0, 0), (0, in_nc_pad - in_nc), (0, 0)))

    flat_params = _flatten_params(params, in_nc_pad)

    in_specs = [pl.BlockSpec((1, in_nc_pad, HW), lambda n: (n, 0, 0))]
    in_specs += [pl.BlockSpec(p.shape, lambda n: (0, 0)) for p in flat_params]

    kernel = functools.partial(_rrdbnet_kernel, nb=nb, H=H, W=W)
    out = pl.pallas_call(
        kernel,
        out_shape=jax.ShapeDtypeStruct((N, out_nc, HW), jnp.float32),
        grid=(N,),
        in_specs=in_specs,
        out_specs=pl.BlockSpec((1, out_nc, HW), lambda n: (n, 0, 0)),
        compiler_params=pltpu.CompilerParams(
            dimension_semantics=("parallel",)),
    )(x_flat, *flat_params)
    return out.reshape(N, out_nc, H, W)


# ----------------------------------------------------------------------------
# Deterministic synthetic parameters (PyTorch-style OIHW) + pure-JAX reference
# ----------------------------------------------------------------------------
def init_params(key, in_nc, out_nc, nf, nb, gc):
    n_convs = 4 + 9 * nb
    keys = iter(jax.random.split(key, 2 * n_convs))

    def conv_p(cin, cout):
        w = 0.1 * jax.random.normal(next(keys), (cout, cin, 3, 3), jnp.float32)
        b = 0.1 * jax.random.normal(next(keys), (cout,), jnp.float32)
        return {"w": w, "b": b}

    params = {"conv_first": conv_p(in_nc, nf)}
    rrdbs = []
    for _ in range(nb):
        blk = {}
        for name in ("rdb1", "rdb2", "rdb3"):
            blk[name] = {
                "conv1": conv_p(nf, gc),
                "conv2": conv_p(nf + gc, gc),
                "conv3": conv_p(nf + 2 * gc, nf),
            }
        rrdbs.append(blk)
    params["rrdb"] = rrdbs
    params["trunk_conv"] = conv_p(nf, nf)
    params["HRconv"] = conv_p(nf, nf)
    params["conv_last"] = conv_p(nf, out_nc)
    return params


def _lrelu_ref(v):
    return jnp.where(v >= 0, v, 0.2 * v)


def _conv_ref(x, p, replicate=False):
    w, b = p["w"], p["b"]
    if replicate:
        x = jnp.pad(x, ((0, 0), (0, 0), (1, 1), (1, 1)), mode="edge")
        padding = "VALID"
    else:
        padding = ((1, 1), (1, 1))
    y = lax.conv_general_dilated(
        x, w, window_strides=(1, 1), padding=padding,
        dimension_numbers=("NCHW", "OIHW", "NCHW"),
        precision=lax.Precision.HIGHEST)
    return y + b.reshape(1, -1, 1, 1)


def rrdbnet_ref(x, params):
    fea = _conv_ref(x, params["conv_first"])
    trunk = fea
    for blk in params["rrdb"]:
        rrdb_in = trunk
        cur = trunk
        for name in ("rdb1", "rdb2", "rdb3"):
            rdb = blk[name]
            x0 = cur
            x1 = _lrelu_ref(_conv_ref(x0, rdb["conv1"], replicate=True))
            x2 = _lrelu_ref(_conv_ref(jnp.concatenate([x0, x1], axis=1), rdb["conv2"]))
            x3 = _lrelu_ref(_conv_ref(jnp.concatenate([x0, x1, x2], axis=1),
                                      rdb["conv3"]))
            cur = x3 * 0.4 + x0
        trunk = cur * 0.2 + rrdb_in
    trunk = _conv_ref(trunk, params["trunk_conv"])
    fea = fea + trunk
    h = _lrelu_ref(_conv_ref(fea, params["HRconv"]))
    return _conv_ref(h, params["conv_last"])


# ----------------------------------------------------------------------------
if __name__ == "__main__":
    in_nc, out_nc, nf, nb, gc = 4, 4, 8, 1, 8   # small RRDBNet_padding_same
    N, H, W = 2, 16, 16

    key = jax.random.PRNGKey(0)
    kx, kp = jax.random.split(key)
    x = jax.random.normal(kx, (N, in_nc, H, W), jnp.float32)   # NCHW, like PyTorch
    params = init_params(kp, in_nc, out_nc, nf, nb, gc)

    out = jax.block_until_ready(jax.jit(rrdbnet_forward)(x, params))
    ref = jax.block_until_ready(rrdbnet_ref(x, params))

    assert out.shape == (N, out_nc, H, W)
    max_err = jnp.max(jnp.abs(out - ref))
    assert jnp.allclose(out, ref, rtol=2e-4, atol=2e-4), (
        f"mismatch vs JAX reference, max abs err = {max_err}")
    print("KERNEL_OK")
</pallas_src>

<mosaic_0001>
module attributes {stable_mosaic.version = 11 : i64} {
  func.func @_rrdbnet_kernel(%arg0: i32, %arg1: memref<1x8x256xf32, #tpu.memory_space<vmem>>, %arg2: memref<8x72xf32, #tpu.memory_space<vmem>>, %arg3: memref<8x1xf32, #tpu.memory_space<vmem>>, %arg4: memref<8x72xf32, #tpu.memory_space<vmem>>, %arg5: memref<8x1xf32, #tpu.memory_space<vmem>>, %arg6: memref<8x72xf32, #tpu.memory_space<vmem>>, %arg7: memref<8x72xf32, #tpu.memory_space<vmem>>, %arg8: memref<8x1xf32, #tpu.memory_space<vmem>>, %arg9: memref<8x72xf32, #tpu.memory_space<vmem>>, %arg10: memref<8x72xf32, #tpu.memory_space<vmem>>, %arg11: memref<8x72xf32, #tpu.memory_space<vmem>>, %arg12: memref<8x1xf32, #tpu.memory_space<vmem>>, %arg13: memref<8x72xf32, #tpu.memory_space<vmem>>, %arg14: memref<8x1xf32, #tpu.memory_space<vmem>>, %arg15: memref<8x72xf32, #tpu.memory_space<vmem>>, %arg16: memref<8x72xf32, #tpu.memory_space<vmem>>, %arg17: memref<8x1xf32, #tpu.memory_space<vmem>>, %arg18: memref<8x72xf32, #tpu.memory_space<vmem>>, %arg19: memref<8x72xf32, #tpu.memory_space<vmem>>, %arg20: memref<8x72xf32, #tpu.memory_space<vmem>>, %arg21: memref<8x1xf32, #tpu.memory_space<vmem>>, %arg22: memref<8x72xf32, #tpu.memory_space<vmem>>, %arg23: memref<8x1xf32, #tpu.memory_space<vmem>>, %arg24: memref<8x72xf32, #tpu.memory_space<vmem>>, %arg25: memref<8x72xf32, #tpu.memory_space<vmem>>, %arg26: memref<8x1xf32, #tpu.memory_space<vmem>>, %arg27: memref<8x72xf32, #tpu.memory_space<vmem>>, %arg28: memref<8x72xf32, #tpu.memory_space<vmem>>, %arg29: memref<8x72xf32, #tpu.memory_space<vmem>>, %arg30: memref<8x1xf32, #tpu.memory_space<vmem>>, %arg31: memref<8x72xf32, #tpu.memory_space<vmem>>, %arg32: memref<8x1xf32, #tpu.memory_space<vmem>>, %arg33: memref<8x72xf32, #tpu.memory_space<vmem>>, %arg34: memref<8x1xf32, #tpu.memory_space<vmem>>, %arg35: memref<4x72xf32, #tpu.memory_space<vmem>>, %arg36: memref<4x1xf32, #tpu.memory_space<vmem>>, %arg37: memref<1x4x256xf32, #tpu.memory_space<vmem>>) attributes {dimension_semantics = [#tpu.dimension_semantics<parallel>], iteration_bounds = array<i64: 2>, scalar_prefetch = 0 : i64, scratch_operands = 0 : i64, tpu.core_type = #tpu.core_type<tc>, window_params = [{transform_indices = @transform_0, window_bounds = array<i64: 1, 8, 256>}, {pipeline_mode = #tpu.pipeline_mode<synchronous>, transform_indices = @transform_1, window_bounds = array<i64: 8, 72>}, {pipeline_mode = #tpu.pipeline_mode<synchronous>, transform_indices = @transform_2, window_bounds = array<i64: 8, 1>}, {pipeline_mode = #tpu.pipeline_mode<synchronous>, transform_indices = @transform_3, window_bounds = array<i64: 8, 72>}, {pipeline_mode = #tpu.pipeline_mode<synchronous>, transform_indices = @transform_4, window_bounds = array<i64: 8, 1>}, {pipeline_mode = #tpu.pipeline_mode<synchronous>, transform_indices = @transform_5, window_bounds = array<i64: 8, 72>}, {pipeline_mode = #tpu.pipeline_mode<synchronous>, transform_indices = @transform_6, window_bounds = array<i64: 8, 72>}, {pipeline_mode = #tpu.pipeline_mode<synchronous>, transform_indices = @transform_7, window_bounds = array<i64: 8, 1>}, {pipeline_mode = #tpu.pipeline_mode<synchronous>, transform_indices = @transform_8, window_bounds = array<i64: 8, 72>}, {pipeline_mode = #tpu.pipeline_mode<synchronous>, transform_indices = @transform_9, window_bounds = array<i64: 8, 72>}, {pipeline_mode = #tpu.pipeline_mode<synchronous>, transform_indices = @transform_10, window_bounds = array<i64: 8, 72>}, {pipeline_mode = #tpu.pipeline_mode<synchronous>, transform_indices = @transform_11, window_bounds = array<i64: 8, 1>}, {pipeline_mode = #tpu.pipeline_mode<synchronous>, transform_indices = @transform_12, window_bounds = array<i64: 8, 72>}, {pipeline_mode = #tpu.pipeline_mode<synchronous>, transform_indices = @transform_13, window_bounds = array<i64: 8, 1>}, {pipeline_mode = #tpu.pipeline_mode<synchronous>, transform_indices = @transform_14, window_bounds = array<i64: 8, 72>}, {pipeline_mode = #tpu.pipeline_mode<synchronous>, transform_indices = @transform_15, window_bounds = array<i64: 8, 72>}, {pipeline_mode = #tpu.pipeline_mode<synchronous>, transform_indices = @transform_16, window_bounds = array<i64: 8, 1>}, {pipeline_mode = #tpu.pipeline_mode<synchronous>, transform_indices = @transform_17, window_bounds = array<i64: 8, 72>}, {pipeline_mode = #tpu.pipeline_mode<synchronous>, transform_indices = @transform_18, window_bounds = array<i64: 8, 72>}, {pipeline_mode = #tpu.pipeline_mode<synchronous>, transform_indices = @transform_19, window_bounds = array<i64: 8, 72>}, {pipeline_mode = #tpu.pipeline_mode<synchronous>, transform_indices = @transform_20, window_bounds = array<i64: 8, 1>}, {pipeline_mode = #tpu.pipeline_mode<synchronous>, transform_indices = @transform_21, window_bounds = array<i64: 8, 72>}, {pipeline_mode = #tpu.pipeline_mode<synchronous>, transform_indices = @transform_22, window_bounds = array<i64: 8, 1>}, {pipeline_mode = #tpu.pipeline_mode<synchronous>, transform_indices = @transform_23, window_bounds = array<i64: 8, 72>}, {pipeline_mode = #tpu.pipeline_mode<synchronous>, transform_indices = @transform_24, window_bounds = array<i64: 8, 72>}, {pipeline_mode = #tpu.pipeline_mode<synchronous>, transform_indices = @transform_25, window_bounds = array<i64: 8, 1>}, {pipeline_mode = #tpu.pipeline_mode<synchronous>, transform_indices = @transform_26, window_bounds = array<i64: 8, 72>}, {pipeline_mode = #tpu.pipeline_mode<synchronous>, transform_indices = @transform_27, window_bounds = array<i64: 8, 72>}, {pipeline_mode = #tpu.pipeline_mode<synchronous>, transform_indices = @transform_28, window_bounds = array<i64: 8, 72>}, {pipeline_mode = #tpu.pipeline_mode<synchronous>, transform_indices = @transform_29, window_bounds = array<i64: 8, 1>}, {pipeline_mode = #tpu.pipeline_mode<synchronous>, transform_indices = @transform_30, window_bounds = array<i64: 8, 72>}, {pipeline_mode = #tpu.pipeline_mode<synchronous>, transform_indices = @transform_31, window_bounds = array<i64: 8, 1>}, {pipeline_mode = #tpu.pipeline_mode<synchronous>, transform_indices = @transform_32, window_bounds = array<i64: 8, 72>}, {pipeline_mode = #tpu.pipeline_mode<synchronous>, transform_indices = @transform_33, window_bounds = array<i64: 8, 1>}, {pipeline_mode = #tpu.pipeline_mode<synchronous>, transform_indices = @transform_34, window_bounds = array<i64: 4, 72>}, {pipeline_mode = #tpu.pipeline_mode<synchronous>, transform_indices = @transform_35, window_bounds = array<i64: 4, 1>}, {transform_indices = @transform_36, window_bounds = array<i64: 1, 4, 256>}]} {
    %0 = tpu.iota {dimensions = array<i32: 1>} : vector<1x256xi32>
    %c16_i32 = arith.constant 16 : i32
    %c0_i32 = arith.constant 0 : i32
    %1 = arith.cmpi eq, %c16_i32, %c0_i32 : i32
    %c1_i32 = arith.constant 1 : i32
    %2 = arith.select %1, %c1_i32, %c16_i32 : i32
    %3 = vector.broadcast %2 : i32 to vector<1x256xi32>
    %4 = arith.remsi %0, %3 : vector<1x256xi32>
    %c0_i32_0 = arith.constant 0 : i32
    %5 = vector.broadcast %c0_i32_0 : i32 to vector<1x256xi32>
    %6 = arith.cmpi ne, %4, %5 : vector<1x256xi32>
    %c0_i32_1 = arith.constant 0 : i32
    %7 = vector.broadcast %c0_i32_1 : i32 to vector<1x256xi32>
    %8 = arith.cmpi slt, %4, %7 : vector<1x256xi32>
    %c0_i32_2 = arith.constant 0 : i32
    %9 = arith.cmpi slt, %2, %c0_i32_2 : i32
    %10 = vector.broadcast %9 : i1 to vector<1x256xi1>
    %11 = vector.broadcast %10 : vector<1x256xi1> to vector<1x256xi1>
    %12 = arith.xori %8, %11 : vector<1x256xi1>
    %13 = arith.andi %12, %6 : vector<1x256xi1>
    %14 = vector.broadcast %2 : i32 to vector<1x256xi32>
    %15 = arith.addi %4, %14 : vector<1x256xi32>
    %16 = arith.select %13, %15, %4 : vector<1x256xi1>, vector<1x256xi32>
    %c14_i32 = arith.constant 14 : i32
    %17 = vector.broadcast %c14_i32 : i32 to vector<1x256xi32>
    %18 = arith.cmpi sle, %16, %17 : vector<1x256xi32>
    %c1_i32_3 = arith.constant 1 : i32
    %19 = vector.broadcast %c1_i32_3 : i32 to vector<1x256xi32>
    %20 = arith.cmpi sge, %16, %19 : vector<1x256xi32>
    %c0 = arith.constant 0 : index
    %c0_4 = arith.constant 0 : index
    %c0_5 = arith.constant 0 : index
    %21 = vector.load %arg1[%c0, %c0_4, %c0_5] : memref<1x8x256xf32, #tpu.memory_space<vmem>>, vector<1x8x256xf32>
    %22 = vector.shape_cast %21 : vector<1x8x256xf32> to vector<8x256xf32>
    %23 = vector.extract_strided_slice %22 {offsets = [0, 0], sizes = [8, 240], strides = [1, 1]} : vector<8x256xf32> to vector<8x240xf32>
    %cst = arith.constant 0.000000e+00 : f32
    %24 = vector.broadcast %cst : f32 to vector<8x16xf32>
    %25 = tpu.concatenate %24, %23 in 1 : vector<8x16xf32>, vector<8x240xf32> -> vector<8x256xf32>
    %26 = vector.extract_strided_slice %25 {offsets = [0, 255], sizes = [8, 1], strides = [1, 1]} : vector<8x256xf32> to vector<8x1xf32>
    %27 = vector.extract_strided_slice %25 {offsets = [0, 0], sizes = [8, 255], strides = [1, 1]} : vector<8x256xf32> to vector<8x255xf32>
    %28 = tpu.concatenate %26, %27 in 1 : vector<8x1xf32>, vector<8x255xf32> -> vector<8x256xf32>
    %cst_6 = arith.constant 0.000000e+00 : f32
    %29 = vector.shape_cast %20 : vector<1x256xi1> to vector<1x256xi1>
    %30 = vector.broadcast %29 : vector<1x256xi1> to vector<8x256xi1>
    %31 = vector.broadcast %cst_6 : f32 to vector<8x256xf32>
    %32 = arith.select %30, %28, %31 : vector<8x256xi1>, vector<8x256xf32>
    %33 = vector.extract_strided_slice %25 {offsets = [0, 1], sizes = [8, 255], strides = [1, 1]} : vector<8x256xf32> to vector<8x255xf32>
    %34 = vector.extract_strided_slice %25 {offsets = [0, 0], sizes = [8, 1], strides = [1, 1]} : vector<8x256xf32> to vector<8x1xf32>
    %35 = tpu.concatenate %33, %34 in 1 : vector<8x255xf32>, vector<8x1xf32> -> vector<8x256xf32>
    %cst_7 = arith.constant 0.000000e+00 : f32
    %36 = vector.shape_cast %18 : vector<1x256xi1> to vector<1x256xi1>
    %37 = vector.broadcast %36 : vector<1x256xi1> to vector<8x256xi1>
    %38 = vector.broadcast %cst_7 : f32 to vector<8x256xf32>
    %39 = arith.select %37, %35, %38 : vector<8x256xi1>, vector<8x256xf32>
    %40 = vector.extract_strided_slice %22 {offsets = [0, 255], sizes = [8, 1], strides = [1, 1]} : vector<8x256xf32> to vector<8x1xf32>
    %41 = vector.extract_strided_slice %22 {offsets = [0, 0], sizes = [8, 255], strides = [1, 1]} : vector<8x256xf32> to vector<8x255xf32>
    %42 = tpu.concatenate %40, %41 in 1 : vector<8x1xf32>, vector<8x255xf32> -> vector<8x256xf32>
    %cst_8 = arith.constant 0.000000e+00 : f32
    %43 = vector.shape_cast %20 : vector<1x256xi1> to vector<1x256xi1>
    %44 = vector.broadcast %43 : vector<1x256xi1> to vector<8x256xi1>
    %45 = vector.broadcast %cst_8 : f32 to vector<8x256xf32>
    %46 = arith.select %44, %42, %45 : vector<8x256xi1>, vector<8x256xf32>
    %47 = vector.extract_strided_slice %22 {offsets = [0, 1], sizes = [8, 255], strides = [1, 1]} : vector<8x256xf32> to vector<8x255xf32>
    %48 = vector.extract_strided_slice %22 {offsets = [0, 0], sizes = [8, 1], strides = [1, 1]} : vector<8x256xf32> to vector<8x1xf32>
    %49 = tpu.concatenate %47, %48 in 1 : vector<8x255xf32>, vector<8x1xf32> -> vector<8x256xf32>
    %cst_9 = arith.constant 0.000000e+00 : f32
    %50 = vector.shape_cast %18 : vector<1x256xi1> to vector<1x256xi1>
    %51 = vector.broadcast %50 : vector<1x256xi1> to vector<8x256xi1>
    %52 = vector.broadcast %cst_9 : f32 to vector<8x256xf32>
    %53 = arith.select %51, %49, %52 : vector<8x256xi1>, vector<8x256xf32>
    %54 = vector.extract_strided_slice %22 {offsets = [0, 16], sizes = [8, 240], strides = [1, 1]} : vector<8x256xf32> to vector<8x240xf32>
    %cst_10 = arith.constant 0.000000e+00 : f32
    %55 = vector.broadcast %cst_10 : f32 to vector<8x16xf32>
    %56 = tpu.concatenate %54, %55 in 1 : vector<8x240xf32>, vector<8x16xf32> -> vector<8x256xf32>
    %57 = vector.extract_strided_slice %56 {offsets = [0, 255], sizes = [8, 1], strides = [1, 1]} : vector<8x256xf32> to vector<8x1xf32>
    %58 = vector.extract_strided_slice %56 {offsets = [0, 0], sizes = [8, 255], strides = [1, 1]} : vector<8x256xf32> to vector<8x255xf32>
    %59 = tpu.concatenate %57, %58 in 1 : vector<8x1xf32>, vector<8x255xf32> -> vector<8x256xf32>
    %cst_11 = arith.constant 0.000000e+00 : f32
    %60 = vector.shape_cast %20 : vector<1x256xi1> to vector<1x256xi1>
    %61 = vector.broadcast %60 : vector<1x256xi1> to vector<8x256xi1>
    %62 = vector.broadcast %cst_11 : f32 to vector<8x256xf32>
    %63 = arith.select %61, %59, %62 : vector<8x256xi1>, vector<8x256xf32>
    %64 = vector.extract_strided_slice %56 {offsets = [0, 1], sizes = [8, 255], strides = [1, 1]} : vector<8x256xf32> to vector<8x255xf32>
    %65 = vector.extract_strided_slice %56 {offsets = [0, 0], sizes = [8, 1], strides = [1, 1]} : vector<8x256xf32> to vector<8x1xf32>
    %66 = tpu.concatenate %64, %65 in 1 : vector<8x255xf32>, vector<8x1xf32> -> vector<8x256xf32>
    %cst_12 = arith.constant 0.000000e+00 : f32
    %67 = vector.shape_cast %18 : vector<1x256xi1> to vector<1x256xi1>
    %68 = vector.broadcast %67 : vector<1x256xi1> to vector<8x256xi1>
    %69 = vector.broadcast %cst_12 : f32 to vector<8x256xf32>
    %70 = arith.select %68, %66, %69 : vector<8x256xi1>, vector<8x256xf32>
    %71 = tpu.concatenate %32, %25, %39, %46, %22, %53, %63, %56, %70 in 0 : vector<8x256xf32>, vector<8x256xf32>, vector<8x256xf32>, vector<8x256xf32>, vector<8x256xf32>, vector<8x256xf32>, vector<8x256xf32>, vector<8x256xf32>, vector<8x256xf32> -> vector<72x256xf32>
    %c0_13 = arith.constant 0 : index
    %c0_14 = arith.constant 0 : index
    %72 = vector.load %arg2[%c0_13, %c0_14] : memref<8x72xf32, #tpu.memory_space<vmem>>, vector<8x72xf32>
    %cst_15 = arith.constant dense<0.000000e+00> : vector<8x256xf32>
    %73 = tpu.matmul %72, %71, %cst_15 {dimension_numbers = #tpu.dot_dimension_numbers<[1], [0], [0], [1], [0, 0, 1, 1], [], []>} : vector<8x72xf32>, vector<72x256xf32>, vector<8x256xf32> -> vector<8x256xf32>
    %c0_16 = arith.constant 0 : index
    %c0_17 = arith.constant 0 : index
    %74 = vector.load %arg3[%c0_16, %c0_17] : memref<8x1xf32, #tpu.memory_space<vmem>>, vector<8x1xf32>
    %75 = vector.broadcast %74 : vector<8x1xf32> to vector<8x256xf32>
    %76 = arith.addf %73, %75 : vector<8x256xf32>
    %77 = vector.extract_strided_slice %76 {offsets = [0, 0], sizes = [8, 240], strides = [1, 1]} : vector<8x256xf32> to vector<8x240xf32>
    %78 = vector.extract_strided_slice %76 {offsets = [0, 0], sizes = [8, 16], strides = [1, 1]} : vector<8x256xf32> to vector<8x16xf32>
    %79 = tpu.concatenate %78, %77 in 1 : vector<8x16xf32>, vector<8x240xf32> -> vector<8x256xf32>
    %80 = vector.extract_strided_slice %79 {offsets = [0, 255], sizes = [8, 1], strides = [1, 1]} : vector<8x256xf32> to vector<8x1xf32>
    %81 = vector.extract_strided_slice %79 {offsets = [0, 0], sizes = [8, 255], strides = [1, 1]} : vector<8x256xf32> to vector<8x255xf32>
    %82 = tpu.concatenate %80, %81 in 1 : vector<8x1xf32>, vector<8x255xf32> -> vector<8x256xf32>
    %83 = vector.shape_cast %20 : vector<1x256xi1> to vector<1x256xi1>
    %84 = vector.broadcast %83 : vector<1x256xi1> to vector<8x256xi1>
    %85 = arith.select %84, %82, %79 : vector<8x256xi1>, vector<8x256xf32>
    %86 = vector.extract_strided_slice %79 {offsets = [0, 1], sizes = [8, 255], strides = [1, 1]} : vector<8x256xf32> to vector<8x255xf32>
    %87 = vector.extract_strided_slice %79 {offsets = [0, 0], sizes = [8, 1], strides = [1, 1]} : vector<8x256xf32> to vector<8x1xf32>
    %88 = tpu.concatenate %86, %87 in 1 : vector<8x255xf32>, vector<8x1xf32> -> vector<8x256xf32>
    %89 = vector.shape_cast %18 : vector<1x256xi1> to vector<1x256xi1>
    %90 = vector.broadcast %89 : vector<1x256xi1> to vector<8x256xi1>
    %91 = arith.select %90, %88, %79 : vector<8x256xi1>, vector<8x256xf32>
    %92 = vector.extract_strided_slice %76 {offsets = [0, 255], sizes = [8, 1], strides = [1, 1]} : vector<8x256xf32> to vector<8x1xf32>
    %93 = vector.extract_strided_slice %76 {offsets = [0, 0], sizes = [8, 255], strides = [1, 1]} : vector<8x256xf32> to vector<8x255xf32>
    %94 = tpu.concatenate %92, %93 in 1 : vector<8x1xf32>, vector<8x255xf32> -> vector<8x256xf32>
    %95 = vector.shape_cast %20 : vector<1x256xi1> to vector<1x256xi1>
    %96 = vector.broadcast %95 : vector<1x256xi1> to vector<8x256xi1>
    %97 = arith.select %96, %94, %76 : vector<8x256xi1>, vector<8x256xf32>
    %98 = vector.extract_strided_slice %76 {offsets = [0, 1], sizes = [8, 255], strides = [1, 1]} : vector<8x256xf32> to vector<8x255xf32>
    %99 = vector.extract_strided_slice %76 {offsets = [0, 0], sizes = [8, 1], strides = [1, 1]} : vector<8x256xf32> to vector<8x1xf32>
    %100 = tpu.concatenate %98, %99 in 1 : vector<8x255xf32>, vector<8x1xf32> -> vector<8x256xf32>
    %101 = vector.shape_cast %18 : vector<1x256xi1> to vector<1x256xi1>
    %102 = vector.broadcast %101 : vector<1x256xi1> to vector<8x256xi1>
    %103 = arith.select %102, %100, %76 : vector<8x256xi1>, vector<8x256xf32>
    %104 = vector.extract_strided_slice %76 {offsets = [0, 16], sizes = [8, 240], strides = [1, 1]} : vector<8x256xf32> to vector<8x240xf32>
    %105 = vector.extract_strided_slice %76 {offsets = [0, 240], sizes = [8, 16], strides = [1, 1]} : vector<8x256xf32> to vector<8x16xf32>
    %106 = tpu.concatenate %104, %105 in 1 : vector<8x240xf32>, vector<8x16xf32> -> vector<8x256xf32>
    %107 = vector.extract_strided_slice %106 {offsets = [0, 255], sizes = [8, 1], strides = [1, 1]} : vector<8x256xf32> to vector<8x1xf32>
    %108 = vector.extract_strided_slice %106 {offsets = [0, 0], sizes = [8, 255], strides = [1, 1]} : vector<8x256xf32> to vector<8x255xf32>
    %109 = tpu.concatenate %107, %108 in 1 : vector<8x1xf32>, vector<8x255xf32> -> vector<8x256xf32>
    %110 = vector.shape_cast %20 : vector<1x256xi1> to vector<1x256xi1>
    %111 = vector.broadcast %110 : vector<1x256xi1> to vector<8x256xi1>
    %112 = arith.select %111, %109, %106 : vector<8x256xi1>, vector<8x256xf32>
    %113 = vector.extract_strided_slice %106 {offsets = [0, 1], sizes = [8, 255], strides = [1, 1]} : vector<8x256xf32> to vector<8x255xf32>
    %114 = vector.extract_strided_slice %106 {offsets = [0, 0], sizes = [8, 1], strides = [1, 1]} : vector<8x256xf32> to vector<8x1xf32>
    %115 = tpu.concatenate %113, %114 in 1 : vector<8x255xf32>, vector<8x1xf32> -> vector<8x256xf32>
    %116 = vector.shape_cast %18 : vector<1x256xi1> to vector<1x256xi1>
    %117 = vector.broadcast %116 : vector<1x256xi1> to vector<8x256xi1>
    %118 = arith.select %117, %115, %106 : vector<8x256xi1>, vector<8x256xf32>
    %119 = tpu.concatenate %85, %79, %91, %97, %76, %103, %112, %106, %118 in 0 : vector<8x256xf32>, vector<8x256xf32>, vector<8x256xf32>, vector<8x256xf32>, vector<8x256xf32>, vector<8x256xf32>, vector<8x256xf32>, vector<8x256xf32>, vector<8x256xf32> -> vector<72x256xf32>
    %c0_18 = arith.constant 0 : index
    %c0_19 = arith.constant 0 : index
    %120 = vector.load %arg4[%c0_18, %c0_19] : memref<8x72xf32, #tpu.memory_space<vmem>>, vector<8x72xf32>
    %cst_20 = arith.constant dense<0.000000e+00> : vector<8x256xf32>
    %121 = tpu.matmul %120, %119, %cst_20 {dimension_numbers = #tpu.dot_dimension_numbers<[1], [0], [0], [1], [0, 0, 1, 1], [], []>} : vector<8x72xf32>, vector<72x256xf32>, vector<8x256xf32> -> vector<8x256xf32>
    %c0_21 = arith.constant 0 : index
    %c0_22 = arith.constant 0 : index
    %122 = vector.load %arg5[%c0_21, %c0_22] : memref<8x1xf32, #tpu.memory_space<vmem>>, vector<8x1xf32>
    %123 = vector.broadcast %122 : vector<8x1xf32> to vector<8x256xf32>
    %124 = arith.addf %121, %123 : vector<8x256xf32>
    %cst_23 = arith.constant 2.000000e-01 : f32
    %125 = vector.broadcast %cst_23 : f32 to vector<8x256xf32>
    %126 = arith.mulf %125, %124 : vector<8x256xf32>
    %127 = arith.maximumf %124, %126 : vector<8x256xf32>
    %128 = vector.extract_strided_slice %76 {offsets = [0, 0], sizes = [8, 240], strides = [1, 1]} : vector<8x256xf32> to vector<8x240xf32>
    %cst_24 = arith.constant 0.000000e+00 : f32
    %129 = vector.broadcast %cst_24 : f32 to vector<8x16xf32>
    %130 = tpu.concatenate %129, %128 in 1 : vector<8x16xf32>, vector<8x240xf32> -> vector<8x256xf32>
    %131 = vector.extract_strided_slice %130 {offsets = [0, 255], sizes = [8, 1], strides = [1, 1]} : vector<8x256xf32> to vector<8x1xf32>
    %132 = vector.extract_strided_slice %130 {offsets = [0, 0], sizes = [8, 255], strides = [1, 1]} : vector<8x256xf32> to vector<8x255xf32>
    %133 = tpu.concatenate %131, %132 in 1 : vector<8x1xf32>, vector<8x255xf32> -> vector<8x256xf32>
    %cst_25 = arith.constant 0.000000e+00 : f32
    %134 = vector.shape_cast %20 : vector<1x256xi1> to vector<1x256xi1>
    %135 = vector.broadcast %134 : vector<1x256xi1> to vector<8x256xi1>
    %136 = vector.broadcast %cst_25 : f32 to vector<8x256xf32>
    %137 = arith.select %135, %133, %136 : vector<8x256xi1>, vector<8x256xf32>
    %138 = vector.extract_strided_slice %130 {offsets = [0, 1], sizes = [8, 255], strides = [1, 1]} : vector<8x256xf32> to vector<8x255xf32>
    %139 = vector.extract_strided_slice %130 {offsets = [0, 0], sizes = [8, 1], strides = [1, 1]} : vector<8x256xf32> to vector<8x1xf32>
    %140 = tpu.concatenate %138, %139 in 1 : vector<8x255xf32>, vector<8x1xf32> -> vector<8x256xf32>
    %cst_26 = arith.constant 0.000000e+00 : f32
    %141 = vector.shape_cast %18 : vector<1x256xi1> to vector<1x256xi1>
    %142 = vector.broadcast %141 : vector<1x256xi1> to vector<8x256xi1>
    %143 = vector.broadcast %cst_26 : f32 to vector<8x256xf32>
    %144 = arith.select %142, %140, %143 : vector<8x256xi1>, vector<8x256xf32>
    %145 = vector.extract_strided_slice %76 {offsets = [0, 255], sizes = [8, 1], strides = [1, 1]} : vector<8x256xf32> to vector<8x1xf32>
    %146 = vector.extract_strided_slice %76 {offsets = [0, 0], sizes = [8, 255], strides = [1, 1]} : vector<8x256xf32> to vector<8x255xf32>
    %147 = tpu.concatenate %145, %146 in 1 : vector<8x1xf32>, vector<8x255xf32> -> vector<8x256xf32>
    %cst_27 = arith.constant 0.000000e+00 : f32
    %148 = vector.shape_cast %20 : vector<1x256xi1> to vector<1x256xi1>
    %149 = vector.broadcast %148 : vector<1x256xi1> to vector<8x256xi1>
    %150 = vector.broadcast %cst_27 : f32 to vector<8x256xf32>
    %151 = arith.select %149, %147, %150 : vector<8x256xi1>, vector<8x256xf32>
    %152 = vector.extract_strided_slice %76 {offsets = [0, 1], sizes = [8, 255], strides = [1, 1]} : vector<8x256xf32> to vector<8x255xf32>
    %153 = vector.extract_strided_slice %76 {offsets = [0, 0], sizes = [8, 1], strides = [1, 1]} : vector<8x256xf32> to vector<8x1xf32>
    %154 = tpu.concatenate %152, %153 in 1 : vector<8x255xf32>, vector<8x1xf32> -> vector<8x256xf32>
    %cst_28 = arith.constant 0.000000e+00 : f32
    %155 = vector.shape_cast %18 : vector<1x256xi1> to vector<1x256xi1>
    %156 = vector.broadcast %155 : vector<1x256xi1> to vector<8x256xi1>
    %157 = vector.broadcast %cst_28 : f32 to vector<8x256xf32>
    %158 = arith.select %156, %154, %157 : vector<8x256xi1>, vector<8x256xf32>
    %159 = vector.extract_strided_slice %76 {offsets = [0, 16], sizes = [8, 240], strides = [1, 1]} : vector<8x256xf32> to vector<8x240xf32>
    %cst_29 = arith.constant 0.000000e+00 : f32
    %160 = vector.broadcast %cst_29 : f32 to vector<8x16xf32>
    %161 = tpu.concatenate %159, %160 in 1 : vector<8x240xf32>, vector<8x16xf32> -> vector<8x256xf32>
    %162 = vector.extract_strided_slice %161 {offsets = [0, 255], sizes = [8, 1], strides = [1, 1]} : vector<8x256xf32> to vector<8x1xf32>
    %163 = vector.extract_strided_slice %161 {offsets = [0, 0], sizes = [8, 255], strides = [1, 1]} : vector<8x256xf32> to vector<8x255xf32>
    %164 = tpu.concatenate %162, %163 in 1 : vector<8x1xf32>, vector<8x255xf32> -> vector<8x256xf32>
    %cst_30 = arith.constant 0.000000e+00 : f32
    %165 = vector.shape_cast %20 : vector<1x256xi1> to vector<1x256xi1>
    %166 = vector.broadcast %165 : vector<1x256xi1> to vector<8x256xi1>
    %167 = vector.broadcast %cst_30 : f32 to vector<8x256xf32>
    %168 = arith.select %166, %164, %167 : vector<8x256xi1>, vector<8x256xf32>
    %169 = vector.extract_strided_slice %161 {offsets = [0, 1], sizes = [8, 255], strides = [1, 1]} : vector<8x256xf32> to vector<8x255xf32>
    %170 = vector.extract_strided_slice %161 {offsets = [0, 0], sizes = [8, 1], strides = [1, 1]} : vector<8x256xf32> to vector<8x1xf32>
    %171 = tpu.concatenate %169, %170 in 1 : vector<8x255xf32>, vector<8x1xf32> -> vector<8x256xf32>
    %cst_31 = arith.constant 0.000000e+00 : f32
    %172 = vector.shape_cast %18 : vector<1x256xi1> to vector<1x256xi1>
    %173 = vector.broadcast %172 : vector<1x256xi1> to vector<8x256xi1>
    %174 = vector.broadcast %cst_31 : f32 to vector<8x256xf32>
    %175 = arith.select %173, %171, %174 : vector<8x256xi1>, vector<8x256xf32>
    %176 = tpu.concatenate %137, %130, %144, %151, %76, %158, %168, %161, %175 in 0 : vector<8x256xf32>, vector<8x256xf32>, vector<8x256xf32>, vector<8x256xf32>, vector<8x256xf32>, vector<8x256xf32>, vector<8x256xf32>, vector<8x256xf32>, vector<8x256xf32> -> vector<72x256xf32>
    %177 = vector.extract_strided_slice %127 {offsets = [0, 0], sizes = [8, 240], strides = [1, 1]} : vector<8x256xf32> to vector<8x240xf32>
    %cst_32 = arith.constant 0.000000e+00 : f32
    %178 = vector.broadcast %cst_32 : f32 to vector<8x16xf32>
    %179 = tpu.concatenate %178, %177 in 1 : vector<8x16xf32>, vector<8x240xf32> -> vector<8x256xf32>
    %180 = vector.extract_strided_slice %179 {offsets = [0, 255], sizes = [8, 1], strides = [1, 1]} : vector<8x256xf32> to vector<8x1xf32>
    %181 = vector.extract_strided_slice %179 {offsets = [0, 0], sizes = [8, 255], strides = [1, 1]} : vector<8x256xf32> to vector<8x255xf32>
    %182 = tpu.concatenate %180, %181 in 1 : vector<8x1xf32>, vector<8x255xf32> -> vector<8x256xf32>
    %cst_33 = arith.constant 0.000000e+00 : f32
    %183 = vector.shape_cast %20 : vector<1x256xi1> to vector<1x256xi1>
    %184 = vector.broadcast %183 : vector<1x256xi1> to vector<8x256xi1>
    %185 = vector.broadcast %cst_33 : f32 to vector<8x256xf32>
    %186 = arith.select %184, %182, %185 : vector<8x256xi1>, vector<8x256xf32>
    %187 = vector.extract_strided_slice %179 {offsets = [0, 1], sizes = [8, 255], strides = [1, 1]} : vector<8x256xf32> to vector<8x255xf32>
    %188 = vector.extract_strided_slice %179 {offsets = [0, 0], sizes = [8, 1], strides = [1, 1]} : vector<8x256xf32> to vector<8x1xf32>
    %189 = tpu.concatenate %187, %188 in 1 : vector<8x255xf32>, vector<8x1xf32> -> vector<8x256xf32>
    %cst_34 = arith.constant 0.000000e+00 : f32
    %190 = vector.shape_cast %18 : vector<1x256xi1> to vector<1x256xi1>
    %191 = vector.broadcast %190 : vector<1x256xi1> to vector<8x256xi1>
    %192 = vector.broadcast %cst_34 : f32 to vector<8x256xf32>
    %193 = arith.select %191, %189, %192 : vector<8x256xi1>, vector<8x256xf32>
    %194 = vector.extract_strided_slice %127 {offsets = [0, 255], sizes = [8, 1], strides = [1, 1]} : vector<8x256xf32> to vector<8x1xf32>
    %195 = vector.extract_strided_slice %127 {offsets = [0, 0], sizes = [8, 255], strides = [1, 1]} : vector<8x256xf32> to vector<8x255xf32>
    %196 = tpu.concatenate %194, %195 in 1 : vector<8x1xf32>, vector<8x255xf32> -> vector<8x256xf32>
    %cst_35 = arith.constant 0.000000e+00 : f32
    %197 = vector.shape_cast %20 : vector<1x256xi1> to vector<1x256xi1>
    %198 = vector.broadcast %197 : vector<1x256xi1> to vector<8x256xi1>
    %199 = vector.broadcast %cst_35 : f32 to vector<8x256xf32>
    %200 = arith.select %198, %196, %199 : vector<8x256xi1>, vector<8x256xf32>
    %201 = vector.extract_strided_slice %127 {offsets = [0, 1], sizes = [8, 255], strides = [1, 1]} : vector<8x256xf32> to vector<8x255xf32>
    %202 = vector.extract_strided_slice %127 {offsets = [0, 0], sizes = [8, 1], strides = [1, 1]} : vector<8x256xf32> to vector<8x1xf32>
    %203 = tpu.concatenate %201, %202 in 1 : vector<8x255xf32>, vector<8x1xf32> -> vector<8x256xf32>
    %cst_36 = arith.constant 0.000000e+00 : f32
    %204 = vector.shape_cast %18 : vector<1x256xi1> to vector<1x256xi1>
    %205 = vector.broadcast %204 : vector<1x256xi1> to vector<8x256xi1>
    %206 = vector.broadcast %cst_36 : f32 to vector<8x256xf32>
    %207 = arith.select %205, %203, %206 : vector<8x256xi1>, vector<8x256xf32>
    %208 = vector.extract_strided_slice %127 {offsets = [0, 16], sizes = [8, 240], strides = [1, 1]} : vector<8x256xf32> to vector<8x240xf32>
    %cst_37 = arith.constant 0.000000e+00 : f32
    %209 = vector.broadcast %cst_37 : f32 to vector<8x16xf32>
    %210 = tpu.concatenate %208, %209 in 1 : vector<8x240xf32>, vector<8x16xf32> -> vector<8x256xf32>
    %211 = vector.extract_strided_slice %210 {offsets = [0, 255], sizes = [8, 1], strides = [1, 1]} : vector<8x256xf32> to vector<8x1xf32>
    %212 = vector.extract_strided_slice %210 {offsets = [0, 0], sizes = [8, 255], strides = [1, 1]} : vector<8x256xf32> to vector<8x255xf32>
    %213 = tpu.concatenate %211, %212 in 1 : vector<8x1xf32>, vector<8x255xf32> -> vector<8x256xf32>
    %cst_38 = arith.constant 0.000000e+00 : f32
    %214 = vector.shape_cast %20 : vector<1x256xi1> to vector<1x256xi1>
    %215 = vector.broadcast %214 : vector<1x256xi1> to vector<8x256xi1>
    %216 = vector.broadcast %cst_38 : f32 to vector<8x256xf32>
    %217 = arith.select %215, %213, %216 : vector<8x256xi1>, vector<8x256xf32>
    %218 = vector.extract_strided_slice %210 {offsets = [0, 1], sizes = [8, 255], strides = [1, 1]} : vector<8x256xf32> to vector<8x255xf32>
    %219 = vector.extract_strided_slice %210 {offsets = [0, 0], sizes = [8, 1], strides = [1, 1]} : vector<8x256xf32> to vector<8x1xf32>
    %220 = tpu.concatenate %218, %219 in 1 : vector<8x255xf32>, vector<8x1xf32> -> vector<8x256xf32>
    %cst_39 = arith.constant 0.000000e+00 : f32
    %221 = vector.shape_cast %18 : vector<1x256xi1> to vector<1x256xi1>
    %222 = vector.broadcast %221 : vector<1x256xi1> to vector<8x256xi1>
    %223 = vector.broadcast %cst_39 : f32 to vector<8x256xf32>
    %224 = arith.select %222, %220, %223 : vector<8x256xi1>, vector<8x256xf32>
    %225 = tpu.concatenate %186, %179, %193, %200, %127, %207, %217, %210, %224 in 0 : vector<8x256xf32>, vector<8x256xf32>, vector<8x256xf32>, vector<8x256xf32>, vector<8x256xf32>, vector<8x256xf32>, vector<8x256xf32>, vector<8x256xf32>, vector<8x256xf32> -> vector<72x256xf32>
    %c0_40 = arith.constant 0 : index
    %c0_41 = arith.constant 0 : index
    %226 = vector.load %arg6[%c0_40, %c0_41] : memref<8x72xf32, #tpu.memory_space<vmem>>, vector<8x72xf32>
    %cst_42 = arith.constant dense<0.000000e+00> : vector<8x256xf32>
    %227 = tpu.matmul %226, %176, %cst_42 {dimension_numbers = #tpu.dot_dimension_numbers<[1], [0], [0], [1], [0, 0, 1, 1], [], []>} : vector<8x72xf32>, vector<72x256xf32>, vector<8x256xf32> -> vector<8x256xf32>
    %c0_43 = arith.constant 0 : index
    %c0_44 = arith.constant 0 : index
    %228 = vector.load %arg7[%c0_43, %c0_44] : memref<8x72xf32, #tpu.memory_space<vmem>>, vector<8x72xf32>
    %cst_45 = arith.constant dense<0.000000e+00> : vector<8x256xf32>
    %229 = tpu.matmul %228, %225, %cst_45 {dimension_numbers = #tpu.dot_dimension_numbers<[1], [0], [0], [1], [0, 0, 1, 1], [], []>} : vector<8x72xf32>, vector<72x256xf32>, vector<8x256xf32> -> vector<8x256xf32>
    %230 = arith.addf %227, %229 : vector<8x256xf32>
    %c0_46 = arith.constant 0 : index
    %c0_47 = arith.constant 0 : index
    %231 = vector.load %arg8[%c0_46, %c0_47] : memref<8x1xf32, #tpu.memory_space<vmem>>, vector<8x1xf32>
    %232 = vector.broadcast %231 : vector<8x1xf32> to vector<8x256xf32>
    %233 = arith.addf %230, %232 : vector<8x256xf32>
    %cst_48 = arith.constant 2.000000e-01 : f32
    %234 = vector.broadcast %cst_48 : f32 to vector<8x256xf32>
    %235 = arith.mulf %234, %233 : vector<8x256xf32>
    %236 = arith.maximumf %233, %235 : vector<8x256xf32>
    %237 = vector.extract_strided_slice %236 {offsets = [0, 0], sizes = [8, 240], strides = [1, 1]} : vector<8x256xf32> to vector<8x240xf32>
    %cst_49 = arith.constant 0.000000e+00 : f32
    %238 = vector.broadcast %cst_49 : f32 to vector<8x16xf32>
    %239 = tpu.concatenate %238, %237 in 1 : vector<8x16xf32>, vector<8x240xf32> -> vector<8x256xf32>
    %240 = vector.extract_strided_slice %239 {offsets = [0, 255], sizes = [8, 1], strides = [1, 1]} : vector<8x256xf32> to vector<8x1xf32>
    %241 = vector.extract_strided_slice %239 {offsets = [0, 0], sizes = [8, 255], strides = [1, 1]} : vector<8x256xf32> to vector<8x255xf32>
    %242 = tpu.concatenate %240, %241 in 1 : vector<8x1xf32>, vector<8x255xf32> -> vector<8x256xf32>
    %cst_50 = arith.constant 0.000000e+00 : f32
    %243 = vector.shape_cast %20 : vector<1x256xi1> to vector<1x256xi1>
    %244 = vector.broadcast %243 : vector<1x256xi1> to vector<8x256xi1>
    %245 = vector.broadcast %cst_50 : f32 to vector<8x256xf32>
    %246 = arith.select %244, %242, %245 : vector<8x256xi1>, vector<8x256xf32>
    %247 = vector.extract_strided_slice %239 {offsets = [0, 1], sizes = [8, 255], strides = [1, 1]} : vector<8x256xf32> to vector<8x255xf32>
    %248 = vector.extract_strided_slice %239 {offsets = [0, 0], sizes = [8, 1], strides = [1, 1]} : vector<8x256xf32> to vector<8x1xf32>
    %249 = tpu.concatenate %247, %248 in 1 : vector<8x255xf32>, vector<8x1xf32> -> vector<8x256xf32>
    %cst_51 = arith.constant 0.000000e+00 : f32
    %250 = vector.shape_cast %18 : vector<1x256xi1> to vector<1x256xi1>
    %251 = vector.broadcast %250 : vector<1x256xi1> to vector<8x256xi1>
    %252 = vector.broadcast %cst_51 : f32 to vector<8x256xf32>
    %253 = arith.select %251, %249, %252 : vector<8x256xi1>, vector<8x256xf32>
    %254 = vector.extract_strided_slice %236 {offsets = [0, 255], sizes = [8, 1], strides = [1, 1]} : vector<8x256xf32> to vector<8x1xf32>
    %255 = vector.extract_strided_slice %236 {offsets = [0, 0], sizes = [8, 255], strides = [1, 1]} : vector<8x256xf32> to vector<8x255xf32>
    %256 = tpu.concatenate %254, %255 in 1 : vector<8x1xf32>, vector<8x255xf32> -> vector<8x256xf32>
    %cst_52 = arith.constant 0.000000e+00 : f32
    %257 = vector.shape_cast %20 : vector<1x256xi1> to vector<1x256xi1>
    %258 = vector.broadcast %257 : vector<1x256xi1> to vector<8x256xi1>
    %259 = vector.broadcast %cst_52 : f32 to vector<8x256xf32>
    %260 = arith.select %258, %256, %259 : vector<8x256xi1>, vector<8x256xf32>
    %261 = vector.extract_strided_slice %236 {offsets = [0, 1], sizes = [8, 255], strides = [1, 1]} : vector<8x256xf32> to vector<8x255xf32>
    %262 = vector.extract_strided_slice %236 {offsets = [0, 0], sizes = [8, 1], strides = [1, 1]} : vector<8x256xf32> to vector<8x1xf32>
    %263 = tpu.concatenate %261, %262 in 1 : vector<8x255xf32>, vector<8x1xf32> -> vector<8x256xf32>
    %cst_53 = arith.constant 0.000000e+00 : f32
    %264 = vector.shape_cast %18 : vector<1x256xi1> to vector<1x256xi1>
    %265 = vector.broadcast %264 : vector<1x256xi1> to vector<8x256xi1>
    %266 = vector.broadcast %cst_53 : f32 to vector<8x256xf32>
    %267 = arith.select %265, %263, %266 : vector<8x256xi1>, vector<8x256xf32>
    %268 = vector.extract_strided_slice %236 {offsets = [0, 16], sizes = [8, 240], strides = [1, 1]} : vector<8x256xf32> to vector<8x240xf32>
    %cst_54 = arith.constant 0.000000e+00 : f32
    %269 = vector.broadcast %cst_54 : f32 to vector<8x16xf32>
    %270 = tpu.concatenate %268, %269 in 1 : vector<8x240xf32>, vector<8x16xf32> -> vector<8x256xf32>
    %271 = vector.extract_strided_slice %270 {offsets = [0, 255], sizes = [8, 1], strides = [1, 1]} : vector<8x256xf32> to vector<8x1xf32>
    %272 = vector.extract_strided_slice %270 {offsets = [0, 0], sizes = [8, 255], strides = [1, 1]} : vector<8x256xf32> to vector<8x255xf32>
    %273 = tpu.concatenate %271, %272 in 1 : vector<8x1xf32>, vector<8x255xf32> -> vector<8x256xf32>
    %cst_55 = arith.constant 0.000000e+00 : f32
    %274 = vector.shape_cast %20 : vector<1x256xi1> to vector<1x256xi1>
    %275 = vector.broadcast %274 : vector<1x256xi1> to vector<8x256xi1>
    %276 = vector.broadcast %cst_55 : f32 to vector<8x256xf32>
    %277 = arith.select %275, %273, %276 : vector<8x256xi1>, vector<8x256xf32>
    %278 = vector.extract_strided_slice %270 {offsets = [0, 1], sizes = [8, 255], strides = [1, 1]} : vector<8x256xf32> to vector<8x255xf32>
    %279 = vector.extract_strided_slice %270 {offsets = [0, 0], sizes = [8, 1], strides = [1, 1]} : vector<8x256xf32> to vector<8x1xf32>
    %280 = tpu.concatenate %278, %279 in 1 : vector<8x255xf32>, vector<8x1xf32> -> vector<8x256xf32>
    %cst_56 = arith.constant 0.000000e+00 : f32
    %281 = vector.shape_cast %18 : vector<1x256xi1> to vector<1x256xi1>
    %282 = vector.broadcast %281 : vector<1x256xi1> to vector<8x256xi1>
    %283 = vector.broadcast %cst_56 : f32 to vector<8x256xf32>
    %284 = arith.select %282, %280, %283 : vector<8x256xi1>, vector<8x256xf32>
    %285 = tpu.concatenate %246, %239, %253, %260, %236, %267, %277, %270, %284 in 0 : vector<8x256xf32>, vector<8x256xf32>, vector<8x256xf32>, vector<8x256xf32>, vector<8x256xf32>, vector<8x256xf32>, vector<8x256xf32>, vector<8x256xf32>, vector<8x256xf32> -> vector<72x256xf32>
    %c0_57 = arith.constant 0 : index
    %c0_58 = arith.constant 0 : index
    %286 = vector.load %arg9[%c0_57, %c0_58] : memref<8x72xf32, #tpu.memory_space<vmem>>, vector<8x72xf32>
    %cst_59 = arith.constant dense<0.000000e+00> : vector<8x256xf32>
    %287 = tpu.matmul %286, %176, %cst_59 {dimension_numbers = #tpu.dot_dimension_numbers<[1], [0], [0], [1], [0, 0, 1, 1], [], []>} : vector<8x72xf32>, vector<72x256xf32>, vector<8x256xf32> -> vector<8x256xf32>
    %c0_60 = arith.constant 0 : index
    %c0_61 = arith.constant 0 : index
    %288 = vector.load %arg10[%c0_60, %c0_61] : memref<8x72xf32, #tpu.memory_space<vmem>>, vector<8x72xf32>
    %cst_62 = arith.constant dense<0.000000e+00> : vector<8x256xf32>
    %289 = tpu.matmul %288, %225, %cst_62 {dimension_numbers = #tpu.dot_dimension_numbers<[1], [0], [0], [1], [0, 0, 1, 1], [], []>} : vector<8x72xf32>, vector<72x256xf32>, vector<8x256xf32> -> vector<8x256xf32>
    %290 = arith.addf %287, %289 : vector<8x256xf32>
    %c0_63 = arith.constant 0 : index
    %c0_64 = arith.constant 0 : index
    %291 = vector.load %arg11[%c0_63, %c0_64] : memref<8x72xf32, #tpu.memory_space<vmem>>, vector<8x72xf32>
    %cst_65 = arith.constant dense<0.000000e+00> : vector<8x256xf32>
    %292 = tpu.matmul %291, %285, %cst_65 {dimension_numbers = #tpu.dot_dimension_numbers<[1], [0], [0], [1], [0, 0, 1, 1], [], []>} : vector<8x72xf32>, vector<72x256xf32>, vector<8x256xf32> -> vector<8x256xf32>
    %293 = arith.addf %290, %292 : vector<8x256xf32>
    %c0_66 = arith.constant 0 : index
    %c0_67 = arith.constant 0 : index
    %294 = vector.load %arg12[%c0_66, %c0_67] : memref<8x1xf32, #tpu.memory_space<vmem>>, vector<8x1xf32>
    %295 = vector.broadcast %294 : vector<8x1xf32> to vector<8x256xf32>
    %296 = arith.addf %293, %295 : vector<8x256xf32>
    %cst_68 = arith.constant 2.000000e-01 : f32
    %297 = vector.broadcast %cst_68 : f32 to vector<8x256xf32>
    %298 = arith.mulf %297, %296 : vector<8x256xf32>
    %299 = arith.maximumf %296, %298 : vector<8x256xf32>
    %cst_69 = arith.constant 4.000000e-01 : f32
    %300 = vector.broadcast %cst_69 : f32 to vector<8x256xf32>
    %301 = arith.mulf %299, %300 : vector<8x256xf32>
    %302 = arith.addf %301, %76 : vector<8x256xf32>
    %303 = vector.extract_strided_slice %302 {offsets = [0, 0], sizes = [8, 240], strides = [1, 1]} : vector<8x256xf32> to vector<8x240xf32>
    %304 = vector.extract_strided_slice %302 {offsets = [0, 0], sizes = [8, 16], strides = [1, 1]} : vector<8x256xf32> to vector<8x16xf32>
    %305 = tpu.concatenate %304, %303 in 1 : vector<8x16xf32>, vector<8x240xf32> -> vector<8x256xf32>
    %306 = vector.extract_strided_slice %305 {offsets = [0, 255], sizes = [8, 1], strides = [1, 1]} : vector<8x256xf32> to vector<8x1xf32>
    %307 = vector.extract_strided_slice %305 {offsets = [0, 0], sizes = [8, 255], strides = [1, 1]} : vector<8x256xf32> to vector<8x255xf32>
    %308 = tpu.concatenate %306, %307 in 1 : vector<8x1xf32>, vector<8x255xf32> -> vector<8x256xf32>
    %309 = vector.shape_cast %20 : vector<1x256xi1> to vector<1x256xi1>
    %310 = vector.broadcast %309 : vector<1x256xi1> to vector<8x256xi1>
    %311 = arith.select %310, %308, %305 : vector<8x256xi1>, vector<8x256xf32>
    %312 = vector.extract_strided_slice %305 {offsets = [0, 1], sizes = [8, 255], strides = [1, 1]} : vector<8x256xf32> to vector<8x255xf32>
    %313 = vector.extract_strided_slice %305 {offsets = [0, 0], sizes = [8, 1], strides = [1, 1]} : vector<8x256xf32> to vector<8x1xf32>
    %314 = tpu.concatenate %312, %313 in 1 : vector<8x255xf32>, vector<8x1xf32> -> vector<8x256xf32>
    %315 = vector.shape_cast %18 : vector<1x256xi1> to vector<1x256xi1>
    %316 = vector.broadcast %315 : vector<1x256xi1> to vector<8x256xi1>
    %317 = arith.select %316, %314, %305 : vector<8x256xi1>, vector<8x256xf32>
    %318 = vector.extract_strided_slice %302 {offsets = [0, 255], sizes = [8, 1], strides = [1, 1]} : vector<8x256xf32> to vector<8x1xf32>
    %319 = vector.extract_strided_slice %302 {offsets = [0, 0], sizes = [8, 255], strides = [1, 1]} : vector<8x256xf32> to vector<8x255xf32>
    %320 = tpu.concatenate %318, %319 in 1 : vector<8x1xf32>, vector<8x255xf32> -> vector<8x256xf32>
    %321 = vector.shape_cast %20 : vector<1x256xi1> to vector<1x256xi1>
    %322 = vector.broadcast %321 : vector<1x256xi1> to vector<8x256xi1>
    %323 = arith.select %322, %320, %302 : vector<8x256xi1>, vector<8x256xf32>
    %324 = vector.extract_strided_slice %302 {offsets = [0, 1], sizes = [8, 255], strides = [1, 1]} : vector<8x256xf32> to vector<8x255xf32>
    %325 = vector.extract_strided_slice %302 {offsets = [0, 0], sizes = [8, 1], strides = [1, 1]} : vector<8x256xf32> to vector<8x1xf32>
    %326 = tpu.concatenate %324, %325 in 1 : vector<8x255xf32>, vector<8x1xf32> -> vector<8x256xf32>
    %327 = vector.shape_cast %18 : vector<1x256xi1> to vector<1x256xi1>
    %328 = vector.broadcast %327 : vector<1x256xi1> to vector<8x256xi1>
    %329 = arith.select %328, %326, %302 : vector<8x256xi1>, vector<8x256xf32>
    %330 = vector.extract_strided_slice %302 {offsets = [0, 16], sizes = [8, 240], strides = [1, 1]} : vector<8x256xf32> to vector<8x240xf32>
    %331 = vector.extract_strided_slice %302 {offsets = [0, 240], sizes = [8, 16], strides = [1, 1]} : vector<8x256xf32> to vector<8x16xf32>
    %332 = tpu.concatenate %330, %331 in 1 : vector<8x240xf32>, vector<8x16xf32> -> vector<8x256xf32>
    %333 = vector.extract_strided_slice %332 {offsets = [0, 255], sizes = [8, 1], strides = [1, 1]} : vector<8x256xf32> to vector<8x1xf32>
    %334 = vector.extract_strided_slice %332 {offsets = [0, 0], sizes = [8, 255], strides = [1, 1]} : vector<8x256xf32> to vector<8x255xf32>
    %335 = tpu.concatenate %333, %334 in 1 : vector<8x1xf32>, vector<8x255xf32> -> vector<8x256xf32>
    %336 = vector.shape_cast %20 : vector<1x256xi1> to vector<1x256xi1>
    %337 = vector.broadcast %336 : vector<1x256xi1> to vector<8x256xi1>
    %338 = arith.select %337, %335, %332 : vector<8x256xi1>, vector<8x256xf32>
    %339 = vector.extract_strided_slice %332 {offsets = [0, 1], sizes = [8, 255], strides = [1, 1]} : vector<8x256xf32> to vector<8x255xf32>
    %340 = vector.extract_strided_slice %332 {offsets = [0, 0], sizes = [8, 1], strides = [1, 1]} : vector<8x256xf32> to vector<8x1xf32>
    %341 = tpu.concatenate %339, %340 in 1 : vector<8x255xf32>, vector<8x1xf32> -> vector<8x256xf32>
    %342 = vector.shape_cast %18 : vector<1x256xi1> to vector<1x256xi1>
    %343 = vector.broadcast %342 : vector<1x256xi1> to vector<8x256xi1>
    %344 = arith.select %343, %341, %332 : vector<8x256xi1>, vector<8x256xf32>
    %345 = tpu.concatenate %311, %305, %317, %323, %302, %329, %338, %332, %344 in 0 : vector<8x256xf32>, vector<8x256xf32>, vector<8x256xf32>, vector<8x256xf32>, vector<8x256xf32>, vector<8x256xf32>, vector<8x256xf32>, vector<8x256xf32>, vector<8x256xf32> -> vector<72x256xf32>
    %c0_70 = arith.constant 0 : index
    %c0_71 = arith.constant 0 : index
    %346 = vector.load %arg13[%c0_70, %c0_71] : memref<8x72xf32, #tpu.memory_space<vmem>>, vector<8x72xf32>
    %cst_72 = arith.constant dense<0.000000e+00> : vector<8x256xf32>
    %347 = tpu.matmul %346, %345, %cst_72 {dimension_numbers = #tpu.dot_dimension_numbers<[1], [0], [0], [1], [0, 0, 1, 1], [], []>} : vector<8x72xf32>, vector<72x256xf32>, vector<8x256xf32> -> vector<8x256xf32>
    %c0_73 = arith.constant 0 : index
    %c0_74 = arith.constant 0 : index
    %348 = vector.load %arg14[%c0_73, %c0_74] : memref<8x1xf32, #tpu.memory_space<vmem>>, vector<8x1xf32>
    %349 = vector.broadcast %348 : vector<8x1xf32> to vector<8x256xf32>
    %350 = arith.addf %347, %349 : vector<8x256xf32>
    %cst_75 = arith.constant 2.000000e-01 : f32
    %351 = vector.broadcast %cst_75 : f32 to vector<8x256xf32>
    %352 = arith.mulf %351, %350 : vector<8x256xf32>
    %353 = arith.maximumf %350, %352 : vector<8x256xf32>
    %354 = vector.extract_strided_slice %302 {offsets = [0, 0], sizes = [8, 240], strides = [1, 1]} : vector<8x256xf32> to vector<8x240xf32>
    %cst_76 = arith.constant 0.000000e+00 : f32
    %355 = vector.broadcast %cst_76 : f32 to vector<8x16xf32>
    %356 = tpu.concatenate %355, %354 in 1 : vector<8x16xf32>, vector<8x240xf32> -> vector<8x256xf32>
    %357 = vector.extract_strided_slice %356 {offsets = [0, 255], sizes = [8, 1], strides = [1, 1]} : vector<8x256xf32> to vector<8x1xf32>
    %358 = vector.extract_strided_slice %356 {offsets = [0, 0], sizes = [8, 255], strides = [1, 1]} : vector<8x256xf32> to vector<8x255xf32>
    %359 = tpu.concatenate %357, %358 in 1 : vector<8x1xf32>, vector<8x255xf32> -> vector<8x256xf32>
    %cst_77 = arith.constant 0.000000e+00 : f32
    %360 = vector.shape_cast %20 : vector<1x256xi1> to vector<1x256xi1>
    %361 = vector.broadcast %360 : vector<1x256xi1> to vector<8x256xi1>
    %362 = vector.broadcast %cst_77 : f32 to vector<8x256xf32>
    %363 = arith.select %361, %359, %362 : vector<8x256xi1>, vector<8x256xf32>
    %364 = vector.extract_strided_slice %356 {offsets = [0, 1], sizes = [8, 255], strides = [1, 1]} : vector<8x256xf32> to vector<8x255xf32>
    %365 = vector.extract_strided_slice %356 {offsets = [0, 0], sizes = [8, 1], strides = [1, 1]} : vector<8x256xf32> to vector<8x1xf32>
    %366 = tpu.concatenate %364, %365 in 1 : vector<8x255xf32>, vector<8x1xf32> -> vector<8x256xf32>
    %cst_78 = arith.constant 0.000000e+00 : f32
    %367 = vector.shape_cast %18 : vector<1x256xi1> to vector<1x256xi1>
    %368 = vector.broadcast %367 : vector<1x256xi1> to vector<8x256xi1>
    %369 = vector.broadcast %cst_78 : f32 to vector<8x256xf32>
    %370 = arith.select %368, %366, %369 : vector<8x256xi1>, vector<8x256xf32>
    %371 = vector.extract_strided_slice %302 {offsets = [0, 255], sizes = [8, 1], strides = [1, 1]} : vector<8x256xf32> to vector<8x1xf32>
    %372 = vector.extract_strided_slice %302 {offsets = [0, 0], sizes = [8, 255], strides = [1, 1]} : vector<8x256xf32> to vector<8x255xf32>
    %373 = tpu.concatenate %371, %372 in 1 : vector<8x1xf32>, vector<8x255xf32> -> vector<8x256xf32>
    %cst_79 = arith.constant 0.000000e+00 : f32
    %374 = vector.shape_cast %20 : vector<1x256xi1> to vector<1x256xi1>
    %375 = vector.broadcast %374 : vector<1x256xi1> to vector<8x256xi1>
    %376 = vector.broadcast %cst_79 : f32 to vector<8x256xf32>
    %377 = arith.select %375, %373, %376 : vector<8x256xi1>, vector<8x256xf32>
    %378 = vector.extract_strided_slice %302 {offsets = [0, 1], sizes = [8, 255], strides = [1, 1]} : vector<8x256xf32> to vector<8x255xf32>
    %379 = vector.extract_strided_slice %302 {offsets = [0, 0], sizes = [8, 1], strides = [1, 1]} : vector<8x256xf32> to vector<8x1xf32>
    %380 = tpu.concatenate %378, %379 in 1 : vector<8x255xf32>, vector<8x1xf32> -> vector<8x256xf32>
    %cst_80 = arith.constant 0.000000e+00 : f32
    %381 = vector.shape_cast %18 : vector<1x256xi1> to vector<1x256xi1>
    %382 = vector.broadcast %381 : vector<1x256xi1> to vector<8x256xi1>
    %383 = vector.broadcast %cst_80 : f32 to vector<8x256xf32>
    %384 = arith.select %382, %380, %383 : vector<8x256xi1>, vector<8x256xf32>
    %385 = vector.extract_strided_slice %302 {offsets = [0, 16], sizes = [8, 240], strides = [1, 1]} : vector<8x256xf32> to vector<8x240xf32>
    %cst_81 = arith.constant 0.000000e+00 : f32
    %386 = vector.broadcast %cst_81 : f32 to vector<8x16xf32>
    %387 = tpu.concatenate %385, %386 in 1 : vector<8x240xf32>, vector<8x16xf32> -> vector<8x256xf32>
    %388 = vector.extract_strided_slice %387 {offsets = [0, 255], sizes = [8, 1], strides = [1, 1]} : vector<8x256xf32> to vector<8x1xf32>
    %389 = vector.extract_strided_slice %387 {offsets = [0, 0], sizes = [8, 255], strides = [1, 1]} : vector<8x256xf32> to vector<8x255xf32>
    %390 = tpu.concatenate %388, %389 in 1 : vector<8x1xf32>, vector<8x255xf32> -> vector<8x256xf32>
    %cst_82 = arith.constant 0.000000e+00 : f32
    %391 = vector.shape_cast %20 : vector<1x256xi1> to vector<1x256xi1>
    %392 = vector.broadcast %391 : vector<1x256xi1> to vector<8x256xi1>
    %393 = vector.broadcast %cst_82 : f32 to vector<8x256xf32>
    %394 = arith.select %392, %390, %393 : vector<8x256xi1>, vector<8x256xf32>
    %395 = vector.extract_strided_slice %387 {offsets = [0, 1], sizes = [8, 255], strides = [1, 1]} : vector<8x256xf32> to vector<8x255xf32>
    %396 = vector.extract_strided_slice %387 {offsets = [0, 0], sizes = [8, 1], strides = [1, 1]} : vector<8x256xf32> to vector<8x1xf32>
    %397 = tpu.concatenate %395, %396 in 1 : vector<8x255xf32>, vector<8x1xf32> -> vector<8x256xf32>
    %cst_83 = arith.constant 0.000000e+00 : f32
    %398 = vector.shape_cast %18 : vector<1x256xi1> to vector<1x256xi1>
    %399 = vector.broadcast %398 : vector<1x256xi1> to vector<8x256xi1>
    %400 = vector.broadcast %cst_83 : f32 to vector<8x256xf32>
    %401 = arith.select %399, %397, %400 : vector<8x256xi1>, vector<8x256xf32>
    %402 = tpu.concatenate %363, %356, %370, %377, %302, %384, %394, %387, %401 in 0 : vector<8x256xf32>, vector<8x256xf32>, vector<8x256xf32>, vector<8x256xf32>, vector<8x256xf32>, vector<8x256xf32>, vector<8x256xf32>, vector<8x256xf32>, vector<8x256xf32> -> vector<72x256xf32>
    %403 = vector.extract_strided_slice %353 {offsets = [0, 0], sizes = [8, 240], strides = [1, 1]} : vector<8x256xf32> to vector<8x240xf32>
    %cst_84 = arith.constant 0.000000e+00 : f32
    %404 = vector.broadcast %cst_84 : f32 to vector<8x16xf32>
    %405 = tpu.concatenate %404, %403 in 1 : vector<8x16xf32>, vector<8x240xf32> -> vector<8x256xf32>
    %406 = vector.extract_strided_slice %405 {offsets = [0, 255], sizes = [8, 1], strides = [1, 1]} : vector<8x256xf32> to vector<8x1xf32>
    %407 = vector.extract_strided_slice %405 {offsets = [0, 0], sizes = [8, 255], strides = [1, 1]} : vector<8x256xf32> to vector<8x255xf32>
    %408 = tpu.concatenate %406, %407 in 1 : vector<8x1xf32>, vector<8x255xf32> -> vector<8x256xf32>
    %cst_85 = arith.constant 0.000000e+00 : f32
    %409 = vector.shape_cast %20 : vector<1x256xi1> to vector<1x256xi1>
    %410 = vector.broadcast %409 : vector<1x256xi1> to vector<8x256xi1>
    %411 = vector.broadcast %cst_85 : f32 to vector<8x256xf32>
    %412 = arith.select %410, %408, %411 : vector<8x256xi1>, vector<8x256xf32>
    %413 = vector.extract_strided_slice %405 {offsets = [0, 1], sizes = [8, 255], strides = [1, 1]} : vector<8x256xf32> to vector<8x255xf32>
    %414 = vector.extract_strided_slice %405 {offsets = [0, 0], sizes = [8, 1], strides = [1, 1]} : vector<8x256xf32> to vector<8x1xf32>
    %415 = tpu.concatenate %413, %414 in 1 : vector<8x255xf32>, vector<8x1xf32> -> vector<8x256xf32>
    %cst_86 = arith.constant 0.000000e+00 : f32
    %416 = vector.shape_cast %18 : vector<1x256xi1> to vector<1x256xi1>
    %417 = vector.broadcast %416 : vector<1x256xi1> to vector<8x256xi1>
    %418 = vector.broadcast %cst_86 : f32 to vector<8x256xf32>
    %419 = arith.select %417, %415, %418 : vector<8x256xi1>, vector<8x256xf32>
    %420 = vector.extract_strided_slice %353 {offsets = [0, 255], sizes = [8, 1], strides = [1, 1]} : vector<8x256xf32> to vector<8x1xf32>
    %421 = vector.extract_strided_slice %353 {offsets = [0, 0], sizes = [8, 255], strides = [1, 1]} : vector<8x256xf32> to vector<8x255xf32>
    %422 = tpu.concatenate %420, %421 in 1 : vector<8x1xf32>, vector<8x255xf32> -> vector<8x256xf32>
    %cst_87 = arith.constant 0.000000e+00 : f32
    %423 = vector.shape_cast %20 : vector<1x256xi1> to vector<1x256xi1>
    %424 = vector.broadcast %423 : vector<1x256xi1> to vector<8x256xi1>
    %425 = vector.broadcast %cst_87 : f32 to vector<8x256xf32>
    %426 = arith.select %424, %422, %425 : vector<8x256xi1>, vector<8x256xf32>
    %427 = vector.extract_strided_slice %353 {offsets = [0, 1], sizes = [8, 255], strides = [1, 1]} : vector<8x256xf32> to vector<8x255xf32>
    %428 = vector.extract_strided_slice %353 {offsets = [0, 0], sizes = [8, 1], strides = [1, 1]} : vector<8x256xf32> to vector<8x1xf32>
    %429 = tpu.concatenate %427, %428 in 1 : vector<8x255xf32>, vector<8x1xf32> -> vector<8x256xf32>
    %cst_88 = arith.constant 0.000000e+00 : f32
    %430 = vector.shape_cast %18 : vector<1x256xi1> to vector<1x256xi1>
    %431 = vector.broadcast %430 : vector<1x256xi1> to vector<8x256xi1>
    %432 = vector.broadcast %cst_88 : f32 to vector<8x256xf32>
    %433 = arith.select %431, %429, %432 : vector<8x256xi1>, vector<8x256xf32>
    %434 = vector.extract_strided_slice %353 {offsets = [0, 16], sizes = [8, 240], strides = [1, 1]} : vector<8x256xf32> to vector<8x240xf32>
    %cst_89 = arith.constant 0.000000e+00 : f32
    %435 = vector.broadcast %cst_89 : f32 to vector<8x16xf32>
    %436 = tpu.concatenate %434, %435 in 1 : vector<8x240xf32>, vector<8x16xf32> -> vector<8x256xf32>
    %437 = vector.extract_strided_slice %436 {offsets = [0, 255], sizes = [8, 1], strides = [1, 1]} : vector<8x256xf32> to vector<8x1xf32>
    %438 = vector.extract_strided_slice %436 {offsets = [0, 0], sizes = [8, 255], strides = [1, 1]} : vector<8x256xf32> to vector<8x255xf32>
    %439 = tpu.concatenate %437, %438 in 1 : vector<8x1xf32>, vector<8x255xf32> -> vector<8x256xf32>
    %cst_90 = arith.constant 0.000000e+00 : f32
    %440 = vector.shape_cast %20 : vector<1x256xi1> to vector<1x256xi1>
    %441 = vector.broadcast %440 : vector<1x256xi1> to vector<8x256xi1>
    %442 = vector.broadcast %cst_90 : f32 to vector<8x256xf32>
    %443 = arith.select %441, %439, %442 : vector<8x256xi1>, vector<8x256xf32>
    %444 = vector.extract_strided_slice %436 {offsets = [0, 1], sizes = [8, 255], strides = [1, 1]} : vector<8x256xf32> to vector<8x255xf32>
    %445 = vector.extract_strided_slice %436 {offsets = [0, 0], sizes = [8, 1], strides = [1, 1]} : vector<8x256xf32> to vector<8x1xf32>
    %446 = tpu.concatenate %444, %445 in 1 : vector<8x255xf32>, vector<8x1xf32> -> vector<8x256xf32>
    %cst_91 = arith.constant 0.000000e+00 : f32
    %447 = vector.shape_cast %18 : vector<1x256xi1> to vector<1x256xi1>
    %448 = vector.broadcast %447 : vector<1x256xi1> to vector<8x256xi1>
    %449 = vector.broadcast %cst_91 : f32 to vector<8x256xf32>
    %450 = arith.select %448, %446, %449 : vector<8x256xi1>, vector<8x256xf32>
    %451 = tpu.concatenate %412, %405, %419, %426, %353, %433, %443, %436, %450 in 0 : vector<8x256xf32>, vector<8x256xf32>, vector<8x256xf32>, vector<8x256xf32>, vector<8x256xf32>, vector<8x256xf32>, vector<8x256xf32>, vector<8x256xf32>, vector<8x256xf32> -> vector<72x256xf32>
    %c0_92 = arith.constant 0 : index
    %c0_93 = arith.constant 0 : index
    %452 = vector.load %arg15[%c0_92, %c0_93] : memref<8x72xf32, #tpu.memory_space<vmem>>, vector<8x72xf32>
    %cst_94 = arith.constant dense<0.000000e+00> : vector<8x256xf32>
    %453 = tpu.matmul %452, %402, %cst_94 {dimension_numbers = #tpu.dot_dimension_numbers<[1], [0], [0], [1], [0, 0, 1, 1], [], []>} : vector<8x72xf32>, vector<72x256xf32>, vector<8x256xf32> -> vector<8x256xf32>
    %c0_95 = arith.constant 0 : index
    %c0_96 = arith.constant 0 : index
    %454 = vector.load %arg16[%c0_95, %c0_96] : memref<8x72xf32, #tpu.memory_space<vmem>>, vector<8x72xf32>
    %cst_97 = arith.constant dense<0.000000e+00> : vector<8x256xf32>
    %455 = tpu.matmul %454, %451, %cst_97 {dimension_numbers = #tpu.dot_dimension_numbers<[1], [0], [0], [1], [0, 0, 1, 1], [], []>} : vector<8x72xf32>, vector<72x256xf32>, vector<8x256xf32> -> vector<8x256xf32>
    %456 = arith.addf %453, %455 : vector<8x256xf32>
    %c0_98 = arith.constant 0 : index
    %c0_99 = arith.constant 0 : index
    %457 = vector.load %arg17[%c0_98, %c0_99] : memref<8x1xf32, #tpu.memory_space<vmem>>, vector<8x1xf32>
    %458 = vector.broadcast %457 : vector<8x1xf32> to vector<8x256xf32>
    %459 = arith.addf %456, %458 : vector<8x256xf32>
    %cst_100 = arith.constant 2.000000e-01 : f32
    %460 = vector.broadcast %cst_100 : f32 to vector<8x256xf32>
    %461 = arith.mulf %460, %459 : vector<8x256xf32>
    %462 = arith.maximumf %459, %461 : vector<8x256xf32>
    %463 = vector.extract_strided_slice %462 {offsets = [0, 0], sizes = [8, 240], strides = [1, 1]} : vector<8x256xf32> to vector<8x240xf32>
    %cst_101 = arith.constant 0.000000e+00 : f32
    %464 = vector.broadcast %cst_101 : f32 to vector<8x16xf32>
    %465 = tpu.concatenate %464, %463 in 1 : vector<8x16xf32>, vector<8x240xf32> -> vector<8x256xf32>
    %466 = vector.extract_strided_slice %465 {offsets = [0, 255], sizes = [8, 1], strides = [1, 1]} : vector<8x256xf32> to vector<8x1xf32>
    %467 = vector.extract_strided_slice %465 {offsets = [0, 0], sizes = [8, 255], strides = [1, 1]} : vector<8x256xf32> to vector<8x255xf32>
    %468 = tpu.concatenate %466, %467 in 1 : vector<8x1xf32>, vector<8x255xf32> -> vector<8x256xf32>
    %cst_102 = arith.constant 0.000000e+00 : f32
    %469 = vector.shape_cast %20 : vector<1x256xi1> to vector<1x256xi1>
    %470 = vector.broadcast %469 : vector<1x256xi1> to vector<8x256xi1>
    %471 = vector.broadcast %cst_102 : f32 to vector<8x256xf32>
    %472 = arith.select %470, %468, %471 : vector<8x256xi1>, vector<8x256xf32>
    %473 = vector.extract_strided_slice %465 {offsets = [0, 1], sizes = [8, 255], strides = [1, 1]} : vector<8x256xf32> to vector<8x255xf32>
    %474 = vector.extract_strided_slice %465 {offsets = [0, 0], sizes = [8, 1], strides = [1, 1]} : vector<8x256xf32> to vector<8x1xf32>
    %475 = tpu.concatenate %473, %474 in 1 : vector<8x255xf32>, vector<8x1xf32> -> vector<8x256xf32>
    %cst_103 = arith.constant 0.000000e+00 : f32
    %476 = vector.shape_cast %18 : vector<1x256xi1> to vector<1x256xi1>
    %477 = vector.broadcast %476 : vector<1x256xi1> to vector<8x256xi1>
    %478 = vector.broadcast %cst_103 : f32 to vector<8x256xf32>
    %479 = arith.select %477, %475, %478 : vector<8x256xi1>, vector<8x256xf32>
    %480 = vector.extract_strided_slice %462 {offsets = [0, 255], sizes = [8, 1], strides = [1, 1]} : vector<8x256xf32> to vector<8x1xf32>
    %481 = vector.extract_strided_slice %462 {offsets = [0, 0], sizes = [8, 255], strides = [1, 1]} : vector<8x256xf32> to vector<8x255xf32>
    %482 = tpu.concatenate %480, %481 in 1 : vector<8x1xf32>, vector<8x255xf32> -> vector<8x256xf32>
    %cst_104 = arith.constant 0.000000e+00 : f32
    %483 = vector.shape_cast %20 : vector<1x256xi1> to vector<1x256xi1>
    %484 = vector.broadcast %483 : vector<1x256xi1> to vector<8x256xi1>
    %485 = vector.broadcast %cst_104 : f32 to vector<8x256xf32>
    %486 = arith.select %484, %482, %485 : vector<8x256xi1>, vector<8x256xf32>
    %487 = vector.extract_strided_slice %462 {offsets = [0, 1], sizes = [8, 255], strides = [1, 1]} : vector<8x256xf32> to vector<8x255xf32>
    %488 = vector.extract_strided_slice %462 {offsets = [0, 0], sizes = [8, 1], strides = [1, 1]} : vector<8x256xf32> to vector<8x1xf32>
    %489 = tpu.concatenate %487, %488 in 1 : vector<8x255xf32>, vector<8x1xf32> -> vector<8x256xf32>
    %cst_105 = arith.constant 0.000000e+00 : f32
    %490 = vector.shape_cast %18 : vector<1x256xi1> to vector<1x256xi1>
    %491 = vector.broadcast %490 : vector<1x256xi1> to vector<8x256xi1>
    %492 = vector.broadcast %cst_105 : f32 to vector<8x256xf32>
    %493 = arith.select %491, %489, %492 : vector<8x256xi1>, vector<8x256xf32>
    %494 = vector.extract_strided_slice %462 {offsets = [0, 16], sizes = [8, 240], strides = [1, 1]} : vector<8x256xf32> to vector<8x240xf32>
    %cst_106 = arith.constant 0.000000e+00 : f32
    %495 = vector.broadcast %cst_106 : f32 to vector<8x16xf32>
    %496 = tpu.concatenate %494, %495 in 1 : vector<8x240xf32>, vector<8x16xf32> -> vector<8x256xf32>
    %497 = vector.extract_strided_slice %496 {offsets = [0, 255], sizes = [8, 1], strides = [1, 1]} : vector<8x256xf32> to vector<8x1xf32>
    %498 = vector.extract_strided_slice %496 {offsets = [0, 0], sizes = [8, 255], strides = [1, 1]} : vector<8x256xf32> to vector<8x255xf32>
    %499 = tpu.concatenate %497, %498 in 1 : vector<8x1xf32>, vector<8x255xf32> -> vector<8x256xf32>
    %cst_107 = arith.constant 0.000000e+00 : f32
    %500 = vector.shape_cast %20 : vector<1x256xi1> to vector<1x256xi1>
    %501 = vector.broadcast %500 : vector<1x256xi1> to vector<8x256xi1>
    %502 = vector.broadcast %cst_107 : f32 to vector<8x256xf32>
    %503 = arith.select %501, %499, %502 : vector<8x256xi1>, vector<8x256xf32>
    %504 = vector.extract_strided_slice %496 {offsets = [0, 1], sizes = [8, 255], strides = [1, 1]} : vector<8x256xf32> to vector<8x255xf32>
    %505 = vector.extract_strided_slice %496 {offsets = [0, 0], sizes = [8, 1], strides = [1, 1]} : vector<8x256xf32> to vector<8x1xf32>
    %506 = tpu.concatenate %504, %505 in 1 : vector<8x255xf32>, vector<8x1xf32> -> vector<8x256xf32>
    %cst_108 = arith.constant 0.000000e+00 : f32
    %507 = vector.shape_cast %18 : vector<1x256xi1> to vector<1x256xi1>
    %508 = vector.broadcast %507 : vector<1x256xi1> to vector<8x256xi1>
    %509 = vector.broadcast %cst_108 : f32 to vector<8x256xf32>
    %510 = arith.select %508, %506, %509 : vector<8x256xi1>, vector<8x256xf32>
    %511 = tpu.concatenate %472, %465, %479, %486, %462, %493, %503, %496, %510 in 0 : vector<8x256xf32>, vector<8x256xf32>, vector<8x256xf32>, vector<8x256xf32>, vector<8x256xf32>, vector<8x256xf32>, vector<8x256xf32>, vector<8x256xf32>, vector<8x256xf32> -> vector<72x256xf32>
    %c0_109 = arith.constant 0 : index
    %c0_110 = arith.constant 0 : index
    %512 = vector.load %arg18[%c0_109, %c0_110] : memref<8x72xf32, #tpu.memory_space<vmem>>, vector<8x72xf32>
    %cst_111 = arith.constant dense<0.000000e+00> : vector<8x256xf32>
    %513 = tpu.matmul %512, %402, %cst_111 {dimension_numbers = #tpu.dot_dimension_numbers<[1], [0], [0], [1], [0, 0, 1, 1], [], []>} : vector<8x72xf32>, vector<72x256xf32>, vector<8x256xf32> -> vector<8x256xf32>
    %c0_112 = arith.constant 0 : index
    %c0_113 = arith.constant 0 : index
    %514 = vector.load %arg19[%c0_112, %c0_113] : memref<8x72xf32, #tpu.memory_space<vmem>>, vector<8x72xf32>
    %cst_114 = arith.constant dense<0.000000e+00> : vector<8x256xf32>
    %515 = tpu.matmul %514, %451, %cst_114 {dimension_numbers = #tpu.dot_dimension_numbers<[1], [0], [0], [1], [0, 0, 1, 1], [], []>} : vector<8x72xf32>, vector<72x256xf32>, vector<8x256xf32> -> vector<8x256xf32>
    %516 = arith.addf %513, %515 : vector<8x256xf32>
    %c0_115 = arith.constant 0 : index
    %c0_116 = arith.constant 0 : index
    %517 = vector.load %arg20[%c0_115, %c0_116] : memref<8x72xf32, #tpu.memory_space<vmem>>, vector<8x72xf32>
    %cst_117 = arith.constant dense<0.000000e+00> : vector<8x256xf32>
    %518 = tpu.matmul %517, %511, %cst_117 {dimension_numbers = #tpu.dot_dimension_numbers<[1], [0], [0], [1], [0, 0, 1, 1], [], []>} : vector<8x72xf32>, vector<72x256xf32>, vector<8x256xf32> -> vector<8x256xf32>
    %519 = arith.addf %516, %518 : vector<8x256xf32>
    %c0_118 = arith.constant 0 : index
    %c0_119 = arith.constant 0 : index
    %520 = vector.load %arg21[%c0_118, %c0_119] : memref<8x1xf32, #tpu.memory_space<vmem>>, vector<8x1xf32>
    %521 = vector.broadcast %520 : vector<8x1xf32> to vector<8x256xf32>
    %522 = arith.addf %519, %521 : vector<8x256xf32>
    %cst_120 = arith.constant 2.000000e-01 : f32
    %523 = vector.broadcast %cst_120 : f32 to vector<8x256xf32>
    %524 = arith.mulf %523, %522 : vector<8x256xf32>
    %525 = arith.maximumf %522, %524 : vector<8x256xf32>
    %cst_121 = arith.constant 4.000000e-01 : f32
    %526 = vector.broadcast %cst_121 : f32 to vector<8x256xf32>
    %527 = arith.mulf %525, %526 : vector<8x256xf32>
    %528 = arith.addf %527, %302 : vector<8x256xf32>
    %529 = vector.extract_strided_slice %528 {offsets = [0, 0], sizes = [8, 240], strides = [1, 1]} : vector<8x256xf32> to vector<8x240xf32>
    %530 = vector.extract_strided_slice %528 {offsets = [0, 0], sizes = [8, 16], strides = [1, 1]} : vector<8x256xf32> to vector<8x16xf32>
    %531 = tpu.concatenate %530, %529 in 1 : vector<8x16xf32>, vector<8x240xf32> -> vector<8x256xf32>
    %532 = vector.extract_strided_slice %531 {offsets = [0, 255], sizes = [8, 1], strides = [1, 1]} : vector<8x256xf32> to vector<8x1xf32>
    %533 = vector.extract_strided_slice %531 {offsets = [0, 0], sizes = [8, 255], strides = [1, 1]} : vector<8x256xf32> to vector<8x255xf32>
    %534 = tpu.concatenate %532, %533 in 1 : vector<8x1xf32>, vector<8x255xf32> -> vector<8x256xf32>
    %535 = vector.shape_cast %20 : vector<1x256xi1> to vector<1x256xi1>
    %536 = vector.broadcast %535 : vector<1x256xi1> to vector<8x256xi1>
    %537 = arith.select %536, %534, %531 : vector<8x256xi1>, vector<8x256xf32>
    %538 = vector.extract_strided_slice %531 {offsets = [0, 1], sizes = [8, 255], strides = [1, 1]} : vector<8x256xf32> to vector<8x255xf32>
    %539 = vector.extract_strided_slice %531 {offsets = [0, 0], sizes = [8, 1], strides = [1, 1]} : vector<8x256xf32> to vector<8x1xf32>
    %540 = tpu.concatenate %538, %539 in 1 : vector<8x255xf32>, vector<8x1xf32> -> vector<8x256xf32>
    %541 = vector.shape_cast %18 : vector<1x256xi1> to vector<1x256xi1>
    %542 = vector.broadcast %541 : vector<1x256xi1> to vector<8x256xi1>
    %543 = arith.select %542, %540, %531 : vector<8x256xi1>, vector<8x256xf32>
    %544 = vector.extract_strided_slice %528 {offsets = [0, 255], sizes = [8, 1], strides = [1, 1]} : vector<8x256xf32> to vector<8x1xf32>
    %545 = vector.extract_strided_slice %528 {offsets = [0, 0], sizes = [8, 255], strides = [1, 1]} : vector<8x256xf32> to vector<8x255xf32>
    %546 = tpu.concatenate %544, %545 in 1 : vector<8x1xf32>, vector<8x255xf32> -> vector<8x256xf32>
    %547 = vector.shape_cast %20 : vector<1x256xi1> to vector<1x256xi1>
    %548 = vector.broadcast %547 : vector<1x256xi1> to vector<8x256xi1>
    %549 = arith.select %548, %546, %528 : vector<8x256xi1>, vector<8x256xf32>
    %550 = vector.extract_strided_slice %528 {offsets = [0, 1], sizes = [8, 255], strides = [1, 1]} : vector<8x256xf32> to vector<8x255xf32>
    %551 = vector.extract_strided_slice %528 {offsets = [0, 0], sizes = [8, 1], strides = [1, 1]} : vector<8x256xf32> to vector<8x1xf32>
    %552 = tpu.concatenate %550, %551 in 1 : vector<8x255xf32>, vector<8x1xf32> -> vector<8x256xf32>
    %553 = vector.shape_cast %18 : vector<1x256xi1> to vector<1x256xi1>
    %554 = vector.broadcast %553 : vector<1x256xi1> to vector<8x256xi1>
    %555 = arith.select %554, %552, %528 : vector<8x256xi1>, vector<8x256xf32>
    %556 = vector.extract_strided_slice %528 {offsets = [0, 16], sizes = [8, 240], strides = [1, 1]} : vector<8x256xf32> to vector<8x240xf32>
    %557 = vector.extract_strided_slice %528 {offsets = [0, 240], sizes = [8, 16], strides = [1, 1]} : vector<8x256xf32> to vector<8x16xf32>
    %558 = tpu.concatenate %556, %557 in 1 : vector<8x240xf32>, vector<8x16xf32> -> vector<8x256xf32>
    %559 = vector.extract_strided_slice %558 {offsets = [0, 255], sizes = [8, 1], strides = [1, 1]} : vector<8x256xf32> to vector<8x1xf32>
    %560 = vector.extract_strided_slice %558 {offsets = [0, 0], sizes = [8, 255], strides = [1, 1]} : vector<8x256xf32> to vector<8x255xf32>
    %561 = tpu.concatenate %559, %560 in 1 : vector<8x1xf32>, vector<8x255xf32> -> vector<8x256xf32>
    %562 = vector.shape_cast %20 : vector<1x256xi1> to vector<1x256xi1>
    %563 = vector.broadcast %562 : vector<1x256xi1> to vector<8x256xi1>
    %564 = arith.select %563, %561, %558 : vector<8x256xi1>, vector<8x256xf32>
    %565 = vector.extract_strided_slice %558 {offsets = [0, 1], sizes = [8, 255], strides = [1, 1]} : vector<8x256xf32> to vector<8x255xf32>
    %566 = vector.extract_strided_slice %558 {offsets = [0, 0], sizes = [8, 1], strides = [1, 1]} : vector<8x256xf32> to vector<8x1xf32>
    %567 = tpu.concatenate %565, %566 in 1 : vector<8x255xf32>, vector<8x1xf32> -> vector<8x256xf32>
    %568 = vector.shape_cast %18 : vector<1x256xi1> to vector<1x256xi1>
    %569 = vector.broadcast %568 : vector<1x256xi1> to vector<8x256xi1>
    %570 = arith.select %569, %567, %558 : vector<8x256xi1>, vector<8x256xf32>
    %571 = tpu.concatenate %537, %531, %543, %549, %528, %555, %564, %558, %570 in 0 : vector<8x256xf32>, vector<8x256xf32>, vector<8x256xf32>, vector<8x256xf32>, vector<8x256xf32>, vector<8x256xf32>, vector<8x256xf32>, vector<8x256xf32>, vector<8x256xf32> -> vector<72x256xf32>
    %c0_122 = arith.constant 0 : index
    %c0_123 = arith.constant 0 : index
    %572 = vector.load %arg22[%c0_122, %c0_123] : memref<8x72xf32, #tpu.memory_space<vmem>>, vector<8x72xf32>
    %cst_124 = arith.constant dense<0.000000e+00> : vector<8x256xf32>
    %573 = tpu.matmul %572, %571, %cst_124 {dimension_numbers = #tpu.dot_dimension_numbers<[1], [0], [0], [1], [0, 0, 1, 1], [], []>} : vector<8x72xf32>, vector<72x256xf32>, vector<8x256xf32> -> vector<8x256xf32>
    %c0_125 = arith.constant 0 : index
    %c0_126 = arith.constant 0 : index
    %574 = vector.load %arg23[%c0_125, %c0_126] : memref<8x1xf32, #tpu.memory_space<vmem>>, vector<8x1xf32>
    %575 = vector.broadcast %574 : vector<8x1xf32> to vector<8x256xf32>
    %576 = arith.addf %573, %575 : vector<8x256xf32>
    %cst_127 = arith.constant 2.000000e-01 : f32
    %577 = vector.broadcast %cst_127 : f32 to vector<8x256xf32>
    %578 = arith.mulf %577, %576 : vector<8x256xf32>
    %579 = arith.maximumf %576, %578 : vector<8x256xf32>
    %580 = vector.extract_strided_slice %528 {offsets = [0, 0], sizes = [8, 240], strides = [1, 1]} : vector<8x256xf32> to vector<8x240xf32>
    %cst_128 = arith.constant 0.000000e+00 : f32
    %581 = vector.broadcast %cst_128 : f32 to vector<8x16xf32>
    %582 = tpu.concatenate %581, %580 in 1 : vector<8x16xf32>, vector<8x240xf32> -> vector<8x256xf32>
    %583 = vector.extract_strided_slice %582 {offsets = [0, 255], sizes = [8, 1], strides = [1, 1]} : vector<8x256xf32> to vector<8x1xf32>
    %584 = vector.extract_strided_slice %582 {offsets = [0, 0], sizes = [8, 255], strides = [1, 1]} : vector<8x256xf32> to vector<8x255xf32>
    %585 = tpu.concatenate %583, %584 in 1 : vector<8x1xf32>, vector<8x255xf32> -> vector<8x256xf32>
    %cst_129 = arith.constant 0.000000e+00 : f32
    %586 = vector.shape_cast %20 : vector<1x256xi1> to vector<1x256xi1>
    %587 = vector.broadcast %586 : vector<1x256xi1> to vector<8x256xi1>
    %588 = vector.broadcast %cst_129 : f32 to vector<8x256xf32>
    %589 = arith.select %587, %585, %588 : vector<8x256xi1>, vector<8x256xf32>
    %590 = vector.extract_strided_slice %582 {offsets = [0, 1], sizes = [8, 255], strides = [1, 1]} : vector<8x256xf32> to vector<8x255xf32>
    %591 = vector.extract_strided_slice %582 {offsets = [0, 0], sizes = [8, 1], strides = [1, 1]} : vector<8x256xf32> to vector<8x1xf32>
    %592 = tpu.concatenate %590, %591 in 1 : vector<8x255xf32>, vector<8x1xf32> -> vector<8x256xf32>
    %cst_130 = arith.constant 0.000000e+00 : f32
    %593 = vector.shape_cast %18 : vector<1x256xi1> to vector<1x256xi1>
    %594 = vector.broadcast %593 : vector<1x256xi1> to vector<8x256xi1>
    %595 = vector.broadcast %cst_130 : f32 to vector<8x256xf32>
    %596 = arith.select %594, %592, %595 : vector<8x256xi1>, vector<8x256xf32>
    %597 = vector.extract_strided_slice %528 {offsets = [0, 255], sizes = [8, 1], strides = [1, 1]} : vector<8x256xf32> to vector<8x1xf32>
    %598 = vector.extract_strided_slice %528 {offsets = [0, 0], sizes = [8, 255], strides = [1, 1]} : vector<8x256xf32> to vector<8x255xf32>
    %599 = tpu.concatenate %597, %598 in 1 : vector<8x1xf32>, vector<8x255xf32> -> vector<8x256xf32>
    %cst_131 = arith.constant 0.000000e+00 : f32
    %600 = vector.shape_cast %20 : vector<1x256xi1> to vector<1x256xi1>
    %601 = vector.broadcast %600 : vector<1x256xi1> to vector<8x256xi1>
    %602 = vector.broadcast %cst_131 : f32 to vector<8x256xf32>
    %603 = arith.select %601, %599, %602 : vector<8x256xi1>, vector<8x256xf32>
    %604 = vector.extract_strided_slice %528 {offsets = [0, 1], sizes = [8, 255], strides = [1, 1]} : vector<8x256xf32> to vector<8x255xf32>
    %605 = vector.extract_strided_slice %528 {offsets = [0, 0], sizes = [8, 1], strides = [1, 1]} : vector<8x256xf32> to vector<8x1xf32>
    %606 = tpu.concatenate %604, %605 in 1 : vector<8x255xf32>, vector<8x1xf32> -> vector<8x256xf32>
    %cst_132 = arith.constant 0.000000e+00 : f32
    %607 = vector.shape_cast %18 : vector<1x256xi1> to vector<1x256xi1>
    %608 = vector.broadcast %607 : vector<1x256xi1> to vector<8x256xi1>
    %609 = vector.broadcast %cst_132 : f32 to vector<8x256xf32>
    %610 = arith.select %608, %606, %609 : vector<8x256xi1>, vector<8x256xf32>
    %611 = vector.extract_strided_slice %528 {offsets = [0, 16], sizes = [8, 240], strides = [1, 1]} : vector<8x256xf32> to vector<8x240xf32>
    %cst_133 = arith.constant 0.000000e+00 : f32
    %612 = vector.broadcast %cst_133 : f32 to vector<8x16xf32>
    %613 = tpu.concatenate %611, %612 in 1 : vector<8x240xf32>, vector<8x16xf32> -> vector<8x256xf32>
    %614 = vector.extract_strided_slice %613 {offsets = [0, 255], sizes = [8, 1], strides = [1, 1]} : vector<8x256xf32> to vector<8x1xf32>
    %615 = vector.extract_strided_slice %613 {offsets = [0, 0], sizes = [8, 255], strides = [1, 1]} : vector<8x256xf32> to vector<8x255xf32>
    %616 = tpu.concatenate %614, %615 in 1 : vector<8x1xf32>, vector<8x255xf32> -> vector<8x256xf32>
    %cst_134 = arith.constant 0.000000e+00 : f32
    %617 = vector.shape_cast %20 : vector<1x256xi1> to vector<1x256xi1>
    %618 = vector.broadcast %617 : vector<1x256xi1> to vector<8x256xi1>
    %619 = vector.broadcast %cst_134 : f32 to vector<8x256xf32>
    %620 = arith.select %618, %616, %619 : vector<8x256xi1>, vector<8x256xf32>
    %621 = vector.extract_strided_slice %613 {offsets = [0, 1], sizes = [8, 255], strides = [1, 1]} : vector<8x256xf32> to vector<8x255xf32>
    %622 = vector.extract_strided_slice %613 {offsets = [0, 0], sizes = [8, 1], strides = [1, 1]} : vector<8x256xf32> to vector<8x1xf32>
    %623 = tpu.concatenate %621, %622 in 1 : vector<8x255xf32>, vector<8x1xf32> -> vector<8x256xf32>
    %cst_135 = arith.constant 0.000000e+00 : f32
    %624 = vector.shape_cast %18 : vector<1x256xi1> to vector<1x256xi1>
    %625 = vector.broadcast %624 : vector<1x256xi1> to vector<8x256xi1>
    %626 = vector.broadcast %cst_135 : f32 to vector<8x256xf32>
    %627 = arith.select %625, %623, %626 : vector<8x256xi1>, vector<8x256xf32>
    %628 = tpu.concatenate %589, %582, %596, %603, %528, %610, %620, %613, %627 in 0 : vector<8x256xf32>, vector<8x256xf32>, vector<8x256xf32>, vector<8x256xf32>, vector<8x256xf32>, vector<8x256xf32>, vector<8x256xf32>, vector<8x256xf32>, vector<8x256xf32> -> vector<72x256xf32>
    %629 = vector.extract_strided_slice %579 {offsets = [0, 0], sizes = [8, 240], strides = [1, 1]} : vector<8x256xf32> to vector<8x240xf32>
    %cst_136 = arith.constant 0.000000e+00 : f32
    %630 = vector.broadcast %cst_136 : f32 to vector<8x16xf32>
    %631 = tpu.concatenate %630, %629 in 1 : vector<8x16xf32>, vector<8x240xf32> -> vector<8x256xf32>
    %632 = vector.extract_strided_slice %631 {offsets = [0, 255], sizes = [8, 1], strides = [1, 1]} : vector<8x256xf32> to vector<8x1xf32>
    %633 = vector.extract_strided_slice %631 {offsets = [0, 0], sizes = [8, 255], strides = [1, 1]} : vector<8x256xf32> to vector<8x255xf32>
    %634 = tpu.concatenate %632, %633 in 1 : vector<8x1xf32>, vector<8x255xf32> -> vector<8x256xf32>
    %cst_137 = arith.constant 0.000000e+00 : f32
    %635 = vector.shape_cast %20 : vector<1x256xi1> to vector<1x256xi1>
    %636 = vector.broadcast %635 : vector<1x256xi1> to vector<8x256xi1>
    %637 = vector.broadcast %cst_137 : f32 to vector<8x256xf32>
    %638 = arith.select %636, %634, %637 : vector<8x256xi1>, vector<8x256xf32>
    %639 = vector.extract_strided_slice %631 {offsets = [0, 1], sizes = [8, 255], strides = [1, 1]} : vector<8x256xf32> to vector<8x255xf32>
    %640 = vector.extract_strided_slice %631 {offsets = [0, 0], sizes = [8, 1], strides = [1, 1]} : vector<8x256xf32> to vector<8x1xf32>
    %641 = tpu.concatenate %639, %640 in 1 : vector<8x255xf32>, vector<8x1xf32> -> vector<8x256xf32>
    %cst_138 = arith.constant 0.000000e+00 : f32
    %642 = vector.shape_cast %18 : vector<1x256xi1> to vector<1x256xi1>
    %643 = vector.broadcast %642 : vector<1x256xi1> to vector<8x256xi1>
    %644 = vector.broadcast %cst_138 : f32 to vector<8x256xf32>
    %645 = arith.select %643, %641, %644 : vector<8x256xi1>, vector<8x256xf32>
    %646 = vector.extract_strided_slice %579 {offsets = [0, 255], sizes = [8, 1], strides = [1, 1]} : vector<8x256xf32> to vector<8x1xf32>
    %647 = vector.extract_strided_slice %579 {offsets = [0, 0], sizes = [8, 255], strides = [1, 1]} : vector<8x256xf32> to vector<8x255xf32>
    %648 = tpu.concatenate %646, %647 in 1 : vector<8x1xf32>, vector<8x255xf32> -> vector<8x256xf32>
    %cst_139 = arith.constant 0.000000e+00 : f32
    %649 = vector.shape_cast %20 : vector<1x256xi1> to vector<1x256xi1>
    %650 = vector.broadcast %649 : vector<1x256xi1> to vector<8x256xi1>
    %651 = vector.broadcast %cst_139 : f32 to vector<8x256xf32>
    %652 = arith.select %650, %648, %651 : vector<8x256xi1>, vector<8x256xf32>
    %653 = vector.extract_strided_slice %579 {offsets = [0, 1], sizes = [8, 255], strides = [1, 1]} : vector<8x256xf32> to vector<8x255xf32>
    %654 = vector.extract_strided_slice %579 {offsets = [0, 0], sizes = [8, 1], strides = [1, 1]} : vector<8x256xf32> to vector<8x1xf32>
    %655 = tpu.concatenate %653, %654 in 1 : vector<8x255xf32>, vector<8x1xf32> -> vector<8x256xf32>
    %cst_140 = arith.constant 0.000000e+00 : f32
    %656 = vector.shape_cast %18 : vector<1x256xi1> to vector<1x256xi1>
    %657 = vector.broadcast %656 : vector<1x256xi1> to vector<8x256xi1>
    %658 = vector.broadcast %cst_140 : f32 to vector<8x256xf32>
    %659 = arith.select %657, %655, %658 : vector<8x256xi1>, vector<8x256xf32>
    %660 = vector.extract_strided_slice %579 {offsets = [0, 16], sizes = [8, 240], strides = [1, 1]} : vector<8x256xf32> to vector<8x240xf32>
    %cst_141 = arith.constant 0.000000e+00 : f32
    %661 = vector.broadcast %cst_141 : f32 to vector<8x16xf32>
    %662 = tpu.concatenate %660, %661 in 1 : vector<8x240xf32>, vector<8x16xf32> -> vector<8x256xf32>
    %663 = vector.extract_strided_slice %662 {offsets = [0, 255], sizes = [8, 1], strides = [1, 1]} : vector<8x256xf32> to vector<8x1xf32>
    %664 = vector.extract_strided_slice %662 {offsets = [0, 0], sizes = [8, 255], strides = [1, 1]} : vector<8x256xf32> to vector<8x255xf32>
    %665 = tpu.concatenate %663, %664 in 1 : vector<8x1xf32>, vector<8x255xf32> -> vector<8x256xf32>
    %cst_142 = arith.constant 0.000000e+00 : f32
    %666 = vector.shape_cast %20 : vector<1x256xi1> to vector<1x256xi1>
    %667 = vector.broadcast %666 : vector<1x256xi1> to vector<8x256xi1>
    %668 = vector.broadcast %cst_142 : f32 to vector<8x256xf32>
    %669 = arith.select %667, %665, %668 : vector<8x256xi1>, vector<8x256xf32>
    %670 = vector.extract_strided_slice %662 {offsets = [0, 1], sizes = [8, 255], strides = [1, 1]} : vector<8x256xf32> to vector<8x255xf32>
    %671 = vector.extract_strided_slice %662 {offsets = [0, 0], sizes = [8, 1], strides = [1, 1]} : vector<8x256xf32> to vector<8x1xf32>
    %672 = tpu.concatenate %670, %671 in 1 : vector<8x255xf32>, vector<8x1xf32> -> vector<8x256xf32>
    %cst_143 = arith.constant 0.000000e+00 : f32
    %673 = vector.shape_cast %18 : vector<1x256xi1> to vector<1x256xi1>
    %674 = vector.broadcast %673 : vector<1x256xi1> to vector<8x256xi1>
    %675 = vector.broadcast %cst_143 : f32 to vector<8x256xf32>
    %676 = arith.select %674, %672, %675 : vector<8x256xi1>, vector<8x256xf32>
    %677 = tpu.concatenate %638, %631, %645, %652, %579, %659, %669, %662, %676 in 0 : vector<8x256xf32>, vector<8x256xf32>, vector<8x256xf32>, vector<8x256xf32>, vector<8x256xf32>, vector<8x256xf32>, vector<8x256xf32>, vector<8x256xf32>, vector<8x256xf32> -> vector<72x256xf32>
    %c0_144 = arith.constant 0 : index
    %c0_145 = arith.constant 0 : index
    %678 = vector.load %arg24[%c0_144, %c0_145] : memref<8x72xf32, #tpu.memory_space<vmem>>, vector<8x72xf32>
    %cst_146 = arith.constant dense<0.000000e+00> : vector<8x256xf32>
    %679 = tpu.matmul %678, %628, %cst_146 {dimension_numbers = #tpu.dot_dimension_numbers<[1], [0], [0], [1], [0, 0, 1, 1], [], []>} : vector<8x72xf32>, vector<72x256xf32>, vector<8x256xf32> -> vector<8x256xf32>
    %c0_147 = arith.constant 0 : index
    %c0_148 = arith.constant 0 : index
    %680 = vector.load %arg25[%c0_147, %c0_148] : memref<8x72xf32, #tpu.memory_space<vmem>>, vector<8x72xf32>
    %cst_149 = arith.constant dense<0.000000e+00> : vector<8x256xf32>
    %681 = tpu.matmul %680, %677, %cst_149 {dimension_numbers = #tpu.dot_dimension_numbers<[1], [0], [0], [1], [0, 0, 1, 1], [], []>} : vector<8x72xf32>, vector<72x256xf32>, vector<8x256xf32> -> vector<8x256xf32>
    %682 = arith.addf %679, %681 : vector<8x256xf32>
    %c0_150 = arith.constant 0 : index
    %c0_151 = arith.constant 0 : index
    %683 = vector.load %arg26[%c0_150, %c0_151] : memref<8x1xf32, #tpu.memory_space<vmem>>, vector<8x1xf32>
    %684 = vector.broadcast %683 : vector<8x1xf32> to vector<8x256xf32>
    %685 = arith.addf %682, %684 : vector<8x256xf32>
    %cst_152 = arith.constant 2.000000e-01 : f32
    %686 = vector.broadcast %cst_152 : f32 to vector<8x256xf32>
    %687 = arith.mulf %686, %685 : vector<8x256xf32>
    %688 = arith.maximumf %685, %687 : vector<8x256xf32>
    %689 = vector.extract_strided_slice %688 {offsets = [0, 0], sizes = [8, 240], strides = [1, 1]} : vector<8x256xf32> to vector<8x240xf32>
    %cst_153 = arith.constant 0.000000e+00 : f32
    %690 = vector.broadcast %cst_153 : f32 to vector<8x16xf32>
    %691 = tpu.concatenate %690, %689 in 1 : vector<8x16xf32>, vector<8x240xf32> -> vector<8x256xf32>
    %692 = vector.extract_strided_slice %691 {offsets = [0, 255], sizes = [8, 1], strides = [1, 1]} : vector<8x256xf32> to vector<8x1xf32>
    %693 = vector.extract_strided_slice %691 {offsets = [0, 0], sizes = [8, 255], strides = [1, 1]} : vector<8x256xf32> to vector<8x255xf32>
    %694 = tpu.concatenate %692, %693 in 1 : vector<8x1xf32>, vector<8x255xf32> -> vector<8x256xf32>
    %cst_154 = arith.constant 0.000000e+00 : f32
    %695 = vector.shape_cast %20 : vector<1x256xi1> to vector<1x256xi1>
    %696 = vector.broadcast %695 : vector<1x256xi1> to vector<8x256xi1>
    %697 = vector.broadcast %cst_154 : f32 to vector<8x256xf32>
    %698 = arith.select %696, %694, %697 : vector<8x256xi1>, vector<8x256xf32>
    %699 = vector.extract_strided_slice %691 {offsets = [0, 1], sizes = [8, 255], strides = [1, 1]} : vector<8x256xf32> to vector<8x255xf32>
    %700 = vector.extract_strided_slice %691 {offsets = [0, 0], sizes = [8, 1], strides = [1, 1]} : vector<8x256xf32> to vector<8x1xf32>
    %701 = tpu.concatenate %699, %700 in 1 : vector<8x255xf32>, vector<8x1xf32> -> vector<8x256xf32>
    %cst_155 = arith.constant 0.000000e+00 : f32
    %702 = vector.shape_cast %18 : vector<1x256xi1> to vector<1x256xi1>
    %703 = vector.broadcast %702 : vector<1x256xi1> to vector<8x256xi1>
    %704 = vector.broadcast %cst_155 : f32 to vector<8x256xf32>
    %705 = arith.select %703, %701, %704 : vector<8x256xi1>, vector<8x256xf32>
    %706 = vector.extract_strided_slice %688 {offsets = [0, 255], sizes = [8, 1], strides = [1, 1]} : vector<8x256xf32> to vector<8x1xf32>
    %707 = vector.extract_strided_slice %688 {offsets = [0, 0], sizes = [8, 255], strides = [1, 1]} : vector<8x256xf32> to vector<8x255xf32>
    %708 = tpu.concatenate %706, %707 in 1 : vector<8x1xf32>, vector<8x255xf32> -> vector<8x256xf32>
    %cst_156 = arith.constant 0.000000e+00 : f32
    %709 = vector.shape_cast %20 : vector<1x256xi1> to vector<1x256xi1>
    %710 = vector.broadcast %709 : vector<1x256xi1> to vector<8x256xi1>
    %711 = vector.broadcast %cst_156 : f32 to vector<8x256xf32>
    %712 = arith.select %710, %708, %711 : vector<8x256xi1>, vector<8x256xf32>
    %713 = vector.extract_strided_slice %688 {offsets = [0, 1], sizes = [8, 255], strides = [1, 1]} : vector<8x256xf32> to vector<8x255xf32>
    %714 = vector.extract_strided_slice %688 {offsets = [0, 0], sizes = [8, 1], strides = [1, 1]} : vector<8x256xf32> to vector<8x1xf32>
    %715 = tpu.concatenate %713, %714 in 1 : vector<8x255xf32>, vector<8x1xf32> -> vector<8x256xf32>
    %cst_157 = arith.constant 0.000000e+00 : f32
    %716 = vector.shape_cast %18 : vector<1x256xi1> to vector<1x256xi1>
    %717 = vector.broadcast %716 : vector<1x256xi1> to vector<8x256xi1>
    %718 = vector.broadcast %cst_157 : f32 to vector<8x256xf32>
    %719 = arith.select %717, %715, %718 : vector<8x256xi1>, vector<8x256xf32>
    %720 = vector.extract_strided_slice %688 {offsets = [0, 16], sizes = [8, 240], strides = [1, 1]} : vector<8x256xf32> to vector<8x240xf32>
    %cst_158 = arith.constant 0.000000e+00 : f32
    %721 = vector.broadcast %cst_158 : f32 to vector<8x16xf32>
    %722 = tpu.concatenate %720, %721 in 1 : vector<8x240xf32>, vector<8x16xf32> -> vector<8x256xf32>
    %723 = vector.extract_strided_slice %722 {offsets = [0, 255], sizes = [8, 1], strides = [1, 1]} : vector<8x256xf32> to vector<8x1xf32>
    %724 = vector.extract_strided_slice %722 {offsets = [0, 0], sizes = [8, 255], strides = [1, 1]} : vector<8x256xf32> to vector<8x255xf32>
    %725 = tpu.concatenate %723, %724 in 1 : vector<8x1xf32>, vector<8x255xf32> -> vector<8x256xf32>
    %cst_159 = arith.constant 0.000000e+00 : f32
    %726 = vector.shape_cast %20 : vector<1x256xi1> to vector<1x256xi1>
    %727 = vector.broadcast %726 : vector<1x256xi1> to vector<8x256xi1>
    %728 = vector.broadcast %cst_159 : f32 to vector<8x256xf32>
    %729 = arith.select %727, %725, %728 : vector<8x256xi1>, vector<8x256xf32>
    %730 = vector.extract_strided_slice %722 {offsets = [0, 1], sizes = [8, 255], strides = [1, 1]} : vector<8x256xf32> to vector<8x255xf32>
    %731 = vector.extract_strided_slice %722 {offsets = [0, 0], sizes = [8, 1], strides = [1, 1]} : vector<8x256xf32> to vector<8x1xf32>
    %732 = tpu.concatenate %730, %731 in 1 : vector<8x255xf32>, vector<8x1xf32> -> vector<8x256xf32>
    %cst_160 = arith.constant 0.000000e+00 : f32
    %733 = vector.shape_cast %18 : vector<1x256xi1> to vector<1x256xi1>
    %734 = vector.broadcast %733 : vector<1x256xi1> to vector<8x256xi1>
    %735 = vector.broadcast %cst_160 : f32 to vector<8x256xf32>
    %736 = arith.select %734, %732, %735 : vector<8x256xi1>, vector<8x256xf32>
    %737 = tpu.concatenate %698, %691, %705, %712, %688, %719, %729, %722, %736 in 0 : vector<8x256xf32>, vector<8x256xf32>, vector<8x256xf32>, vector<8x256xf32>, vector<8x256xf32>, vector<8x256xf32>, vector<8x256xf32>, vector<8x256xf32>, vector<8x256xf32> -> vector<72x256xf32>
    %c0_161 = arith.constant 0 : index
    %c0_162 = arith.constant 0 : index
    %738 = vector.load %arg27[%c0_161, %c0_162] : memref<8x72xf32, #tpu.memory_space<vmem>>, vector<8x72xf32>
    %cst_163 = arith.constant dense<0.000000e+00> : vector<8x256xf32>
    %739 = tpu.matmul %738, %628, %cst_163 {dimension_numbers = #tpu.dot_dimension_numbers<[1], [0], [0], [1], [0, 0, 1, 1], [], []>} : vector<8x72xf32>, vector<72x256xf32>, vector<8x256xf32> -> vector<8x256xf32>
    %c0_164 = arith.constant 0 : index
    %c0_165 = arith.constant 0 : index
    %740 = vector.load %arg28[%c0_164, %c0_165] : memref<8x72xf32, #tpu.memory_space<vmem>>, vector<8x72xf32>
    %cst_166 = arith.constant dense<0.000000e+00> : vector<8x256xf32>
    %741 = tpu.matmul %740, %677, %cst_166 {dimension_numbers = #tpu.dot_dimension_numbers<[1], [0], [0], [1], [0, 0, 1, 1], [], []>} : vector<8x72xf32>, vector<72x256xf32>, vector<8x256xf32> -> vector<8x256xf32>
    %742 = arith.addf %739, %741 : vector<8x256xf32>
    %c0_167 = arith.constant 0 : index
    %c0_168 = arith.constant 0 : index
    %743 = vector.load %arg29[%c0_167, %c0_168] : memref<8x72xf32, #tpu.memory_space<vmem>>, vector<8x72xf32>
    %cst_169 = arith.constant dense<0.000000e+00> : vector<8x256xf32>
    %744 = tpu.matmul %743, %737, %cst_169 {dimension_numbers = #tpu.dot_dimension_numbers<[1], [0], [0], [1], [0, 0, 1, 1], [], []>} : vector<8x72xf32>, vector<72x256xf32>, vector<8x256xf32> -> vector<8x256xf32>
    %745 = arith.addf %742, %744 : vector<8x256xf32>
    %c0_170 = arith.constant 0 : index
    %c0_171 = arith.constant 0 : index
    %746 = vector.load %arg30[%c0_170, %c0_171] : memref<8x1xf32, #tpu.memory_space<vmem>>, vector<8x1xf32>
    %747 = vector.broadcast %746 : vector<8x1xf32> to vector<8x256xf32>
    %748 = arith.addf %745, %747 : vector<8x256xf32>
    %cst_172 = arith.constant 2.000000e-01 : f32
    %749 = vector.broadcast %cst_172 : f32 to vector<8x256xf32>
    %750 = arith.mulf %749, %748 : vector<8x256xf32>
    %751 = arith.maximumf %748, %750 : vector<8x256xf32>
    %cst_173 = arith.constant 4.000000e-01 : f32
    %752 = vector.broadcast %cst_173 : f32 to vector<8x256xf32>
    %753 = arith.mulf %751, %752 : vector<8x256xf32>
    %754 = arith.addf %753, %528 : vector<8x256xf32>
    %cst_174 = arith.constant 2.000000e-01 : f32
    %755 = vector.broadcast %cst_174 : f32 to vector<8x256xf32>
    %756 = arith.mulf %754, %755 : vector<8x256xf32>
    %757 = arith.addf %756, %76 : vector<8x256xf32>
    %758 = vector.extract_strided_slice %757 {offsets = [0, 0], sizes = [8, 240], strides = [1, 1]} : vector<8x256xf32> to vector<8x240xf32>
    %cst_175 = arith.constant 0.000000e+00 : f32
    %759 = vector.broadcast %cst_175 : f32 to vector<8x16xf32>
    %760 = tpu.concatenate %759, %758 in 1 : vector<8x16xf32>, vector<8x240xf32> -> vector<8x256xf32>
    %761 = vector.extract_strided_slice %760 {offsets = [0, 255], sizes = [8, 1], strides = [1, 1]} : vector<8x256xf32> to vector<8x1xf32>
    %762 = vector.extract_strided_slice %760 {offsets = [0, 0], sizes = [8, 255], strides = [1, 1]} : vector<8x256xf32> to vector<8x255xf32>
    %763 = tpu.concatenate %761, %762 in 1 : vector<8x1xf32>, vector<8x255xf32> -> vector<8x256xf32>
    %cst_176 = arith.constant 0.000000e+00 : f32
    %764 = vector.shape_cast %20 : vector<1x256xi1> to vector<1x256xi1>
    %765 = vector.broadcast %764 : vector<1x256xi1> to vector<8x256xi1>
    %766 = vector.broadcast %cst_176 : f32 to vector<8x256xf32>
    %767 = arith.select %765, %763, %766 : vector<8x256xi1>, vector<8x256xf32>
    %768 = vector.extract_strided_slice %760 {offsets = [0, 1], sizes = [8, 255], strides = [1, 1]} : vector<8x256xf32> to vector<8x255xf32>
    %769 = vector.extract_strided_slice %760 {offsets = [0, 0], sizes = [8, 1], strides = [1, 1]} : vector<8x256xf32> to vector<8x1xf32>
    %770 = tpu.concatenate %768, %769 in 1 : vector<8x255xf32>, vector<8x1xf32> -> vector<8x256xf32>
    %cst_177 = arith.constant 0.000000e+00 : f32
    %771 = vector.shape_cast %18 : vector<1x256xi1> to vector<1x256xi1>
    %772 = vector.broadcast %771 : vector<1x256xi1> to vector<8x256xi1>
    %773 = vector.broadcast %cst_177 : f32 to vector<8x256xf32>
    %774 = arith.select %772, %770, %773 : vector<8x256xi1>, vector<8x256xf32>
    %775 = vector.extract_strided_slice %757 {offsets = [0, 255], sizes = [8, 1], strides = [1, 1]} : vector<8x256xf32> to vector<8x1xf32>
    %776 = vector.extract_strided_slice %757 {offsets = [0, 0], sizes = [8, 255], strides = [1, 1]} : vector<8x256xf32> to vector<8x255xf32>
    %777 = tpu.concatenate %775, %776 in 1 : vector<8x1xf32>, vector<8x255xf32> -> vector<8x256xf32>
    %cst_178 = arith.constant 0.000000e+00 : f32
    %778 = vector.shape_cast %20 : vector<1x256xi1> to vector<1x256xi1>
    %779 = vector.broadcast %778 : vector<1x256xi1> to vector<8x256xi1>
    %780 = vector.broadcast %cst_178 : f32 to vector<8x256xf32>
    %781 = arith.select %779, %777, %780 : vector<8x256xi1>, vector<8x256xf32>
    %782 = vector.extract_strided_slice %757 {offsets = [0, 1], sizes = [8, 255], strides = [1, 1]} : vector<8x256xf32> to vector<8x255xf32>
    %783 = vector.extract_strided_slice %757 {offsets = [0, 0], sizes = [8, 1], strides = [1, 1]} : vector<8x256xf32> to vector<8x1xf32>
    %784 = tpu.concatenate %782, %783 in 1 : vector<8x255xf32>, vector<8x1xf32> -> vector<8x256xf32>
    %cst_179 = arith.constant 0.000000e+00 : f32
    %785 = vector.shape_cast %18 : vector<1x256xi1> to vector<1x256xi1>
    %786 = vector.broadcast %785 : vector<1x256xi1> to vector<8x256xi1>
    %787 = vector.broadcast %cst_179 : f32 to vector<8x256xf32>
    %788 = arith.select %786, %784, %787 : vector<8x256xi1>, vector<8x256xf32>
    %789 = vector.extract_strided_slice %757 {offsets = [0, 16], sizes = [8, 240], strides = [1, 1]} : vector<8x256xf32> to vector<8x240xf32>
    %cst_180 = arith.constant 0.000000e+00 : f32
    %790 = vector.broadcast %cst_180 : f32 to vector<8x16xf32>
    %791 = tpu.concatenate %789, %790 in 1 : vector<8x240xf32>, vector<8x16xf32> -> vector<8x256xf32>
    %792 = vector.extract_strided_slice %791 {offsets = [0, 255], sizes = [8, 1], strides = [1, 1]} : vector<8x256xf32> to vector<8x1xf32>
    %793 = vector.extract_strided_slice %791 {offsets = [0, 0], sizes = [8, 255], strides = [1, 1]} : vector<8x256xf32> to vector<8x255xf32>
    %794 = tpu.concatenate %792, %793 in 1 : vector<8x1xf32>, vector<8x255xf32> -> vector<8x256xf32>
    %cst_181 = arith.constant 0.000000e+00 : f32
    %795 = vector.shape_cast %20 : vector<1x256xi1> to vector<1x256xi1>
    %796 = vector.broadcast %795 : vector<1x256xi1> to vector<8x256xi1>
    %797 = vector.broadcast %cst_181 : f32 to vector<8x256xf32>
    %798 = arith.select %796, %794, %797 : vector<8x256xi1>, vector<8x256xf32>
    %799 = vector.extract_strided_slice %791 {offsets = [0, 1], sizes = [8, 255], strides = [1, 1]} : vector<8x256xf32> to vector<8x255xf32>
    %800 = vector.extract_strided_slice %791 {offsets = [0, 0], sizes = [8, 1], strides = [1, 1]} : vector<8x256xf32> to vector<8x1xf32>
    %801 = tpu.concatenate %799, %800 in 1 : vector<8x255xf32>, vector<8x1xf32> -> vector<8x256xf32>
    %cst_182 = arith.constant 0.000000e+00 : f32
    %802 = vector.shape_cast %18 : vector<1x256xi1> to vector<1x256xi1>
    %803 = vector.broadcast %802 : vector<1x256xi1> to vector<8x256xi1>
    %804 = vector.broadcast %cst_182 : f32 to vector<8x256xf32>
    %805 = arith.select %803, %801, %804 : vector<8x256xi1>, vector<8x256xf32>
    %806 = tpu.concatenate %767, %760, %774, %781, %757, %788, %798, %791, %805 in 0 : vector<8x256xf32>, vector<8x256xf32>, vector<8x256xf32>, vector<8x256xf32>, vector<8x256xf32>, vector<8x256xf32>, vector<8x256xf32>, vector<8x256xf32>, vector<8x256xf32> -> vector<72x256xf32>
    %c0_183 = arith.constant 0 : index
    %c0_184 = arith.constant 0 : index
    %807 = vector.load %arg31[%c0_183, %c0_184] : memref<8x72xf32, #tpu.memory_space<vmem>>, vector<8x72xf32>
    %cst_185 = arith.constant dense<0.000000e+00> : vector<8x256xf32>
    %808 = tpu.matmul %807, %806, %cst_185 {dimension_numbers = #tpu.dot_dimension_numbers<[1], [0], [0], [1], [0, 0, 1, 1], [], []>} : vector<8x72xf32>, vector<72x256xf32>, vector<8x256xf32> -> vector<8x256xf32>
    %c0_186 = arith.constant 0 : index
    %c0_187 = arith.constant 0 : index
    %809 = vector.load %arg32[%c0_186, %c0_187] : memref<8x1xf32, #tpu.memory_space<vmem>>, vector<8x1xf32>
    %810 = vector.broadcast %809 : vector<8x1xf32> to vector<8x256xf32>
    %811 = arith.addf %808, %810 : vector<8x256xf32>
    %812 = arith.addf %76, %811 : vector<8x256xf32>
    %813 = vector.extract_strided_slice %812 {offsets = [0, 0], sizes = [8, 240], strides = [1, 1]} : vector<8x256xf32> to vector<8x240xf32>
    %cst_188 = arith.constant 0.000000e+00 : f32
    %814 = vector.broadcast %cst_188 : f32 to vector<8x16xf32>
    %815 = tpu.concatenate %814, %813 in 1 : vector<8x16xf32>, vector<8x240xf32> -> vector<8x256xf32>
    %816 = vector.extract_strided_slice %815 {offsets = [0, 255], sizes = [8, 1], strides = [1, 1]} : vector<8x256xf32> to vector<8x1xf32>
    %817 = vector.extract_strided_slice %815 {offsets = [0, 0], sizes = [8, 255], strides = [1, 1]} : vector<8x256xf32> to vector<8x255xf32>
    %818 = tpu.concatenate %816, %817 in 1 : vector<8x1xf32>, vector<8x255xf32> -> vector<8x256xf32>
    %cst_189 = arith.constant 0.000000e+00 : f32
    %819 = vector.shape_cast %20 : vector<1x256xi1> to vector<1x256xi1>
    %820 = vector.broadcast %819 : vector<1x256xi1> to vector<8x256xi1>
    %821 = vector.broadcast %cst_189 : f32 to vector<8x256xf32>
    %822 = arith.select %820, %818, %821 : vector<8x256xi1>, vector<8x256xf32>
    %823 = vector.extract_strided_slice %815 {offsets = [0, 1], sizes = [8, 255], strides = [1, 1]} : vector<8x256xf32> to vector<8x255xf32>
    %824 = vector.extract_strided_slice %815 {offsets = [0, 0], sizes = [8, 1], strides = [1, 1]} : vector<8x256xf32> to vector<8x1xf32>
    %825 = tpu.concatenate %823, %824 in 1 : vector<8x255xf32>, vector<8x1xf32> -> vector<8x256xf32>
    %cst_190 = arith.constant 0.000000e+00 : f32
    %826 = vector.shape_cast %18 : vector<1x256xi1> to vector<1x256xi1>
    %827 = vector.broadcast %826 : vector<1x256xi1> to vector<8x256xi1>
    %828 = vector.broadcast %cst_190 : f32 to vector<8x256xf32>
    %829 = arith.select %827, %825, %828 : vector<8x256xi1>, vector<8x256xf32>
    %830 = vector.extract_strided_slice %812 {offsets = [0, 255], sizes = [8, 1], strides = [1, 1]} : vector<8x256xf32> to vector<8x1xf32>
    %831 = vector.extract_strided_slice %812 {offsets = [0, 0], sizes = [8, 255], strides = [1, 1]} : vector<8x256xf32> to vector<8x255xf32>
    %832 = tpu.concatenate %830, %831 in 1 : vector<8x1xf32>, vector<8x255xf32> -> vector<8x256xf32>
    %cst_191 = arith.constant 0.000000e+00 : f32
    %833 = vector.shape_cast %20 : vector<1x256xi1> to vector<1x256xi1>
    %834 = vector.broadcast %833 : vector<1x256xi1> to vector<8x256xi1>
    %835 = vector.broadcast %cst_191 : f32 to vector<8x256xf32>
    %836 = arith.select %834, %832, %835 : vector<8x256xi1>, vector<8x256xf32>
    %837 = vector.extract_strided_slice %812 {offsets = [0, 1], sizes = [8, 255], strides = [1, 1]} : vector<8x256xf32> to vector<8x255xf32>
    %838 = vector.extract_strided_slice %812 {offsets = [0, 0], sizes = [8, 1], strides = [1, 1]} : vector<8x256xf32> to vector<8x1xf32>
    %839 = tpu.concatenate %837, %838 in 1 : vector<8x255xf32>, vector<8x1xf32> -> vector<8x256xf32>
    %cst_192 = arith.constant 0.000000e+00 : f32
    %840 = vector.shape_cast %18 : vector<1x256xi1> to vector<1x256xi1>
    %841 = vector.broadcast %840 : vector<1x256xi1> to vector<8x256xi1>
    %842 = vector.broadcast %cst_192 : f32 to vector<8x256xf32>
    %843 = arith.select %841, %839, %842 : vector<8x256xi1>, vector<8x256xf32>
    %844 = vector.extract_strided_slice %812 {offsets = [0, 16], sizes = [8, 240], strides = [1, 1]} : vector<8x256xf32> to vector<8x240xf32>
    %cst_193 = arith.constant 0.000000e+00 : f32
    %845 = vector.broadcast %cst_193 : f32 to vector<8x16xf32>
    %846 = tpu.concatenate %844, %845 in 1 : vector<8x240xf32>, vector<8x16xf32> -> vector<8x256xf32>
    %847 = vector.extract_strided_slice %846 {offsets = [0, 255], sizes = [8, 1], strides = [1, 1]} : vector<8x256xf32> to vector<8x1xf32>
    %848 = vector.extract_strided_slice %846 {offsets = [0, 0], sizes = [8, 255], strides = [1, 1]} : vector<8x256xf32> to vector<8x255xf32>
    %849 = tpu.concatenate %847, %848 in 1 : vector<8x1xf32>, vector<8x255xf32> -> vector<8x256xf32>
    %cst_194 = arith.constant 0.000000e+00 : f32
    %850 = vector.shape_cast %20 : vector<1x256xi1> to vector<1x256xi1>
    %851 = vector.broadcast %850 : vector<1x256xi1> to vector<8x256xi1>
    %852 = vector.broadcast %cst_194 : f32 to vector<8x256xf32>
    %853 = arith.select %851, %849, %852 : vector<8x256xi1>, vector<8x256xf32>
    %854 = vector.extract_strided_slice %846 {offsets = [0, 1], sizes = [8, 255], strides = [1, 1]} : vector<8x256xf32> to vector<8x255xf32>
    %855 = vector.extract_strided_slice %846 {offsets = [0, 0], sizes = [8, 1], strides = [1, 1]} : vector<8x256xf32> to vector<8x1xf32>
    %856 = tpu.concatenate %854, %855 in 1 : vector<8x255xf32>, vector<8x1xf32> -> vector<8x256xf32>
    %cst_195 = arith.constant 0.000000e+00 : f32
    %857 = vector.shape_cast %18 : vector<1x256xi1> to vector<1x256xi1>
    %858 = vector.broadcast %857 : vector<1x256xi1> to vector<8x256xi1>
    %859 = vector.broadcast %cst_195 : f32 to vector<8x256xf32>
    %860 = arith.select %858, %856, %859 : vector<8x256xi1>, vector<8x256xf32>
    %861 = tpu.concatenate %822, %815, %829, %836, %812, %843, %853, %846, %860 in 0 : vector<8x256xf32>, vector<8x256xf32>, vector<8x256xf32>, vector<8x256xf32>, vector<8x256xf32>, vector<8x256xf32>, vector<8x256xf32>, vector<8x256xf32>, vector<8x256xf32> -> vector<72x256xf32>
    %c0_196 = arith.constant 0 : index
    %c0_197 = arith.constant 0 : index
    %862 = vector.load %arg33[%c0_196, %c0_197] : memref<8x72xf32, #tpu.memory_space<vmem>>, vector<8x72xf32>
    %cst_198 = arith.constant dense<0.000000e+00> : vector<8x256xf32>
    %863 = tpu.matmul %862, %861, %cst_198 {dimension_numbers = #tpu.dot_dimension_numbers<[1], [0], [0], [1], [0, 0, 1, 1], [], []>} : vector<8x72xf32>, vector<72x256xf32>, vector<8x256xf32> -> vector<8x256xf32>
    %c0_199 = arith.constant 0 : index
    %c0_200 = arith.constant 0 : index
    %864 = vector.load %arg34[%c0_199, %c0_200] : memref<8x1xf32, #tpu.memory_space<vmem>>, vector<8x1xf32>
    %865 = vector.broadcast %864 : vector<8x1xf32> to vector<8x256xf32>
    %866 = arith.addf %863, %865 : vector<8x256xf32>
    %cst_201 = arith.constant 2.000000e-01 : f32
    %867 = vector.broadcast %cst_201 : f32 to vector<8x256xf32>
    %868 = arith.mulf %867, %866 : vector<8x256xf32>
    %869 = arith.maximumf %866, %868 : vector<8x256xf32>
    %870 = vector.extract_strided_slice %869 {offsets = [0, 0], sizes = [8, 240], strides = [1, 1]} : vector<8x256xf32> to vector<8x240xf32>
    %cst_202 = arith.constant 0.000000e+00 : f32
    %871 = vector.broadcast %cst_202 : f32 to vector<8x16xf32>
    %872 = tpu.concatenate %871, %870 in 1 : vector<8x16xf32>, vector<8x240xf32> -> vector<8x256xf32>
    %873 = vector.extract_strided_slice %872 {offsets = [0, 255], sizes = [8, 1], strides = [1, 1]} : vector<8x256xf32> to vector<8x1xf32>
    %874 = vector.extract_strided_slice %872 {offsets = [0, 0], sizes = [8, 255], strides = [1, 1]} : vector<8x256xf32> to vector<8x255xf32>
    %875 = tpu.concatenate %873, %874 in 1 : vector<8x1xf32>, vector<8x255xf32> -> vector<8x256xf32>
    %cst_203 = arith.constant 0.000000e+00 : f32
    %876 = vector.shape_cast %20 : vector<1x256xi1> to vector<1x256xi1>
    %877 = vector.broadcast %876 : vector<1x256xi1> to vector<8x256xi1>
    %878 = vector.broadcast %cst_203 : f32 to vector<8x256xf32>
    %879 = arith.select %877, %875, %878 : vector<8x256xi1>, vector<8x256xf32>
    %880 = vector.extract_strided_slice %872 {offsets = [0, 1], sizes = [8, 255], strides = [1, 1]} : vector<8x256xf32> to vector<8x255xf32>
    %881 = vector.extract_strided_slice %872 {offsets = [0, 0], sizes = [8, 1], strides = [1, 1]} : vector<8x256xf32> to vector<8x1xf32>
    %882 = tpu.concatenate %880, %881 in 1 : vector<8x255xf32>, vector<8x1xf32> -> vector<8x256xf32>
    %cst_204 = arith.constant 0.000000e+00 : f32
    %883 = vector.shape_cast %18 : vector<1x256xi1> to vector<1x256xi1>
    %884 = vector.broadcast %883 : vector<1x256xi1> to vector<8x256xi1>
    %885 = vector.broadcast %cst_204 : f32 to vector<8x256xf32>
    %886 = arith.select %884, %882, %885 : vector<8x256xi1>, vector<8x256xf32>
    %887 = vector.extract_strided_slice %869 {offsets = [0, 255], sizes = [8, 1], strides = [1, 1]} : vector<8x256xf32> to vector<8x1xf32>
    %888 = vector.extract_strided_slice %869 {offsets = [0, 0], sizes = [8, 255], strides = [1, 1]} : vector<8x256xf32> to vector<8x255xf32>
    %889 = tpu.concatenate %887, %888 in 1 : vector<8x1xf32>, vector<8x255xf32> -> vector<8x256xf32>
    %cst_205 = arith.constant 0.000000e+00 : f32
    %890 = vector.shape_cast %20 : vector<1x256xi1> to vector<1x256xi1>
    %891 = vector.broadcast %890 : vector<1x256xi1> to vector<8x256xi1>
    %892 = vector.broadcast %cst_205 : f32 to vector<8x256xf32>
    %893 = arith.select %891, %889, %892 : vector<8x256xi1>, vector<8x256xf32>
    %894 = vector.extract_strided_slice %869 {offsets = [0, 1], sizes = [8, 255], strides = [1, 1]} : vector<8x256xf32> to vector<8x255xf32>
    %895 = vector.extract_strided_slice %869 {offsets = [0, 0], sizes = [8, 1], strides = [1, 1]} : vector<8x256xf32> to vector<8x1xf32>
    %896 = tpu.concatenate %894, %895 in 1 : vector<8x255xf32>, vector<8x1xf32> -> vector<8x256xf32>
    %cst_206 = arith.constant 0.000000e+00 : f32
    %897 = vector.shape_cast %18 : vector<1x256xi1> to vector<1x256xi1>
    %898 = vector.broadcast %897 : vector<1x256xi1> to vector<8x256xi1>
    %899 = vector.broadcast %cst_206 : f32 to vector<8x256xf32>
    %900 = arith.select %898, %896, %899 : vector<8x256xi1>, vector<8x256xf32>
    %901 = vector.extract_strided_slice %869 {offsets = [0, 16], sizes = [8, 240], strides = [1, 1]} : vector<8x256xf32> to vector<8x240xf32>
    %cst_207 = arith.constant 0.000000e+00 : f32
    %902 = vector.broadcast %cst_207 : f32 to vector<8x16xf32>
    %903 = tpu.concatenate %901, %902 in 1 : vector<8x240xf32>, vector<8x16xf32> -> vector<8x256xf32>
    %904 = vector.extract_strided_slice %903 {offsets = [0, 255], sizes = [8, 1], strides = [1, 1]} : vector<8x256xf32> to vector<8x1xf32>
    %905 = vector.extract_strided_slice %903 {offsets = [0, 0], sizes = [8, 255], strides = [1, 1]} : vector<8x256xf32> to vector<8x255xf32>
    %906 = tpu.concatenate %904, %905 in 1 : vector<8x1xf32>, vector<8x255xf32> -> vector<8x256xf32>
    %cst_208 = arith.constant 0.000000e+00 : f32
    %907 = vector.shape_cast %20 : vector<1x256xi1> to vector<1x256xi1>
    %908 = vector.broadcast %907 : vector<1x256xi1> to vector<8x256xi1>
    %909 = vector.broadcast %cst_208 : f32 to vector<8x256xf32>
    %910 = arith.select %908, %906, %909 : vector<8x256xi1>, vector<8x256xf32>
    %911 = vector.extract_strided_slice %903 {offsets = [0, 1], sizes = [8, 255], strides = [1, 1]} : vector<8x256xf32> to vector<8x255xf32>
    %912 = vector.extract_strided_slice %903 {offsets = [0, 0], sizes = [8, 1], strides = [1, 1]} : vector<8x256xf32> to vector<8x1xf32>
    %913 = tpu.concatenate %911, %912 in 1 : vector<8x255xf32>, vector<8x1xf32> -> vector<8x256xf32>
    %cst_209 = arith.constant 0.000000e+00 : f32
    %914 = vector.shape_cast %18 : vector<1x256xi1> to vector<1x256xi1>
    %915 = vector.broadcast %914 : vector<1x256xi1> to vector<8x256xi1>
    %916 = vector.broadcast %cst_209 : f32 to vector<8x256xf32>
    %917 = arith.select %915, %913, %916 : vector<8x256xi1>, vector<8x256xf32>
    %918 = tpu.concatenate %879, %872, %886, %893, %869, %900, %910, %903, %917 in 0 : vector<8x256xf32>, vector<8x256xf32>, vector<8x256xf32>, vector<8x256xf32>, vector<8x256xf32>, vector<8x256xf32>, vector<8x256xf32>, vector<8x256xf32>, vector<8x256xf32> -> vector<72x256xf32>
    %c0_210 = arith.constant 0 : index
    %c0_211 = arith.constant 0 : index
    %919 = vector.load %arg35[%c0_210, %c0_211] : memref<4x72xf32, #tpu.memory_space<vmem>>, vector<4x72xf32>
    %cst_212 = arith.constant dense<0.000000e+00> : vector<4x256xf32>
    %920 = tpu.matmul %919, %918, %cst_212 {dimension_numbers = #tpu.dot_dimension_numbers<[1], [0], [0], [1], [0, 0, 1, 1], [], []>} : vector<4x72xf32>, vector<72x256xf32>, vector<4x256xf32> -> vector<4x256xf32>
    %c0_213 = arith.constant 0 : index
    %c0_214 = arith.constant 0 : index
    %921 = vector.load %arg36[%c0_213, %c0_214] : memref<4x1xf32, #tpu.memory_space<vmem>>, vector<4x1xf32>
    %922 = vector.broadcast %921 : vector<4x1xf32> to vector<4x256xf32>
    %923 = arith.addf %920, %922 : vector<4x256xf32>
    %c0_215 = arith.constant 0 : index
    %c0_216 = arith.constant 0 : index
    %c0_217 = arith.constant 0 : index
    %924 = vector.load %arg37[%c0_215, %c0_216, %c0_217] : memref<1x4x256xf32, #tpu.memory_space<vmem>>, vector<1x4x256xf32>
    %925 = vector.shape_cast %924 : vector<1x4x256xf32> to vector<4x256xf32>
    %926 = vector.shape_cast %923 : vector<4x256xf32> to vector<1x4x256xf32>
    tpu.vector_store %arg37[%c0_215, %c0_216, %c0_217], %926 {strides = array<i32>} : memref<1x4x256xf32, #tpu.memory_space<vmem>>, vector<1x4x256xf32>,
    return
  }
  func.func @transform_0(%arg0: i32) -> (i32, i32, i32) {
    %c0_i32 = arith.constant 0 : i32
    %c0_i32_0 = arith.constant 0 : i32
    %c0_i32_1 = arith.constant 0 : i32
    return %arg0, %c0_i32, %c0_i32_0 : i32, i32, i32
  }
  func.func @transform_1(%arg0: i32) -> (i32, i32) {
    %c0_i32 = arith.constant 0 : i32
    %c0_i32_0 = arith.constant 0 : i32
    %c0_i32_1 = arith.constant 0 : i32
    return %c0_i32, %c0_i32_0 : i32, i32
  }
  func.func @transform_2(%arg0: i32) -> (i32, i32) {
    %c0_i32 = arith.constant 0 : i32
    %c0_i32_0 = arith.constant 0 : i32
    %c0_i32_1 = arith.constant 0 : i32
    return %c0_i32, %c0_i32_0 : i32, i32
  }
  func.func @transform_3(%arg0: i32) -> (i32, i32) {
    %c0_i32 = arith.constant 0 : i32
    %c0_i32_0 = arith.constant 0 : i32
    %c0_i32_1 = arith.constant 0 : i32
    return %c0_i32, %c0_i32_0 : i32, i32
  }
  func.func @transform_4(%arg0: i32) -> (i32, i32) {
    %c0_i32 = arith.constant 0 : i32
    %c0_i32_0 = arith.constant 0 : i32
    %c0_i32_1 = arith.constant 0 : i32
    return %c0_i32, %c0_i32_0 : i32, i32
  }
  func.func @transform_5(%arg0: i32) -> (i32, i32) {
    %c0_i32 = arith.constant 0 : i32
    %c0_i32_0 = arith.constant 0 : i32
    %c0_i32_1 = arith.constant 0 : i32
    return %c0_i32, %c0_i32_0 : i32, i32
  }
  func.func @transform_6(%arg0: i32) -> (i32, i32) {
    %c0_i32 = arith.constant 0 : i32
    %c0_i32_0 = arith.constant 0 : i32
    %c0_i32_1 = arith.constant 0 : i32
    return %c0_i32, %c0_i32_0 : i32, i32
  }
  func.func @transform_7(%arg0: i32) -> (i32, i32) {
    %c0_i32 = arith.constant 0 : i32
    %c0_i32_0 = arith.constant 0 : i32
    %c0_i32_1 = arith.constant 0 : i32
    return %c0_i32, %c0_i32_0 : i32, i32
  }
  func.func @transform_8(%arg0: i32) -> (i32, i32) {
    %c0_i32 = arith.constant 0 : i32
    %c0_i32_0 = arith.constant 0 : i32
    %c0_i32_1 = arith.constant 0 : i32
    return %c0_i32, %c0_i32_0 : i32, i32
  }
  func.func @transform_9(%arg0: i32) -> (i32, i32) {
    %c0_i32 = arith.constant 0 : i32
    %c0_i32_0 = arith.constant 0 : i32
    %c0_i32_1 = arith.constant 0 : i32
    return %c0_i32, %c0_i32_0 : i32, i32
  }
  func.func @transform_10(%arg0: i32) -> (i32, i32) {
    %c0_i32 = arith.constant 0 : i32
    %c0_i32_0 = arith.constant 0 : i32
    %c0_i32_1 = arith.constant 0 : i32
    return %c0_i32, %c0_i32_0 : i32, i32
  }
  func.func @transform_11(%arg0: i32) -> (i32, i32) {
    %c0_i32 = arith.constant 0 : i32
    %c0_i32_0 = arith.constant 0 : i32
    %c0_i32_1 = arith.constant 0 : i32
    return %c0_i32, %c0_i32_0 : i32, i32
  }
  func.func @transform_12(%arg0: i32) -> (i32, i32) {
    %c0_i32 = arith.constant 0 : i32
    %c0_i32_0 = arith.constant 0 : i32
    %c0_i32_1 = arith.constant 0 : i32
    return %c0_i32, %c0_i32_0 : i32, i32
  }
  func.func @transform_13(%arg0: i32) -> (i32, i32) {
    %c0_i32 = arith.constant 0 : i32
    %c0_i32_0 = arith.constant 0 : i32
    %c0_i32_1 = arith.constant 0 : i32
    return %c0_i32, %c0_i32_0 : i32, i32
  }
  func.func @transform_14(%arg0: i32) -> (i32, i32) {
    %c0_i32 = arith.constant 0 : i32
    %c0_i32_0 = arith.constant 0 : i32
    %c0_i32_1 = arith.constant 0 : i32
    return %c0_i32, %c0_i32_0 : i32, i32
  }
  func.func @transform_15(%arg0: i32) -> (i32, i32) {
    %c0_i32 = arith.constant 0 : i32
    %c0_i32_0 = arith.constant 0 : i32
    %c0_i32_1 = arith.constant 0 : i32
    return %c0_i32, %c0_i32_0 : i32, i32
  }
  func.func @transform_16(%arg0: i32) -> (i32, i32) {
    %c0_i32 = arith.constant 0 : i32
    %c0_i32_0 = arith.constant 0 : i32
    %c0_i32_1 = arith.constant 0 : i32
    return %c0_i32, %c0_i32_0 : i32, i32
  }
  func.func @transform_17(%arg0: i32) -> (i32, i32) {
    %c0_i32 = arith.constant 0 : i32
    %c0_i32_0 = arith.constant 0 : i32
    %c0_i32_1 = arith.constant 0 : i32
    return %c0_i32, %c0_i32_0 : i32, i32
  }
  func.func @transform_18(%arg0: i32) -> (i32, i32) {
    %c0_i32 = arith.constant 0 : i32
    %c0_i32_0 = arith.constant 0 : i32
    %c0_i32_1 = arith.constant 0 : i32
    return %c0_i32, %c0_i32_0 : i32, i32
  }
  func.func @transform_19(%arg0: i32) -> (i32, i32) {
    %c0_i32 = arith.constant 0 : i32
    %c0_i32_0 = arith.constant 0 : i32
    %c0_i32_1 = arith.constant 0 : i32
    return %c0_i32, %c0_i32_0 : i32, i32
  }
  func.func @transform_20(%arg0: i32) -> (i32, i32) {
    %c0_i32 = arith.constant 0 : i32
    %c0_i32_0 = arith.constant 0 : i32
    %c0_i32_1 = arith.constant 0 : i32
    return %c0_i32, %c0_i32_0 : i32, i32
  }
  func.func @transform_21(%arg0: i32) -> (i32, i32) {
    %c0_i32 = arith.constant 0 : i32
    %c0_i32_0 = arith.constant 0 : i32
    %c0_i32_1 = arith.constant 0 : i32
    return %c0_i32, %c0_i32_0 : i32, i32
  }
  func.func @transform_22(%arg0: i32) -> (i32, i32) {
    %c0_i32 = arith.constant 0 : i32
    %c0_i32_0 = arith.constant 0 : i32
    %c0_i32_1 = arith.constant 0 : i32
    return %c0_i32, %c0_i32_0 : i32, i32
  }
  func.func @transform_23(%arg0: i32) -> (i32, i32) {
    %c0_i32 = arith.constant 0 : i32
    %c0_i32_0 = arith.constant 0 : i32
    %c0_i32_1 = arith.constant 0 : i32
    return %c0_i32, %c0_i32_0 : i32, i32
  }
  func.func @transform_24(%arg0: i32) -> (i32, i32) {
    %c0_i32 = arith.constant 0 : i32
    %c0_i32_0 = arith.constant 0 : i32
    %c0_i32_1 = arith.constant 0 : i32
    return %c0_i32, %c0_i32_0 : i32, i32
  }
  func.func @transform_25(%arg0: i32) -> (i32, i32) {
    %c0_i32 = arith.constant 0 : i32
    %c0_i32_0 = arith.constant 0 : i32
    %c0_i32_1 = arith.constant 0 : i32
    return %c0_i32, %c0_i32_0 : i32, i32
  }
  func.func @transform_26(%arg0: i32) -> (i32, i32) {
    %c0_i32 = arith.constant 0 : i32
    %c0_i32_0 = arith.constant 0 : i32
    %c0_i32_1 = arith.constant 0 : i32
    return %c0_i32, %c0_i32_0 : i32, i32
  }
  func.func @transform_27(%arg0: i32) -> (i32, i32) {
    %c0_i32 = arith.constant 0 : i32
    %c0_i32_0 = arith.constant 0 : i32
    %c0_i32_1 = arith.constant 0 : i32
    return %c0_i32, %c0_i32_0 : i32, i32
  }
  func.func @transform_28(%arg0: i32) -> (i32, i32) {
    %c0_i32 = arith.constant 0 : i32
    %c0_i32_0 = arith.constant 0 : i32
    %c0_i32_1 = arith.constant 0 : i32
    return %c0_i32, %c0_i32_0 : i32, i32
  }
  func.func @transform_29(%arg0: i32) -> (i32, i32) {
    %c0_i32 = arith.constant 0 : i32
    %c0_i32_0 = arith.constant 0 : i32
    %c0_i32_1 = arith.constant 0 : i32
    return %c0_i32, %c0_i32_0 : i32, i32
  }
  func.func @transform_30(%arg0: i32) -> (i32, i32) {
    %c0_i32 = arith.constant 0 : i32
    %c0_i32_0 = arith.constant 0 : i32
    %c0_i32_1 = arith.constant 0 : i32
    return %c0_i32, %c0_i32_0 : i32, i32
  }
  func.func @transform_31(%arg0: i32) -> (i32, i32) {
    %c0_i32 = arith.constant 0 : i32
    %c0_i32_0 = arith.constant 0 : i32
    %c0_i32_1 = arith.constant 0 : i32
    return %c0_i32, %c0_i32_0 : i32, i32
  }
  func.func @transform_32(%arg0: i32) -> (i32, i32) {
    %c0_i32 = arith.constant 0 : i32
    %c0_i32_0 = arith.constant 0 : i32
    %c0_i32_1 = arith.constant 0 : i32
    return %c0_i32, %c0_i32_0 : i32, i32
  }
  func.func @transform_33(%arg0: i32) -> (i32, i32) {
    %c0_i32 = arith.constant 0 : i32
    %c0_i32_0 = arith.constant 0 : i32
    %c0_i32_1 = arith.constant 0 : i32
    return %c0_i32, %c0_i32_0 : i32, i32
  }
  func.func @transform_34(%arg0: i32) -> (i32, i32) {
    %c0_i32 = arith.constant 0 : i32
    %c0_i32_0 = arith.constant 0 : i32
    %c0_i32_1 = arith.constant 0 : i32
    return %c0_i32, %c0_i32_0 : i32, i32
  }
  func.func @transform_35(%arg0: i32) -> (i32, i32) {
    %c0_i32 = arith.constant 0 : i32
    %c0_i32_0 = arith.constant 0 : i32
    %c0_i32_1 = arith.constant 0 : i32
    return %c0_i32, %c0_i32_0 : i32, i32
  }
  func.func @transform_36(%arg0: i32) -> (i32, i32, i32) {
    %c0_i32 = arith.constant 0 : i32
    %c0_i32_0 = arith.constant 0 : i32
    %c0_i32_1 = arith.constant 0 : i32
    return %arg0, %c0_i32, %c0_i32_0 : i32, i32, i32
  }
}

</mosaic_0001>

<bundles_post_ra>
// kernel: rrdbnet_forward.1
= control target key start
LH: loop header
LB: loop body
LE: loop exit
PB: predicated region body
PF: predicated region fallthrough
CT: control target
= control target key end

     0   :  { %s4005_s6 = smov 1   ;;  %s4006_s10 = smov 2   ;;  %s5872_s0 = inlined_call_operand.smem [shape: u32[37], index: -1, kind: input, shape index: {}] }
   0x1   :  { %s4054_s5 = sld [smem:[%s5872_s0]]   ;;  %s4007_s14 = smov 3  }
   0x2   :  { %s4059_s9 = sld [smem:[%s5872_s0 + %s4005_s6]]   ;;  %s4008_s18 = smov 4  }
   0x3   :  { %s4064_s13 = sld [smem:[%s5872_s0 + %s4006_s10]]   ;;  %s4009_s22 = smov 5  }
   0x4   :  { %s4069_s17 = sld [smem:[%s5872_s0 + %s4007_s14]]   ;;  %s4010_s26 = smov 6  }
   0x5   :  { %s4074_s21 = sld [smem:[%s5872_s0 + %s4008_s18]]   ;;  %s4011_s30 = smov 7  }
   0x6   :  { %s4079_s25 = sld [smem:[%s5872_s0 + %s4009_s22]]   ;;  %s4012_s4 = smov 8  }
   0x7   :  { %s4084_s29 = sld [smem:[%s5872_s0 + %s4010_s26]]   ;;  %s4013_s10 = smov 9  }
   0x8   :  { %s4089_s3 = sld [smem:[%s5872_s0 + %s4011_s30]]   ;;  %s4014_s15 = smov 10  }
   0x9   :  { %s4094_s8 = sld [smem:[%s5872_s0 + %s4012_s4]]   ;;  %s4015_s20 = smov 11  }
   0xa   :  { %s4099_s14 = sld [smem:[%s5872_s0 + %s4013_s10]]   ;;  %s4016_s26 = smov 12  }
   0xb   :  { %s4104_s19 = sld [smem:[%s5872_s0 + %s4014_s15]]   ;;  %s4017_s1 = smov 13  }
   0xc   :  { %s4109_s24 = sld [smem:[%s5872_s0 + %s4015_s20]]   ;;  %s4018_s7 = smov 14  }
   0xd   :  { %s4114_s30 = sld [smem:[%s5872_s0 + %s4016_s26]]   ;;  %s4019_s15 = smov 15  }
   0xe   :  { %s4119_s6 = sld [smem:[%s5872_s0 + %s4017_s1]]   ;;  %s4020_s22 = smov 16  }
   0xf   :  { %s4124_s12 = sld [smem:[%s5872_s0 + %s4018_s7]]   ;;  %s4021_s28 = smov 17  }
  0x10   :  { %s4129_s20 = sld [smem:[%s5872_s0 + %s4019_s15]]   ;;  %s4022_s7 = smov 18  }
  0x11   :  { %s4134_s27 = sld [smem:[%s5872_s0 + %s4020_s22]]   ;;  %s4023_s15 = smov 19  }
  0x12   :  { %s4139_s4 = sld [smem:[%s5872_s0 + %s4021_s28]]   ;;  %s4024_s22 = smov 20  }
  0x13   :  { %s4025_s28 = smov 21  }
  0x15   :  { %5873 = sst [smem:[#allocation2_spill]] %s4124_s12 }
  0x16   :  { %5874 = sst [smem:[#allocation3_spill]] %s4129_s20 }
  0x17   :  { %5875 = sst [smem:[#allocation4_spill]] %s4134_s27 }
  0x18   :  { %5876 = sst [smem:[#allocation5_spill]] %s4139_s4 }
  0x19   :  { %s4144_s12 = sld [smem:[%s5872_s0 + %s4022_s7]]   ;;  %s4026_s7 = smov 22  }
  0x1a   :  { %s4149_s20 = sld [smem:[%s5872_s0 + %s4023_s15]]   ;;  %s4027_s15 = smov 23  }
  0x1b   :  { %s4154_s27 = sld [smem:[%s5872_s0 + %s4024_s22]]   ;;  %s4028_s22 = smov 24  }
  0x1c   :  { %s4159_s4 = sld [smem:[%s5872_s0 + %s4025_s28]]   ;;  %s4029_s28 = smov 25  }
  0x1f   :  { %5877 = sst [smem:[#allocation6_spill]] %s4144_s12 }
  0x20   :  { %5878 = sst [smem:[#allocation7_spill]] %s4149_s20 }
  0x21   :  { %5879 = sst [smem:[#allocation8_spill]] %s4154_s27 }
  0x22   :  { %5880 = sst [smem:[#allocation9_spill]] %s4159_s4 }
  0x23   :  { %s4164_s12 = sld [smem:[%s5872_s0 + %s4026_s7]]   ;;  %s4030_s7 = smov 26  }
  0x24   :  { %s4169_s20 = sld [smem:[%s5872_s0 + %s4027_s15]]   ;;  %s4031_s15 = smov 27  }
  0x25   :  { %s4174_s27 = sld [smem:[%s5872_s0 + %s4028_s22]]   ;;  %s4032_s22 = smov 28  }
  0x26   :  { %s4179_s4 = sld [smem:[%s5872_s0 + %s4029_s28]]   ;;  %s4033_s28 = smov 29  }
  0x29   :  { %5881 = sst [smem:[#allocation10_spill]] %s4164_s12 }
  0x2a   :  { %5882 = sst [smem:[#allocation11_spill]] %s4169_s20 }
  0x2b   :  { %5883 = sst [smem:[#allocation12_spill]] %s4174_s27 }
  0x2c   :  { %5884 = sst [smem:[#allocation13_spill]] %s4179_s4 }
  0x2d   :  { %s4184_s12 = sld [smem:[%s5872_s0 + %s4030_s7]]   ;;  %s4034_s7 = smov 30  }
  0x2e   :  { %s4189_s20 = sld [smem:[%s5872_s0 + %s4031_s15]]   ;;  %s4035_s15 = smov 31  }
  0x2f   :  { %s4194_s27 = sld [smem:[%s5872_s0 + %s4032_s22]]   ;;  %s4036_s22 = smov 32  }
  0x30   :  { %s4199_s4 = sld [smem:[%s5872_s0 + %s4033_s28]]   ;;  %s4037_s28 = smov 33  }
  0x33   :  { %5885 = sst [smem:[#allocation14_spill]] %s4184_s12 }
  0x34   :  { %5886 = sst [smem:[#allocation15_spill]] %s4189_s20 }
  0x35   :  { %5887 = sst [smem:[#allocation16_spill]] %s4194_s27 }
  0x36   :  { %5888 = sst [smem:[#allocation17_spill]] %s4199_s4 }
  0x37   :  { %s4204_s12 = sld [smem:[%s5872_s0 + %s4034_s7]]   ;;  %s4038_s7 = smov 34  }
  0x38   :  { %s4209_s20 = sld [smem:[%s5872_s0 + %s4035_s15]]   ;;  %s4039_s15 = smov 35  }
  0x39   :  { %s4214_s27 = sld [smem:[%s5872_s0 + %s4036_s22]]   ;;  %s4040_s22 = smov 36  }
  0x3a   :  { %s4219_s4 = sld [smem:[%s5872_s0 + %s4037_s28]]   ;;  %s4236_s28 = smov 0  }
  0x3d   :  { %5889 = sst [smem:[#allocation18_spill]] %s4204_s12 }
  0x3e   :  { %5890 = sst [smem:[#allocation19_spill]] %s4209_s20 }
  0x3f   :  { %5891 = sst [smem:[#allocation20_spill]] %s4214_s27 }
  0x40   :  { %s4224_s12 = sld [smem:[%s5872_s0 + %s4038_s7]]  }
  0x41   :  { %s4229_s20 = sld [smem:[%s5872_s0 + %s4039_s15]]  }
  0x42   :  { %s4234_s27 = sld [smem:[%s5872_s0 + %s4040_s22]]  }
  0x43 LB: > { %s3603_s1 = sadd.s32 4294967295, %s4003_s28   ;;  %p3607_p0 = scmp.ge.s32.totalorder %s4003_s28, 1  ;;  %s4003_s28 = sphi %s4236_s28, %s83_s28  }
  0x44   : > { %p999_p1 = scmp.lt.s32.totalorder %s4003_s28, 3 }
  0x46   : > { %p1000_p2 = pnand %p3607_p0, %p999_p1 }
  0x47   : > { %p1089_p3 = scmp.lt.s32.totalorder (!%p1000_p2), %s3603_s1, 1  ;;  %s4041_s7 = smov (!%p1000_p2), 112  }
  0x48   : > { %1003 = sbr.rel (%p1000_p2) target bundleno = 5128 (0x1408), region = 164  ;;  %s4042_s10 = smov (!%p1000_p2), 16  }
  0x49   : > { %s4043_s11 = smov (!%p1000_p2), 127   ;;  %s4044_s15 = smov (!%p1000_p2), 1  }
  0x4a   : > { %s5902_s16 = sld [smem:[#allocation4_spill]] (!%p1000_p2) }
  0x4b   : > { %s5903_s18 = sld [smem:[#allocation2_spill]] (!%p1000_p2) }
  0x4c   : > { %s5904_s22 = sld [smem:[#allocation3_spill]] (!%p1000_p2) }
  0x4d   : > { %s5922_s1 = smov (!%p1089_p3, %s3603_s1), 1  ;;  %vm1202_vm0 = vcmask 916480   ;;  %vm1138_vm1 = vcmask 130048   ;;  %v1099_v11 = vlaneseq  ;;  %vm1164_vm2 = vcmask 1039360   ;;  %v1231_v22 = vld [vmem:[%s4064_s13] sm:$0xff]  ;;  %s5905_s23 = sld [smem:[#allocation8_spill]] }
  0x4e   : > { %s3943_s0 = sshll.u32 %s5922_s1, 4  ;;  %v4045_v23 = vmov 0   ;;  %vm1149_vm7 = vcmask 7168   ;;  %vm4331_vm8 = vmneg %vm1138_vm1  ;;  %v1230_v44 = vld [vmem:[%s4059_s9] sm:$0xff]  ;;  %vm1237_vm9 = vcmask 588800   ;;  %s5906_s26 = sld [smem:[#allocation5_spill]] }
  0x4f   : > { %s1093_s2 = scalar_lea.vmem %s4054_s5, %s3943_s0  ;;  %v1100_v12 = vand.u32 127, %v1099_v11  ;;  %3994 = vset.pattern.permute.xlu1 %v4045_v23  ;;  %3995 = vset.pattern.permute.xlu0 %v4045_v23  ;;  %v1368_v60 = vld [vmem:[%s4074_s21] sm:$0xff]  ;;  %s5907_s0 = sld [smem:[#allocation6_spill]]  ;;  %vm3508_vm10 = vcmask 1043456  }
  0x50   : > { %v4248_v0 = vld [vmem:[%s1093_s2] sm:$0xff]  ;;  %v4256_v1 = vld [vmem:[%s1093_s2 + $0x8] sm:$0xff]  ;;  %3996 = vset.pattern.permute.xlu2 %v4045_v23  ;;  %s5908_s2 = sld [smem:[#allocation7_spill]] }
  0x51   : > { %1198 = vrot.lane.b32.xlu0 %v4248_v0, %s4041_s7  ;;  %1134 = vrot.lane.b32.xlu1 %v4248_v0, %s4042_s10  ;;  %v1101_v13 = vadd.s32 128, %v1100_v12  ;;  %v1106_v15 = vand.u32 15, %v1100_v12 }
  0x52   : > { %1187 = vrot.lane.b32.xlu2 %v4248_v0, %s4043_s11 }
  0x53   : > { %v1113_v16 = vand.u32 15, %v1101_v13  ;;  %vm4284_vm3 = vcmp.le.s32.totalorder %v1106_v15, 14  ;;  %vm4300_vm5 = vcmp.ge.s32.totalorder %v1106_v15, 1 }
  0x55   : > { %vm4288_vm4 = vcmp.le.s32.totalorder %v1113_v16, 14  ;;  %vm4304_vm6 = vcmp.ge.s32.totalorder %v1113_v16, 1 }
  0x59   : > { %1200 = vrot.lane.b32.xlu0 %v4256_v1, %s4041_s7  ;;  %1136 = vrot.lane.b32.xlu1 %v4256_v1, %s4042_s10 }
  0x61   : > { %1189 = vrot.lane.b32.xlu0 %v4256_v1, %s4043_s11  ;;  %1176 = vrot.lane.b32.xlu1 %v4256_v1, %s4044_s15 }
  0xac   : > { %v1188_v10 = vpop.permute.xlu2 %1187 }
  0xc3   : > { %v1199_v2 = vpop.permute.xlu0 %1198  ;;  %v4266_v3 = vpop.permute.xlu1 %1134 }
  0xc4   : > { %v1142_v8 = vsel %vm1138_vm1, 0.0, %v4266_v3 }
  0xcb   : > { %v1201_v4 = vpop.permute.xlu0 %1200  ;;  %v1137_v7 = vpop.permute.xlu1 %1136 }
  0xcc   : > { %v1206_v5 = vsel %vm1202_vm0, %v1201_v4, 0.0  ;;  %v1203_v6 = vsel %vm1202_vm0, %v1199_v2, %v1201_v4  ;;  %v1139_v9 = vsel %vm1138_vm1, %v4266_v3, %v1137_v7 }
  0xcd   : > { %1208 = vrot.lane.b32.xlu0 %v1206_v5, %s4044_s15  ;;  %1211 = vrot.lane.b32.xlu1 %v1203_v6, %s4044_s15 }
  0xce   : > { %1219 = vrot.lane.b32.xlu2 %v1203_v6, %s4043_s11 }
  0xd3   : > { %v1177_v24 = vpop.permute.xlu1 %1176  ;;  %v1190_v25 = vpop.permute.xlu0 %1189 }
  0xd4   : > { %v1191_v32 = vsel %vm1164_vm2, %v1188_v10, %v1190_v25  ;;  %v1195_v33 = vsel %vm1164_vm2, %v1190_v25, %v1188_v10 }
  0xd5   : > { %1160 = vrot.lane.b32.xlu0 %v1142_v8, %s4043_s11  ;;  %1162 = vrot.lane.b32.xlu1 %v1139_v9, %s4043_s11 }
  0xd6   : > { %1221 = vrot.lane.b32.xlu2 %v1206_v5, %s4043_s11 }
  0xdd   : > { %1147 = vrot.lane.b32.xlu0 %v1142_v8, %s4044_s15  ;;  %1234 = vperm.xlu1 %3994, %v1231_v22  }
  0xde   : > { %1179 = vrot.lane.b32.xlu2 %v4248_v0, %s4044_s15 }
  0xe6   : > { %1143 = vrot.lane.b32.xlu2 %v1139_v9, %s4044_s15 }
 0x128   : > { %v1220_v14 = vpop.permute.xlu2 %1219 }
 0x130   : > { %v1222_v19 = vpop.permute.xlu2 %1221 }
 0x131   : > { %v1223_v20 = vsel %vm1164_vm2, %v1220_v14, %v1222_v19  ;;  %v1227_v21 = vsel %vm1164_vm2, %v1222_v19, %v1220_v14 }
 0x132   : > { %3612 = vmatpush.msk.msra.mxu0 %vm4284_vm3, %v1223_v20  ;;  %3621 = vmatpush.msk.msra.mxu1 %vm4288_vm4, %v1227_v21 }
 0x134   : > { %1249 = vmatpush.msra.mxu0 %v1203_v6  ;;  %3622 = vmatpush.msk.msra.mxu1 %vm1202_vm0, %v1201_v4 }
 0x138   : > { %v1180_v34 = vpop.permute.xlu2 %1179 }
 0x139   : > { %v1184_v35 = vsel %vm1149_vm7, %v1177_v24, %v1180_v34  ;;  %v1181_v36 = vsel %vm1149_vm7, %v1180_v34, %v1177_v24 }
 0x13f   : > { %v1212_v28 = vpop.permute.xlu1 %1211  ;;  %v1209_v29 = vpop.permute.xlu0 %1208 }
 0x140   : > { %v1216_v30 = vsel %vm1149_vm7, %v1209_v29, %v1212_v28  ;;  %v1213_v31 = vsel %vm1149_vm7, %v1212_v28, %v1209_v29  ;;  %v1144_v42 = vpop.permute.xlu2 %1143 }
 0x141   : > { %3613 = vmatpush.msk.msra.mxu0 %vm4300_vm5, %v1216_v30  ;;  %3623 = vmatpush.msk.msra.mxu1 %vm4304_vm6, %v1213_v31 }
 0x143   : > { %3614 = vmatpush.msk.msra.mxu0 %vm4284_vm3, %v1191_v32  ;;  %3624 = vmatpush.msk.msra.mxu1 %vm4288_vm4, %v1195_v33 }
 0x145   : > { %1252 = vmatpush.msra.mxu0 %v4248_v0  ;;  %1272 = vmatpush.msra.mxu1 %v4256_v1 }
 0x147   : > { %v1163_v37 = vpop.permute.xlu1 %1162  ;;  %3615 = vmatpush.msk.msra.mxu0 %vm4300_vm5, %v1184_v35  ;;  %3625 = vmatpush.msk.msra.mxu1 %vm4304_vm6, %v1181_v36  ;;  %v1161_v38 = vpop.permute.xlu0 %1160 }
 0x148   : > { %v1165_v39 = vsel %vm1164_vm2, %v1161_v38, %v1163_v37  ;;  %v1169_v40 = vsel %vm1164_vm2, %v1163_v37, %v1161_v38  ;;  %v1367_v37 = vld [vmem:[%s4069_s17] sm:$0xff] }
 0x149   : > { %3616 = vmatpush.msk.msra.mxu0 %vm4284_vm3, %v1165_v39  ;;  %3626 = vmatpush.msk.msra.mxu1 %vm4288_vm4, %v1169_v40 }
 0x14b   : > { %3618 = vmatpush.msk.msra.mxu0 %vm4331_vm8, %v4266_v3  ;;  %1275 = vmatpush.msra.mxu1 %v1139_v9 }
 0x14f   : > { %v1148_v43 = vpop.permute.xlu0 %1147  ;;  %v1235_v47 = vpop.permute.xlu1 %1234 }
 0x150   : > { %v1153_v45 = vsel %vm1149_vm7, %v1144_v42, %v1148_v43  ;;  %v1150_v46 = vsel %vm1149_vm7, %v1148_v43, %v1144_v42 }
 0x151   : > { %3619 = vmatpush.msk.msra.mxu0 %vm4300_vm5, %v1153_v45  ;;  %3627 = vmatpush.msk.msra.mxu1 %vm4304_vm6, %v1150_v46 }
 0x152   : > { %3620 = vmatmul.msk.f32.vlgmr.msra.gmra.mxu0 %vm1237_vm9, %v1230_v44  ;;  %3628 = vmatmul.msk.f32.vlgmr.msra.gmra.mxu1 %vm1237_vm9, %v1230_v44 }
 0x1cf   : > { %v1258_v48 = vpop.f32.mrf.mxu0  ;;  %v1278_v49 = vpop.f32.mrf.mxu1 }
 0x1d0   : > { %v4351_v50 = vadd.f32 %v1258_v48, %v1235_v47  ;;  %v4353_v51 = vadd.f32 %v1278_v49, %v1235_v47 }
 0x1d2   : > { %1283 = vrot.lane.b32.xlu1 %v4351_v50, %s4042_s10  ;;  %1336 = vrot.lane.b32.xlu2 %v4351_v50, %s4041_s7 }
 0x1d3   : > { %1338 = vrot.lane.b32.xlu0 %v4353_v51, %s4041_s7 }
 0x1da   : > { %1325 = vrot.lane.b32.xlu1 %v4351_v50, %s4043_s11  ;;  %1285 = vrot.lane.b32.xlu2 %v4353_v51, %s4042_s10 }
 0x1db   : > { %1314 = vrot.lane.b32.xlu0 %v4353_v51, %s4044_s15 }
 0x1e2   : > { %1327 = vrot.lane.b32.xlu2 %v4353_v51, %s4043_s11 }
 0x22c   : > { %v1337_v52 = vpop.permute.xlu2 %1336 }
 0x234   : > { %v1286_v58 = vpop.permute.xlu2 %1285 }
 0x23c   : > { %v1328_v63 = vpop.permute.xlu2 %1327 }
 0x244   : > { %v4382_v56 = vpop.permute.xlu1 %1283 }
 0x245   : > { %v4369_v53 = vpop.permute.xlu0 %1338  ;;  %v4387_v57 = vsel %vm1138_vm1, %v4351_v50, %v4382_v56  ;;  %v4397_v59 = vsel %vm1138_vm1, %v4382_v56, %v1286_v58  ;;  %v1421_v62 = vsel %vm1138_vm1, 0.0, %v4382_v56 }
 0x246   : > { %v1343_v54 = vsel %vm1202_vm0, %v4369_v53, %v4353_v51  ;;  %v4376_v55 = vsel %vm1202_vm0, %v1337_v52, %v4369_v53  ;;  %v4408_v61 = vsel %vm1202_vm0, %v4369_v53, 0.0 }
 0x247   : > { %1345 = vrot.lane.b32.xlu2 %v1343_v54, %s4044_s15  ;;  %1358 = vrot.lane.b32.xlu1 %v1343_v54, %s4043_s11 }
 0x248   : > { %1356 = vrot.lane.b32.xlu0 %v4376_v55, %s4043_s11 }
 0x24c   : > { %v1326_v0 = vpop.permute.xlu1 %1325 }
 0x24d   : > { %v1315_v1 = vpop.permute.xlu0 %1314  ;;  %v4431_v14 = vsel %vm1164_vm2, %v1326_v0, %v1328_v63  ;;  %v4434_v15 = vsel %vm1164_vm2, %v1328_v63, %v1326_v0 }
 0x24e   : > { %v1334_v20 = vsel %vm4284_vm3, %v4431_v14, %v4351_v50  ;;  %v1335_v21 = vsel %vm4288_vm4, %v4434_v15, %v4353_v51 }
 0x24f   : > { %1303 = vrot.lane.b32.xlu2 %v4387_v57, %s4043_s11  ;;  %1317 = vrot.lane.b32.xlu1 %v4351_v50, %s4044_s15 }
 0x250   : > { %1348 = vrot.lane.b32.xlu0 %v4376_v55, %s4044_s15 }
 0x257   : > { %1295 = vrot.lane.b32.xlu2 %v4387_v57, %s4044_s15  ;;  %1291 = vrot.lane.b32.xlu1 %v4397_v59, %s4044_s15 }
 0x258   : > { %1305 = vrot.lane.b32.xlu0 %v4397_v59, %s4043_s11 }
 0x260   : > { %1371 = vperm.xlu0 %3995, %v1368_v60  }
 0x268   : > { %1453 = vrot.lane.b32.xlu0 %v4408_v61, %s4043_s11 }
 0x270   : > { %1431 = vrot.lane.b32.xlu0 %v1421_v62, %s4043_s11 }
 0x278   : > { %1423 = vrot.lane.b32.xlu0 %v1421_v62, %s4044_s15 }
 0x2a1   : > { %v1346_v2 = vpop.permute.xlu2 %1345 }
 0x2a9   : > { %v1304_v10 = vpop.permute.xlu2 %1303 }
 0x2b1   : > { %v1296_v32 = vpop.permute.xlu2 %1295 }
 0x2b9   : > { %v1359_v3 = vpop.permute.xlu1 %1358 }
 0x2ba   : > { %v1357_v4 = vpop.permute.xlu0 %1356 }
 0x2bb   : > { %v1360_v5 = vsel %vm1164_vm2, %v1357_v4, %v1359_v3  ;;  %v1364_v6 = vsel %vm1164_vm2, %v1359_v3, %v1357_v4 }
 0x2bc   : > { %v1365_v7 = vsel %vm4284_vm3, %v1360_v5, %v4376_v55  ;;  %v1366_v8 = vsel %vm4288_vm4, %v1364_v6, %v1343_v54 }
 0x2bd   : > { %1384 = vmatpush.msra.mxu2 %v1365_v7  ;;  %1404 = vmatpush.msra.mxu3 %v1366_v8 }
 0x2bf   : > { %1385 = vmatpush.msra.mxu2 %v4376_v55  ;;  %1405 = vmatpush.msra.mxu3 %v1343_v54 }
 0x2c1   : > { %v1318_v9 = vpop.permute.xlu1 %1317 }
 0x2c2   : > { %v4424_v11 = vpop.permute.xlu0 %1348  ;;  %v4450_v22 = vsel %vm1149_vm7, %v1315_v1, %v1318_v9  ;;  %v4453_v23 = vsel %vm1149_vm7, %v1318_v9, %v1315_v1 }
 0x2c3   : > { %v1353_v12 = vsel %vm1149_vm7, %v1346_v2, %v4424_v11  ;;  %v1350_v13 = vsel %vm1149_vm7, %v4424_v11, %v1346_v2  ;;  %v1323_v28 = vsel %vm4300_vm5, %v4450_v22, %v4351_v50  ;;  %v1324_v29 = vsel %vm4304_vm6, %v4453_v23, %v4353_v51 }
 0x2c4   : > { %v1354_v16 = vsel %vm4300_vm5, %v1353_v12, %v4376_v55  ;;  %v1355_v19 = vsel %vm4304_vm6, %v1350_v13, %v1343_v54 }
 0x2c5   : > { %1386 = vmatpush.msra.mxu2 %v1354_v16  ;;  %1406 = vmatpush.msra.mxu3 %v1355_v19 }
 0x2c7   : > { %1387 = vmatpush.msra.mxu2 %v1334_v20  ;;  %1407 = vmatpush.msra.mxu3 %v1335_v21 }
 0x2c9   : > { %1388 = vmatpush.msra.mxu2 %v4351_v50  ;;  %1408 = vmatpush.msra.mxu3 %v4353_v51  ;;  %v4457_v24 = vpop.permute.xlu1 %1291 }
 0x2ca   : > { %v4459_v25 = vpop.permute.xlu0 %1305  ;;  %v1300_v35 = vsel %vm1149_vm7, %v4457_v24, %v1296_v32  ;;  %v1297_v36 = vsel %vm1149_vm7, %v1296_v32, %v4457_v24 }
 0x2cb   : > { %1389 = vmatpush.msra.mxu2 %v1323_v28  ;;  %1409 = vmatpush.msra.mxu3 %v1324_v29  ;;  %v1307_v30 = vsel %vm1164_vm2, %v1304_v10, %v4459_v25  ;;  %v1311_v31 = vsel %vm1164_vm2, %v4459_v25, %v1304_v10  ;;  %v1301_v38 = vsel %vm4300_vm5, %v1300_v35, %v4387_v57 }
 0x2cc   : > { %v1312_v33 = vsel %vm4284_vm3, %v1307_v30, %v4387_v57  ;;  %v1313_v34 = vsel %vm4288_vm4, %v1311_v31, %v4397_v59  ;;  %v1302_v39 = vsel %vm4304_vm6, %v1297_v36, %v4397_v59  ;;  %v1548_v36 = vld [vmem:[%s4084_s29] sm:$0xff] }
 0x2cd   : > { %1390 = vmatpush.msra.mxu2 %v1312_v33  ;;  %1410 = vmatpush.msra.mxu3 %v1313_v34 }
 0x2cf   : > { %1391 = vmatpush.msra.mxu2 %v4387_v57  ;;  %1411 = vmatpush.msra.mxu3 %v4397_v59 }
 0x2d1   : > { %1392 = vmatpush.msra.mxu2 %v1301_v38  ;;  %1412 = vmatpush.msra.mxu3 %v1302_v39 }
 0x2d2   : > { %3629 = vmatmul.msk.f32.vlgmr.msra.gmra.mxu2 %vm1237_vm9, %v1367_v37  ;;  %3630 = vmatmul.msk.f32.vlgmr.msra.gmra.mxu3 %vm1237_vm9, %v1367_v37  ;;  %v1372_v40 = vpop.permute.xlu0 %1371 }
 0x2da   : > { %v1454_v42 = vpop.permute.xlu0 %1453 }
 0x2db   : > { %v4495_v43 = vsel %vm1164_vm2, %v1357_v4, %v1454_v42  ;;  %v4498_v44 = vsel %vm1164_vm2, %v1454_v42, %v1357_v4  ;;  %v1635_v4 = vld [vmem:[%s4089_s3] sm:$0xff] }
 0x2dc   : > { %3648 = vmatpush.msk.msrb.mxu2 %vm4284_vm3, %v4495_v43  ;;  %3657 = vmatpush.msk.msrb.mxu3 %vm4288_vm4, %v4498_v44 }
 0x2de   : > { %1603 = vmatpush.msrb.mxu2 %v4376_v55  ;;  %3658 = vmatpush.msk.msrb.mxu3 %vm1202_vm0, %v4369_v53 }
 0x2e2   : > { %v1432_v5 = vpop.permute.xlu0 %1431 }
 0x2e3   : > { %v1433_v8 = vsel %vm1164_vm2, %v1432_v5, %v4459_v25  ;;  %v1436_v10 = vsel %vm1164_vm2, %v4459_v25, %v1432_v5  ;;  %v1734_v5 = vld [vmem:[%s4099_s14] sm:$0xff] }
 0x2ea   : > { %v1424_v9 = vpop.permute.xlu0 %1423 }
 0x2eb   : > { %v1425_v12 = vsel %vm1149_vm7, %v1424_v9, %v4457_v24 }
 0x355   : > { %v1394_v45 = vpop.f32.mrf.mxu2  ;;  %v1414_v46 = vpop.f32.mrf.mxu3 }
 0x356   : > { %v1395_v47 = vadd.f32 %v1394_v45, %v1372_v40  ;;  %v1415_v48 = vadd.f32 %v1414_v46, %v1372_v40 }
 0x358   : > { %v1417_v49 = vmul.f32 0.2, %v1395_v47  ;;  %v1418_v52 = vmul.f32 0.2, %v1415_v48 }
 0x35a   : > { %v4509_v54 = vmax.f32 %v1395_v47, %v1417_v49  ;;  %v4511_v57 = vmax.f32 %v1415_v48, %v1418_v52 }
 0x35c   : > { %1518 = vrot.lane.b32.xlu2 %v4511_v57, %s4041_s7  ;;  %1516 = vrot.lane.b32.xlu1 %v4509_v54, %s4041_s7 }
 0x364   : > { %1465 = vrot.lane.b32.xlu2 %v4511_v57, %s4042_s10  ;;  %1463 = vrot.lane.b32.xlu1 %v4509_v54, %s4042_s10 }
 0x36c   : > { %1507 = vrot.lane.b32.xlu2 %v4511_v57, %s4043_s11  ;;  %1445 = vrot.lane.b32.xlu1 %v4408_v61, %s4044_s15 }
 0x374   : > { %1505 = vrot.lane.b32.xlu1 %v4509_v54, %s4043_s11 }
 0x37c   : > { %1494 = vrot.lane.b32.xlu1 %v4511_v57, %s4044_s15 }
 0x3b6   : > { %v4529_v58 = vpop.permute.xlu2 %1518 }
 0x3b7   : > { %v1523_v60 = vsel %vm1202_vm0, %v4529_v58, 0.0 }
 0x3b8   : > { %1538 = vrot.lane.b32.xlu0 %v1523_v60, %s4043_s11  ;;  %1525 = vrot.lane.b32.xlu1 %v1523_v60, %s4044_s15 }
 0x3be   : > { %v1466_v63 = vpop.permute.xlu2 %1465 }
 0x3ce   : > { %v1517_v62 = vpop.permute.xlu1 %1516 }
 0x3cf   : > { %v4537_v61 = vsel %vm1202_vm0, %v1517_v62, %v4529_v58 }
 0x3d0   : > { %1536 = vrot.lane.b32.xlu2 %v4537_v61, %s4043_s11 }
 0x3d6   : > { %v4541_v0 = vpop.permute.xlu1 %1463 }
 0x3d7   : > { %v1470_v1 = vsel %vm1138_vm1, 0.0, %v4541_v0  ;;  %v4547_v2 = vsel %vm1138_vm1, %v4541_v0, %v1466_v63 }
 0x3d8   : > { %1528 = vrot.lane.b32.xlu2 %v4537_v61, %s4044_s15  ;;  %1483 = vrot.lane.b32.xlu0 %v1470_v1, %s4043_s11 }
 0x3d9   : > { %1485 = vrot.lane.b32.xlu1 %v4547_v2, %s4043_s11 }
 0x3de   : > { %v1446_v3 = vpop.permute.xlu1 %1445 }
 0x3df   : > { %v1450_v6 = vsel %vm1149_vm7, %v1446_v3, %v4424_v11  ;;  %v1448_v7 = vsel %vm1149_vm7, %v4424_v11, %v1446_v3  ;;  %v1428_v11 = vsel %vm1149_vm7, %v4457_v24, %v1424_v9  ;;  %v1867_v3 = vld [vmem:[%s4109_s24] sm:$0xff] }
 0x3e0   : > { %1497 = vrot.lane.b32.xlu2 %v4509_v54, %s4044_s15  ;;  %1475 = vrot.lane.b32.xlu0 %v1470_v1, %s4044_s15 }
 0x3e1   : > { %1638 = vperm.xlu1 %3994, %v1635_v4   ;;  %3649 = vmatpush.msk.msrb.mxu2 %vm4300_vm5, %v1450_v6  ;;  %v1733_v4 = vld [vmem:[%s4094_s8] sm:$0xff] }
 0x3e2   : > { %3659 = vmatpush.msk.msrb.mxu3 %vm4304_vm6, %v1448_v7 }
 0x3e3   : > { %3650 = vmatpush.msk.msrb.mxu2 %vm4284_vm3, %v4431_v14 }
 0x3e4   : > { %3660 = vmatpush.msk.msrb.mxu3 %vm4288_vm4, %v4434_v15 }
 0x3e5   : > { %1606 = vmatpush.msrb.mxu2 %v4351_v50 }
 0x3e6   : > { %1626 = vmatpush.msrb.mxu3 %v4353_v51 }
 0x3e7   : > { %3651 = vmatpush.msk.msrb.mxu2 %vm4300_vm5, %v4450_v22 }
 0x3e8   : > { %3661 = vmatpush.msk.msrb.mxu3 %vm4304_vm6, %v4453_v23  ;;  %1471 = vrot.lane.b32.xlu2 %v4547_v2, %s4044_s15 }
 0x3e9   : > { %3652 = vmatpush.msk.msrb.mxu2 %vm4284_vm3, %v1433_v8 }
 0x3ea   : > { %3662 = vmatpush.msk.msrb.mxu3 %vm4288_vm4, %v1436_v10 }
 0x3eb   : > { %3654 = vmatpush.msk.msrb.mxu2 %vm4331_vm8, %v4382_v56 }
 0x3ec   : > { %1629 = vmatpush.msrb.mxu3 %v4397_v59 }
 0x3ed   : > { %3655 = vmatpush.msk.msrb.mxu2 %vm4300_vm5, %v1428_v11 }
 0x3ee   : > { %3663 = vmatpush.msk.msrb.mxu3 %vm4304_vm6, %v1425_v12 }
 0x3ef   : > { %3682 = vmatpush.msk.msra.mxu2 %vm4284_vm3, %v4495_v43 }
 0x3f0   : > { %3691 = vmatpush.msk.msra.mxu3 %vm4288_vm4, %v4498_v44 }
 0x3f1   : > { %1789 = vmatpush.msra.mxu2 %v4376_v55  ;;  %v1508_v55 = vpop.permute.xlu2 %1507 }
 0x3f2   : > { %3692 = vmatpush.msk.msra.mxu3 %vm1202_vm0, %v4369_v53  ;;  %v1506_v53 = vpop.permute.xlu1 %1505 }
 0x3f3   : > { %3683 = vmatpush.msk.msra.mxu2 %vm4300_vm5, %v1450_v6  ;;  %v1513_v24 = vsel %vm1164_vm2, %v1508_v55, %v1506_v53 }
 0x3f4   : > { %3693 = vmatpush.msk.msra.mxu3 %vm4304_vm6, %v1448_v7 }
 0x3f5   : > { %3684 = vmatpush.msk.msra.mxu2 %vm4284_vm3, %v4431_v14 }
 0x3f6   : > { %3694 = vmatpush.msk.msra.mxu3 %vm4288_vm4, %v4434_v15 }
 0x3f7   : > { %1792 = vmatpush.msra.mxu2 %v4351_v50 }
 0x3f8   : > { %1812 = vmatpush.msra.mxu3 %v4353_v51 }
 0x3f9   : > { %3685 = vmatpush.msk.msra.mxu2 %vm4300_vm5, %v4450_v22 }
 0x3fa   : > { %3695 = vmatpush.msk.msra.mxu3 %vm4304_vm6, %v4453_v23  ;;  %v1495_v13 = vpop.permute.xlu1 %1494  ;;  %v1509_v23 = vsel %vm1164_vm2, %v1506_v53, %v1508_v55 }
 0x3fb   : > { %3686 = vmatpush.msk.msra.mxu2 %vm4284_vm3, %v1433_v8 }
 0x3fc   : > { %3696 = vmatpush.msk.msra.mxu3 %vm4288_vm4, %v1436_v10 }
 0x3fd   : > { %3688 = vmatpush.msk.msra.mxu2 %vm4331_vm8, %v4382_v56  ;;  %v1547_v56 = vld [vmem:[%s4079_s25] sm:$0xff] }
 0x3fe   : > { %1815 = vmatpush.msra.mxu3 %v4397_v59  ;;  %3656 = vmatmul.msk.f32.vlgmr.msrb.gmra.mxu2 %vm1237_vm9, %v1547_v56 }
 0x3ff   : > { %3689 = vmatpush.msk.msra.mxu2 %vm4300_vm5, %v1428_v11  ;;  %3664 = vmatmul.msk.f32.vlgmr.msrb.gmra.mxu3 %vm1237_vm9, %v1547_v56 }
 0x400   : > { %3697 = vmatpush.msk.msra.mxu3 %vm4304_vm6, %v1425_v12 }
 0x406   : > { %3690 = vmatmul.msk.f32.vlgmr.msra.gmra.mxu2 %vm1237_vm9, %v1733_v4 }
 0x407   : > { %3698 = vmatmul.msk.f32.vlgmr.msra.gmra.mxu3 %vm1237_vm9, %v1733_v4 }
 0x42a   : > { %v1537_v14 = vpop.permute.xlu2 %1536  ;;  %v1539_v15 = vpop.permute.xlu0 %1538 }
 0x42b   : > { %v1540_v16 = vsel %vm1164_vm2, %v1537_v14, %v1539_v15  ;;  %v1544_v19 = vsel %vm1164_vm2, %v1539_v15, %v1537_v14  ;;  %v1526_v59 = vpop.permute.xlu1 %1525 }
 0x42c   : > { %3631 = vmatpush.msk.msrb.mxu0 %vm4284_vm3, %v1540_v16  ;;  %3640 = vmatpush.msk.msrb.mxu1 %vm4288_vm4, %v1544_v19 }
 0x42e   : > { %1560 = vmatpush.msrb.mxu0 %v4537_v61  ;;  %3641 = vmatpush.msk.msrb.mxu1 %vm1202_vm0, %v4529_v58 }
 0x432   : > { %v1529_v20 = vpop.permute.xlu2 %1528 }
 0x433   : > { %v1533_v21 = vsel %vm1149_vm7, %v1526_v59, %v1529_v20  ;;  %v1530_v22 = vsel %vm1149_vm7, %v1529_v20, %v1526_v59 }
 0x434   : > { %3632 = vmatpush.msk.msrb.mxu0 %vm4300_vm5, %v1533_v21  ;;  %3642 = vmatpush.msk.msrb.mxu1 %vm4304_vm6, %v1530_v22 }
 0x436   : > { %3633 = vmatpush.msk.msrb.mxu0 %vm4284_vm3, %v1509_v23  ;;  %3643 = vmatpush.msk.msrb.mxu1 %vm4288_vm4, %v1513_v24 }
 0x438   : > { %1563 = vmatpush.msrb.mxu0 %v4509_v54  ;;  %1583 = vmatpush.msrb.mxu1 %v4511_v57 }
 0x43a   : > { %v1498_v25 = vpop.permute.xlu2 %1497 }
 0x43b   : > { %v1502_v28 = vsel %vm1149_vm7, %v1495_v13, %v1498_v25  ;;  %v1499_v29 = vsel %vm1149_vm7, %v1498_v25, %v1495_v13 }
 0x43c   : > { %3634 = vmatpush.msk.msrb.mxu0 %vm4300_vm5, %v1502_v28  ;;  %3644 = vmatpush.msk.msrb.mxu1 %vm4304_vm6, %v1499_v29 }
 0x442   : > { %v1472_v34 = vpop.permute.xlu2 %1471 }
 0x44a   : > { %v1484_v30 = vpop.permute.xlu0 %1483 }
 0x44b   : > { %v1486_v31 = vpop.permute.xlu1 %1485 }
 0x44c   : > { %v1487_v32 = vsel %vm1164_vm2, %v1484_v30, %v1486_v31  ;;  %v1491_v33 = vsel %vm1164_vm2, %v1486_v31, %v1484_v30 }
 0x44d   : > { %3635 = vmatpush.msk.msrb.mxu0 %vm4284_vm3, %v1487_v32  ;;  %3645 = vmatpush.msk.msrb.mxu1 %vm4288_vm4, %v1491_v33 }
 0x44f   : > { %3637 = vmatpush.msk.msrb.mxu0 %vm4331_vm8, %v4541_v0  ;;  %1586 = vmatpush.msrb.mxu1 %v4547_v2 }
 0x452   : > { %v1476_v35 = vpop.permute.xlu0 %1475 }
 0x453   : > { %v1480_v37 = vsel %vm1149_vm7, %v1472_v34, %v1476_v35  ;;  %v1477_v38 = vsel %vm1149_vm7, %v1476_v35, %v1472_v34  ;;  %v1639_v46 = vpop.permute.xlu1 %1638 }
 0x454   : > { %3638 = vmatpush.msk.msrb.mxu0 %vm4300_vm5, %v1480_v37  ;;  %3646 = vmatpush.msk.msrb.mxu1 %vm4304_vm6, %v1477_v38 }
 0x455   : > { %3639 = vmatmul.msk.f32.vlgmr.msrb.gmra.mxu0 %vm1237_vm9, %v1548_v36  ;;  %3647 = vmatmul.msk.f32.vlgmr.msrb.gmra.mxu1 %vm1237_vm9, %v1548_v36 }
 0x456   : > { %3665 = vmatpush.msk.msra.mxu0 %vm4284_vm3, %v1540_v16  ;;  %3674 = vmatpush.msk.msra.mxu1 %vm4288_vm4, %v1544_v19 }
 0x458   : > { %1746 = vmatpush.msra.mxu0 %v4537_v61  ;;  %3675 = vmatpush.msk.msra.mxu1 %vm1202_vm0, %v4529_v58 }
 0x45a   : > { %3666 = vmatpush.msk.msra.mxu0 %vm4300_vm5, %v1533_v21  ;;  %3676 = vmatpush.msk.msra.mxu1 %vm4304_vm6, %v1530_v22 }
 0x45c   : > { %3667 = vmatpush.msk.msra.mxu0 %vm4284_vm3, %v1509_v23  ;;  %3677 = vmatpush.msk.msra.mxu1 %vm4288_vm4, %v1513_v24 }
 0x45e   : > { %1749 = vmatpush.msra.mxu0 %v4509_v54  ;;  %1769 = vmatpush.msra.mxu1 %v4511_v57 }
 0x460   : > { %3668 = vmatpush.msk.msra.mxu0 %vm4300_vm5, %v1502_v28  ;;  %3678 = vmatpush.msk.msra.mxu1 %vm4304_vm6, %v1499_v29  ;;  %v1821_v28 = vld [vmem:[%s4104_s19] sm:$0xff] }
 0x462   : > { %3669 = vmatpush.msk.msra.mxu0 %vm4284_vm3, %v1487_v32  ;;  %3679 = vmatpush.msk.msra.mxu1 %vm4288_vm4, %v1491_v33 }
 0x464   : > { %3671 = vmatpush.msk.msra.mxu0 %vm4331_vm8, %v4541_v0  ;;  %1772 = vmatpush.msra.mxu1 %v4547_v2 }
 0x466   : > { %3672 = vmatpush.msk.msra.mxu0 %vm4300_vm5, %v1480_v37  ;;  %3680 = vmatpush.msk.msra.mxu1 %vm4304_vm6, %v1477_v38 }
 0x467   : > { %3673 = vmatmul.msk.f32.vlgmr.msra.gmra.mxu0 %vm1237_vm9, %v1734_v5  ;;  %3681 = vmatmul.msk.f32.vlgmr.msra.gmra.mxu1 %vm1237_vm9, %v1734_v5 }
 0x481   : > { %v1612_v39 = vpop.f32.mrf.mxu2 }
 0x482   : > { %v1632_v40 = vpop.f32.mrf.mxu3 }
 0x489   : > { %v1798_v34 = vpop.f32.mrf.mxu2 }
 0x48a   : > { %v1818_v33 = vpop.f32.mrf.mxu3 }
 0x4d2   : > { %v1569_v42 = vpop.f32.mrf.mxu0  ;;  %v1589_v43 = vpop.f32.mrf.mxu1 }
 0x4d3   : > { %v1613_v44 = vadd.f32 %v1612_v39, %v1569_v42  ;;  %v1633_v45 = vadd.f32 %v1632_v40, %v1589_v43 }
 0x4d5   : > { %v1641_v47 = vadd.f32 %v1639_v46, %v1613_v44  ;;  %v1642_v48 = vadd.f32 %v1639_v46, %v1633_v45 }
 0x4d7   : > { %v1643_v49 = vmul.f32 0.2, %v1641_v47  ;;  %v1644_v52 = vmul.f32 0.2, %v1642_v48 }
 0x4d9   : > { %v1645_v54 = vmax.f32 %v1641_v47, %v1643_v49  ;;  %v1646_v57 = vmax.f32 %v1642_v48, %v1644_v52 }
 0x4db   : > { %1649 = vrot.lane.b32.xlu1 %v1645_v54, %s4042_s10  ;;  %1702 = vrot.lane.b32.xlu2 %v1645_v54, %s4041_s7 }
 0x4dc   : > { %1704 = vrot.lane.b32.xlu0 %v1646_v57, %s4041_s7 }
 0x4e3   : > { %1691 = vrot.lane.b32.xlu1 %v1645_v54, %s4043_s11  ;;  %1651 = vrot.lane.b32.xlu2 %v1646_v57, %s4042_s10 }
 0x4e4   : > { %1680 = vrot.lane.b32.xlu0 %v1646_v57, %s4044_s15  ;;  %v1755_v31 = vpop.f32.mrf.mxu0  ;;  %v1775_v32 = vpop.f32.mrf.mxu1 }
 0x4e5   : > { %v1819_v35 = vadd.f32 %v1818_v33, %v1775_v32  ;;  %v1799_v36 = vadd.f32 %v1798_v34, %v1755_v31 }
 0x4eb   : > { %1693 = vrot.lane.b32.xlu2 %v1646_v57, %s4043_s11 }
 0x535   : > { %v1703_v58 = vpop.permute.xlu2 %1702 }
 0x53d   : > { %v1652_v1 = vpop.permute.xlu2 %1651 }
 0x545   : > { %v1694_v7 = vpop.permute.xlu2 %1693 }
 0x54d   : > { %v1650_v63 = vpop.permute.xlu1 %1649 }
 0x54e   : > { %v1705_v60 = vpop.permute.xlu0 %1704  ;;  %v1656_v0 = vsel %vm1138_vm1, 0.0, %v1650_v63  ;;  %v1653_v2 = vsel %vm1138_vm1, %v1650_v63, %v1652_v1 }
 0x54f   : > { %v1709_v62 = vsel %vm1202_vm0, %v1705_v60, 0.0  ;;  %v1706_v61 = vsel %vm1202_vm0, %v1703_v58, %v1705_v60 }
 0x550   : > { %1711 = vrot.lane.b32.xlu2 %v1709_v62, %s4044_s15  ;;  %1724 = vrot.lane.b32.xlu1 %v1709_v62, %s4043_s11 }
 0x551   : > { %1722 = vrot.lane.b32.xlu0 %v1706_v61, %s4043_s11 }
 0x555   : > { %v1692_v6 = vpop.permute.xlu1 %1691 }
 0x556   : > { %v1681_v8 = vpop.permute.xlu0 %1680  ;;  %v1695_v19 = vsel %vm1164_vm2, %v1692_v6, %v1694_v7  ;;  %v1699_v56 = vsel %vm1164_vm2, %v1694_v7, %v1692_v6 }
 0x558   : > { %1669 = vrot.lane.b32.xlu2 %v1656_v0, %s4043_s11  ;;  %1683 = vrot.lane.b32.xlu1 %v1645_v54, %s4044_s15 }
 0x559   : > { %1714 = vrot.lane.b32.xlu0 %v1706_v61, %s4044_s15 }
 0x560   : > { %1661 = vrot.lane.b32.xlu2 %v1656_v0, %s4044_s15  ;;  %1657 = vrot.lane.b32.xlu1 %v1653_v2, %s4044_s15 }
 0x561   : > { %1671 = vrot.lane.b32.xlu0 %v1653_v2, %s4043_s11 }
 0x569   : > { %1870 = vperm.xlu0 %3995, %v1867_v3  }
 0x5aa   : > { %v1712_v10 = vpop.permute.xlu2 %1711 }
 0x5b2   : > { %v1670_v16 = vpop.permute.xlu2 %1669 }
 0x5ba   : > { %v1662_v25 = vpop.permute.xlu2 %1661 }
 0x5c2   : > { %v1725_v9 = vpop.permute.xlu1 %1724 }
 0x5c3   : > { %v1723_v11 = vpop.permute.xlu0 %1722 }
 0x5c4   : > { %v1726_v12 = vsel %vm1164_vm2, %v1723_v11, %v1725_v9  ;;  %v1730_v53 = vsel %vm1164_vm2, %v1725_v9, %v1723_v11 }
 0x5c5   : > { %3699 = vmatpush.msk.msrb.mxu0 %vm4284_vm3, %v1726_v12  ;;  %3708 = vmatpush.msk.msrb.mxu1 %vm4288_vm4, %v1730_v53  ;;  %v1970_v12 = vld [vmem:[%s4119_s6] sm:$0xff] }
 0x5c7   : > { %1833 = vmatpush.msrb.mxu0 %v1706_v61  ;;  %3709 = vmatpush.msk.msrb.mxu1 %vm1202_vm0, %v1705_v60 }
 0x5ca   : > { %v1684_v55 = vpop.permute.xlu1 %1683 }
 0x5cb   : > { %v1715_v13 = vpop.permute.xlu0 %1714  ;;  %v1688_v59 = vsel %vm1149_vm7, %v1681_v8, %v1684_v55  ;;  %v1685_v20 = vsel %vm1149_vm7, %v1684_v55, %v1681_v8 }
 0x5cc   : > { %v1719_v14 = vsel %vm1149_vm7, %v1712_v10, %v1715_v13  ;;  %v1716_v15 = vsel %vm1149_vm7, %v1715_v13, %v1712_v10 }
 0x5cd   : > { %3700 = vmatpush.msk.msrb.mxu0 %vm4300_vm5, %v1719_v14  ;;  %3710 = vmatpush.msk.msrb.mxu1 %vm4304_vm6, %v1716_v15 }
 0x5cf   : > { %3701 = vmatpush.msk.msrb.mxu0 %vm4284_vm3, %v1695_v19  ;;  %3711 = vmatpush.msk.msrb.mxu1 %vm4288_vm4, %v1699_v56 }
 0x5d1   : > { %1836 = vmatpush.msrb.mxu0 %v1645_v54  ;;  %1856 = vmatpush.msrb.mxu1 %v1646_v57 }
 0x5d2   : > { %v1658_v24 = vpop.permute.xlu1 %1657 }
 0x5d3   : > { %3702 = vmatpush.msk.msrb.mxu0 %vm4300_vm5, %v1688_v59  ;;  %3712 = vmatpush.msk.msrb.mxu1 %vm4304_vm6, %v1685_v20  ;;  %v1672_v21 = vpop.permute.xlu0 %1671  ;;  %v1666_v29 = vsel %vm1149_vm7, %v1658_v24, %v1662_v25  ;;  %v1663_v30 = vsel %vm1149_vm7, %v1662_v25, %v1658_v24 }
 0x5d4   : > { %v1673_v22 = vsel %vm1164_vm2, %v1670_v16, %v1672_v21  ;;  %v1677_v23 = vsel %vm1164_vm2, %v1672_v21, %v1670_v16 }
 0x5d5   : > { %3703 = vmatpush.msk.msrb.mxu0 %vm4284_vm3, %v1673_v22  ;;  %3713 = vmatpush.msk.msrb.mxu1 %vm4288_vm4, %v1677_v23 }
 0x5d7   : > { %3705 = vmatpush.msk.msrb.mxu0 %vm4331_vm8, %v1650_v63  ;;  %1859 = vmatpush.msrb.mxu1 %v1653_v2 }
 0x5d9   : > { %3706 = vmatpush.msk.msrb.mxu0 %vm4300_vm5, %v1666_v29  ;;  %3714 = vmatpush.msk.msrb.mxu1 %vm4304_vm6, %v1663_v30 }
 0x5da   : > { %3707 = vmatmul.msk.f32.vlgmr.msrb.gmra.mxu0 %vm1237_vm9, %v1821_v28  ;;  %3715 = vmatmul.msk.f32.vlgmr.msrb.gmra.mxu1 %vm1237_vm9, %v1821_v28 }
 0x5db   : > { %v1871_v42 = vpop.permute.xlu0 %1870 }
 0x657   : > { %v1842_v37 = vpop.f32.mrf.mxu0  ;;  %v1862_v38 = vpop.f32.mrf.mxu1 }
 0x658   : > { %v1865_v39 = vadd.f32 %v1842_v37, %v1799_v36  ;;  %v1866_v40 = vadd.f32 %v1862_v38, %v1819_v35  ;;  %v1969_v38 = vld [vmem:[%s4114_s30] sm:$0xff] }
 0x65a   : > { %v1873_v43 = vadd.f32 %v1871_v42, %v1865_v39  ;;  %v1874_v44 = vadd.f32 %v1871_v42, %v1866_v40 }
 0x65c   : > { %v1875_v45 = vmul.f32 0.2, %v1873_v43  ;;  %v1876_v46 = vmul.f32 0.2, %v1874_v44 }
 0x65e   : > { %v1877_v47 = vmax.f32 %v1873_v43, %v1875_v45  ;;  %v1878_v48 = vmax.f32 %v1874_v44, %v1876_v46 }
 0x660   : > { %v1879_v49 = vmul.f32 0.4, %v1877_v47  ;;  %v1880_v52 = vmul.f32 0.4, %v1878_v48 }
 0x662   : > { %v4795_v54 = vadd.f32 %v1879_v49, %v4351_v50  ;;  %v4798_v57 = vadd.f32 %v1880_v52, %v4353_v51 }
 0x664   : > { %1940 = vrot.lane.b32.xlu2 %v4798_v57, %s4041_s7  ;;  %1885 = vrot.lane.b32.xlu0 %v4795_v54, %s4042_s10 }
 0x665   : > { %1938 = vrot.lane.b32.xlu1 %v4795_v54, %s4041_s7 }
 0x66c   : > { %1916 = vrot.lane.b32.xlu2 %v4798_v57, %s4044_s15  ;;  %1927 = vrot.lane.b32.xlu0 %v4795_v54, %s4043_s11 }
 0x66d   : > { %1887 = vrot.lane.b32.xlu1 %v4798_v57, %s4042_s10 }
 0x675   : > { %1929 = vrot.lane.b32.xlu1 %v4798_v57, %s4043_s11 }
 0x6be   : > { %v4814_v58 = vpop.permute.xlu2 %1940 }
 0x6bf   : > { %v1945_v60 = vsel %vm1202_vm0, %v4814_v58, %v4798_v57 }
 0x6c0   : > { %1960 = vrot.lane.b32.xlu0 %v1945_v60, %s4043_s11  ;;  %1947 = vrot.lane.b32.xlu1 %v1945_v60, %s4044_s15 }
 0x6c6   : > { %v1917_v4 = vpop.permute.xlu2 %1916 }
 0x6c8   : > { %1919 = vrot.lane.b32.xlu0 %v4795_v54, %s4044_s15 }
 0x6d6   : > { %v4823_v62 = vpop.permute.xlu0 %1885 }
 0x6d7   : > { %v1939_v61 = vpop.permute.xlu1 %1938  ;;  %v4828_v63 = vsel %vm1138_vm1, %v4795_v54, %v4823_v62 }
 0x6d8   : > { %v4832_v0 = vsel %vm1202_vm0, %v1939_v61, %v4814_v58  ;;  %1905 = vrot.lane.b32.xlu1 %v4828_v63, %s4043_s11  ;;  %v2023_v61 = vsel %vm1138_vm1, 0.0, %v4823_v62 }
 0x6d9   : > { %1958 = vrot.lane.b32.xlu2 %v4832_v0, %s4043_s11 }
 0x6de   : > { %v1928_v3 = vpop.permute.xlu0 %1927 }
 0x6df   : > { %v1888_v1 = vpop.permute.xlu1 %1887 }
 0x6e0   : > { %v4840_v2 = vsel %vm1138_vm1, %v4823_v62, %v1888_v1  ;;  %1897 = vrot.lane.b32.xlu1 %v4828_v63, %s4044_s15 }
 0x6e1   : > { %1950 = vrot.lane.b32.xlu2 %v4832_v0, %s4044_s15  ;;  %1893 = vrot.lane.b32.xlu0 %v4840_v2, %s4044_s15 }
 0x6e7   : > { %v1930_v6 = vpop.permute.xlu1 %1929 }
 0x6e8   : > { %v4866_v13 = vsel %vm1164_vm2, %v1928_v3, %v1930_v6  ;;  %v4869_v14 = vsel %vm1164_vm2, %v1930_v6, %v1928_v3 }
 0x6e9   : > { %1907 = vrot.lane.b32.xlu2 %v4840_v2, %s4043_s11  ;;  %v1936_v20 = vsel %vm4284_vm3, %v4866_v13, %v4795_v54  ;;  %v1937_v21 = vsel %vm4288_vm4, %v4869_v14, %v4798_v57 }
 0x6f1   : > { %1973 = vperm.xlu2 %3996, %v1970_v12  }
 0x732   : > { %v1961_v5 = vpop.permute.xlu0 %1960  ;;  %v1948_v53 = vpop.permute.xlu1 %1947 }
 0x733   : > { %v4850_v7 = vpop.permute.xlu2 %1958 }
 0x734   : > { %v1962_v8 = vsel %vm1164_vm2, %v4850_v7, %v1961_v5  ;;  %v1966_v9 = vsel %vm1164_vm2, %v1961_v5, %v4850_v7 }
 0x735   : > { %v1967_v10 = vsel %vm4284_vm3, %v1962_v8, %v4832_v0  ;;  %v1968_v11 = vsel %vm4288_vm4, %v1966_v9, %v1945_v60 }
 0x736   : > { %1986 = vmatpush.msrb.mxu2 %v1967_v10  ;;  %2006 = vmatpush.msrb.mxu3 %v1968_v11 }
 0x738   : > { %1987 = vmatpush.msrb.mxu2 %v4832_v0  ;;  %2007 = vmatpush.msrb.mxu3 %v1945_v60 }
 0x73a   : > { %v1920_v19 = vpop.permute.xlu0 %1919 }
 0x73b   : > { %v4863_v55 = vpop.permute.xlu2 %1950  ;;  %v4889_v22 = vsel %vm1149_vm7, %v1920_v19, %v1917_v4  ;;  %v4892_v23 = vsel %vm1149_vm7, %v1917_v4, %v1920_v19 }
 0x73c   : > { %v1955_v15 = vsel %vm1149_vm7, %v1948_v53, %v4863_v55  ;;  %v1952_v16 = vsel %vm1149_vm7, %v4863_v55, %v1948_v53  ;;  %v1925_v24 = vsel %vm4300_vm5, %v4892_v23, %v4795_v54  ;;  %v1926_v25 = vsel %vm4304_vm6, %v4889_v22, %v4798_v57 }
 0x73d   : > { %v1956_v56 = vsel %vm4300_vm5, %v1955_v15, %v4832_v0  ;;  %v1957_v59 = vsel %vm4304_vm6, %v1952_v16, %v1945_v60  ;;  %v2045_v60 = vsel %vm1202_vm0, %v4814_v58, 0.0  ;;  %v2237_v16 = vld [vmem:[%s5902_s16] sm:$0xff]  ;;  %s5909_s16 = sld [smem:[#allocation10_spill]] }
 0x73e   : > { %1988 = vmatpush.msrb.mxu2 %v1956_v56  ;;  %2008 = vmatpush.msrb.mxu3 %v1957_v59 }
 0x740   : > { %1989 = vmatpush.msrb.mxu2 %v1936_v20  ;;  %2009 = vmatpush.msrb.mxu3 %v1937_v21 }
 0x742   : > { %1990 = vmatpush.msrb.mxu2 %v4795_v54  ;;  %2010 = vmatpush.msrb.mxu3 %v4798_v57 }
 0x743   : > { %v4904_v28 = vpop.permute.xlu2 %1907 }
 0x744   : > { %1991 = vmatpush.msrb.mxu2 %v1925_v24  ;;  %2011 = vmatpush.msrb.mxu3 %v1926_v25 }
 0x74a   : > { %v1906_v29 = vpop.permute.xlu1 %1905 }
 0x74b   : > { %v1909_v30 = vsel %vm1164_vm2, %v1906_v29, %v4904_v28  ;;  %v1913_v31 = vsel %vm1164_vm2, %v4904_v28, %v1906_v29  ;;  %v1974_v42 = vpop.permute.xlu2 %1973 }
 0x74c   : > { %v1914_v32 = vsel %vm4284_vm3, %v1909_v30, %v4828_v63  ;;  %v1915_v33 = vsel %vm4288_vm4, %v1913_v31, %v4840_v2 }
 0x74d   : > { %1992 = vmatpush.msrb.mxu2 %v1914_v32  ;;  %2012 = vmatpush.msrb.mxu3 %v1915_v33 }
 0x74f   : > { %1993 = vmatpush.msrb.mxu2 %v4828_v63  ;;  %2013 = vmatpush.msrb.mxu3 %v4840_v2 }
 0x752   : > { %v1898_v34 = vpop.permute.xlu1 %1897 }
 0x753   : > { %v4918_v35 = vpop.permute.xlu0 %1893 }
 0x754   : > { %v1899_v36 = vsel %vm1149_vm7, %v1898_v34, %v4918_v35  ;;  %v1902_v37 = vsel %vm1149_vm7, %v4918_v35, %v1898_v34 }
 0x755   : > { %v1903_v39 = vsel %vm4300_vm5, %v1902_v37, %v4828_v63  ;;  %v1904_v40 = vsel %vm4304_vm6, %v1899_v36, %v4840_v2 }
 0x756   : > { %1994 = vmatpush.msrb.mxu2 %v1903_v39  ;;  %2014 = vmatpush.msrb.mxu3 %v1904_v40 }
 0x757   : > { %3716 = vmatmul.msk.f32.vlgmr.msrb.gmra.mxu2 %vm1237_vm9, %v1969_v38  ;;  %3717 = vmatmul.msk.f32.vlgmr.msrb.gmra.mxu3 %vm1237_vm9, %v1969_v38 }
 0x7da   : > { %v1996_v43 = vpop.f32.mrf.mxu2  ;;  %v2016_v44 = vpop.f32.mrf.mxu3 }
 0x7db   : > { %v1997_v45 = vadd.f32 %v1996_v43, %v1974_v42  ;;  %v2017_v46 = vadd.f32 %v2016_v44, %v1974_v42  ;;  %v2150_v42 = vld [vmem:[%s5904_s22] sm:$0xff]  ;;  %s5911_s22 = sld [smem:[#allocation13_spill]] }
 0x7dd   : > { %v2019_v47 = vmul.f32 0.2, %v1997_v45  ;;  %v2020_v48 = vmul.f32 0.2, %v2017_v46 }
 0x7df   : > { %v4933_v49 = vmax.f32 %v1997_v45, %v2019_v47  ;;  %v4935_v52 = vmax.f32 %v2017_v46, %v2020_v48 }
 0x7e1   : > { %2065 = vrot.lane.b32.xlu2 %v4933_v49, %s4042_s10  ;;  %2118 = vrot.lane.b32.xlu0 %v4933_v49, %s4041_s7 }
 0x7e2   : > { %2120 = vrot.lane.b32.xlu1 %v4935_v52, %s4041_s7 }
 0x7e9   : > { %2047 = vrot.lane.b32.xlu2 %v2045_v60, %s4044_s15  ;;  %2067 = vrot.lane.b32.xlu0 %v4935_v52, %s4042_s10 }
 0x7ea   : > { %2055 = vrot.lane.b32.xlu1 %v2045_v60, %s4043_s11 }
 0x7f1   : > { %2107 = vrot.lane.b32.xlu2 %v4933_v49, %s4043_s11  ;;  %2109 = vrot.lane.b32.xlu0 %v4935_v52, %s4043_s11 }
 0x7f2   : > { %2033 = vrot.lane.b32.xlu1 %v2023_v61, %s4043_s11 }
 0x7f9   : > { %2096 = vrot.lane.b32.xlu2 %v4935_v52, %s4044_s15 }
 0x7fa   : > { %2025 = vrot.lane.b32.xlu1 %v2023_v61, %s4044_s15 }
 0x83b   : > { %v4961_v3 = vpop.permute.xlu2 %2065 }
 0x83c   : > { %v2072_v12 = vsel %vm1138_vm1, 0.0, %v4961_v3 }
 0x843   : > { %v2048_v53 = vpop.permute.xlu2 %2047 }
 0x844   : > { %v2050_v15 = vsel %vm1149_vm7, %v4863_v55, %v2048_v53 }
 0x853   : > { %v2119_v63 = vpop.permute.xlu0 %2118 }
 0x854   : > { %v4959_v1 = vpop.permute.xlu1 %2120 }
 0x855   : > { %v2125_v4 = vsel %vm1202_vm0, %v4959_v1, 0.0  ;;  %v4967_v5 = vsel %vm1202_vm0, %v2119_v63, %v4959_v1 }
 0x856   : > { %2127 = vrot.lane.b32.xlu2 %v2125_v4, %s4044_s15  ;;  %2140 = vrot.lane.b32.xlu1 %v2125_v4, %s4043_s11 }
 0x857   : > { %2138 = vrot.lane.b32.xlu0 %v4967_v5, %s4043_s11 }
 0x85b   : > { %v2068_v6 = vpop.permute.xlu0 %2067 }
 0x85c   : > { %v4975_v8 = vsel %vm1138_vm1, %v4961_v3, %v2068_v6  ;;  %v2056_v9 = vpop.permute.xlu1 %2055 }
 0x85d   : > { %v2057_v10 = vsel %vm1164_vm2, %v4850_v7, %v2056_v9  ;;  %v2060_v11 = vsel %vm1164_vm2, %v2056_v9, %v4850_v7  ;;  %v2052_v7 = vsel %vm1149_vm7, %v2048_v53, %v4863_v55 }
 0x85e   : > { %2087 = vrot.lane.b32.xlu2 %v4975_v8, %s4043_s11  ;;  %2085 = vrot.lane.b32.xlu1 %v2072_v12, %s4043_s11 }
 0x85f   : > { %2130 = vrot.lane.b32.xlu0 %v4967_v5, %s4044_s15  ;;  %3735 = vmatpush.msk.msra.mxu2 %vm4284_vm3, %v2057_v10 }
 0x860   : > { %3744 = vmatpush.msk.msra.mxu3 %vm4288_vm4, %v2060_v11 }
 0x861   : > { %2205 = vmatpush.msra.mxu2 %v4832_v0 }
 0x862   : > { %3745 = vmatpush.msk.msra.mxu3 %vm1202_vm0, %v4814_v58 }
 0x863   : > { %3736 = vmatpush.msk.msra.mxu2 %vm4300_vm5, %v2052_v7 }
 0x864   : > { %3746 = vmatpush.msk.msra.mxu3 %vm4304_vm6, %v2050_v15  ;;  %v2034_v19 = vpop.permute.xlu1 %2033 }
 0x865   : > { %3737 = vmatpush.msk.msra.mxu2 %vm4284_vm3, %v4866_v13  ;;  %v2035_v55 = vsel %vm1164_vm2, %v2034_v19, %v4904_v28  ;;  %v2038_v56 = vsel %vm1164_vm2, %v4904_v28, %v2034_v19  ;;  %v2336_v19 = vld [vmem:[%s5907_s0] sm:$0xff]  ;;  %s5914_s0 = sld [smem:[#allocation17_spill]] }
 0x866   : > { %3747 = vmatpush.msk.msra.mxu3 %vm4288_vm4, %v4869_v14  ;;  %2240 = vperm.xlu2 %3996, %v2237_v16   ;;  %v2335_v16 = vld [vmem:[%s5906_s26] sm:$0xff]  ;;  %s5913_s26 = sld [smem:[#allocation12_spill]] }
 0x867   : > { %2077 = vrot.lane.b32.xlu1 %v2072_v12, %s4044_s15  ;;  %2099 = vrot.lane.b32.xlu0 %v4933_v49, %s4044_s15 }
 0x868   : > { %2208 = vmatpush.msra.mxu2 %v4795_v54  ;;  %2228 = vmatpush.msra.mxu3 %v4798_v57 }
 0x86a   : > { %3738 = vmatpush.msk.msra.mxu2 %vm4300_vm5, %v4892_v23  ;;  %3748 = vmatpush.msk.msra.mxu3 %vm4304_vm6, %v4889_v22 }
 0x86c   : > { %3739 = vmatpush.msk.msra.mxu2 %vm4284_vm3, %v2035_v55  ;;  %3749 = vmatpush.msk.msra.mxu3 %vm4288_vm4, %v2038_v56  ;;  %v2026_v59 = vpop.permute.xlu1 %2025 }
 0x86d   : > { %v2027_v20 = vsel %vm1149_vm7, %v2026_v59, %v4918_v35  ;;  %v2030_v21 = vsel %vm1149_vm7, %v4918_v35, %v2026_v59 }
 0x86e   : > { %3741 = vmatpush.msk.msra.mxu2 %vm4331_vm8, %v4823_v62  ;;  %2231 = vmatpush.msra.mxu3 %v4840_v2 }
 0x86f   : > { %2073 = vrot.lane.b32.xlu0 %v4975_v8, %s4044_s15 }
 0x870   : > { %3742 = vmatpush.msk.msra.mxu2 %vm4300_vm5, %v2030_v21  ;;  %3750 = vmatpush.msk.msra.mxu3 %vm4304_vm6, %v2027_v20 }
 0x872   : > { %3769 = vmatpush.msk.msrb.mxu2 %vm4284_vm3, %v2057_v10  ;;  %3778 = vmatpush.msk.msrb.mxu3 %vm4288_vm4, %v2060_v11 }
 0x874   : > { %2391 = vmatpush.msrb.mxu2 %v4832_v0  ;;  %3779 = vmatpush.msk.msrb.mxu3 %vm1202_vm0, %v4814_v58  ;;  %v2149_v58 = vld [vmem:[%s5903_s18] sm:$0xff]  ;;  %v2108_v0 = vpop.permute.xlu2 %2107  ;;  %s5910_s18 = sld [smem:[#allocation9_spill]] }
 0x875   : > { %3743 = vmatmul.msk.f32.vlgmr.msra.gmra.mxu2 %vm1237_vm9, %v2149_v58  ;;  %3751 = vmatmul.msk.f32.vlgmr.msra.gmra.mxu3 %vm1237_vm9, %v2149_v58 }
 0x876   : > { %3770 = vmatpush.msk.msrb.mxu2 %vm4300_vm5, %v2052_v7  ;;  %3780 = vmatpush.msk.msrb.mxu3 %vm4304_vm6, %v2050_v15  ;;  %v2469_v15 = vld [vmem:[%s5905_s23] sm:$0xff]  ;;  %s5912_s23 = sld [smem:[#allocation11_spill]] }
 0x878   : > { %3771 = vmatpush.msk.msrb.mxu2 %vm4284_vm3, %v4866_v13  ;;  %3781 = vmatpush.msk.msrb.mxu3 %vm4288_vm4, %v4869_v14  ;;  %v2110_v13 = vpop.permute.xlu0 %2109 }
 0x879   : > { %v2111_v30 = vsel %vm1164_vm2, %v2108_v0, %v2110_v13  ;;  %v2115_v31 = vsel %vm1164_vm2, %v2110_v13, %v2108_v0 }
 0x87a   : > { %2394 = vmatpush.msrb.mxu2 %v4795_v54  ;;  %2414 = vmatpush.msrb.mxu3 %v4798_v57 }
 0x87c   : > { %3772 = vmatpush.msk.msrb.mxu2 %vm4300_vm5, %v4892_v23  ;;  %3782 = vmatpush.msk.msrb.mxu3 %vm4304_vm6, %v4889_v22  ;;  %v2097_v22 = vpop.permute.xlu2 %2096 }
 0x87e   : > { %3773 = vmatpush.msk.msrb.mxu2 %vm4284_vm3, %v2035_v55  ;;  %3783 = vmatpush.msk.msrb.mxu3 %vm4288_vm4, %v2038_v56 }
 0x880   : > { %3775 = vmatpush.msk.msrb.mxu2 %vm4331_vm8, %v4823_v62  ;;  %2417 = vmatpush.msrb.mxu3 %v4840_v2 }
 0x882   : > { %3776 = vmatpush.msk.msrb.mxu2 %vm4300_vm5, %v2030_v21  ;;  %3784 = vmatpush.msk.msrb.mxu3 %vm4304_vm6, %v2027_v20 }
 0x883   : > { %3785 = vmatmul.msk.f32.vlgmr.msrb.gmra.mxu3 %vm1237_vm9, %v2335_v16  ;;  %3777 = vmatmul.msk.f32.vlgmr.msrb.gmra.mxu2 %vm1237_vm9, %v2335_v16 }
 0x8b0   : > { %v2128_v24 = vpop.permute.xlu2 %2127 }
 0x8b8   : > { %v2088_v36 = vpop.permute.xlu2 %2087 }
 0x8c0   : > { %v2241_v60 = vpop.permute.xlu2 %2240 }
 0x8c8   : > { %v2141_v14 = vpop.permute.xlu1 %2140 }
 0x8c9   : > { %v2139_v23 = vpop.permute.xlu0 %2138 }
 0x8ca   : > { %v2142_v62 = vsel %vm1164_vm2, %v2139_v23, %v2141_v14  ;;  %v2146_v2 = vsel %vm1164_vm2, %v2141_v14, %v2139_v23 }
 0x8cb   : > { %3718 = vmatpush.msk.msra.mxu0 %vm4284_vm3, %v2142_v62  ;;  %3727 = vmatpush.msk.msra.mxu1 %vm4288_vm4, %v2146_v2 }
 0x8cd   : > { %2162 = vmatpush.msra.mxu0 %v4967_v5  ;;  %3728 = vmatpush.msk.msra.mxu1 %vm1202_vm0, %v4959_v1 }
 0x8d0   : > { %v2086_v32 = vpop.permute.xlu1 %2085 }
 0x8d1   : > { %v2131_v25 = vpop.permute.xlu0 %2130  ;;  %v2089_v37 = vsel %vm1164_vm2, %v2086_v32, %v2088_v36  ;;  %v2093_v38 = vsel %vm1164_vm2, %v2088_v36, %v2086_v32 }
 0x8d2   : > { %v2132_v28 = vsel %vm1149_vm7, %v2131_v25, %v2128_v24  ;;  %v2135_v29 = vsel %vm1149_vm7, %v2128_v24, %v2131_v25 }
 0x8d3   : > { %3719 = vmatpush.msk.msra.mxu0 %vm4300_vm5, %v2135_v29  ;;  %3729 = vmatpush.msk.msra.mxu1 %vm4304_vm6, %v2132_v28 }
 0x8d5   : > { %3720 = vmatpush.msk.msra.mxu0 %vm4284_vm3, %v2111_v30  ;;  %3730 = vmatpush.msk.msra.mxu1 %vm4288_vm4, %v2115_v31 }
 0x8d7   : > { %2165 = vmatpush.msra.mxu0 %v4933_v49  ;;  %2185 = vmatpush.msra.mxu1 %v4935_v52 }
 0x8d9   : > { %v2100_v33 = vpop.permute.xlu0 %2099  ;;  %v2078_v39 = vpop.permute.xlu1 %2077 }
 0x8da   : > { %v2101_v34 = vsel %vm1149_vm7, %v2100_v33, %v2097_v22  ;;  %v2104_v35 = vsel %vm1149_vm7, %v2097_v22, %v2100_v33 }
 0x8db   : > { %3721 = vmatpush.msk.msra.mxu0 %vm4300_vm5, %v2104_v35  ;;  %3731 = vmatpush.msk.msra.mxu1 %vm4304_vm6, %v2101_v34 }
 0x8dd   : > { %3722 = vmatpush.msk.msra.mxu0 %vm4284_vm3, %v2089_v37  ;;  %3732 = vmatpush.msk.msra.mxu1 %vm4288_vm4, %v2093_v38 }
 0x8df   : > { %3724 = vmatpush.msk.msra.mxu0 %vm4331_vm8, %v4961_v3  ;;  %2188 = vmatpush.msra.mxu1 %v4975_v8 }
 0x8e1   : > { %v2074_v40 = vpop.permute.xlu0 %2073 }
 0x8e2   : > { %v2079_v43 = vsel %vm1149_vm7, %v2078_v39, %v2074_v40  ;;  %v2082_v44 = vsel %vm1149_vm7, %v2074_v40, %v2078_v39 }
 0x8e3   : > { %3725 = vmatpush.msk.msra.mxu0 %vm4300_vm5, %v2082_v44  ;;  %3733 = vmatpush.msk.msra.mxu1 %vm4304_vm6, %v2079_v43 }
 0x8e4   : > { %3726 = vmatmul.msk.f32.vlgmr.msra.gmra.mxu0 %vm1237_vm9, %v2150_v42  ;;  %3734 = vmatmul.msk.f32.vlgmr.msra.gmra.mxu1 %vm1237_vm9, %v2150_v42 }
 0x8e5   : > { %3752 = vmatpush.msk.msrb.mxu0 %vm4284_vm3, %v2142_v62  ;;  %3761 = vmatpush.msk.msrb.mxu1 %vm4288_vm4, %v2146_v2 }
 0x8e7   : > { %2348 = vmatpush.msrb.mxu0 %v4967_v5  ;;  %3762 = vmatpush.msk.msrb.mxu1 %vm1202_vm0, %v4959_v1 }
 0x8e9   : > { %3753 = vmatpush.msk.msrb.mxu0 %vm4300_vm5, %v2135_v29  ;;  %3763 = vmatpush.msk.msrb.mxu1 %vm4304_vm6, %v2132_v28 }
 0x8eb   : > { %3754 = vmatpush.msk.msrb.mxu0 %vm4284_vm3, %v2111_v30  ;;  %3764 = vmatpush.msk.msrb.mxu1 %vm4288_vm4, %v2115_v31 }
 0x8ed   : > { %2351 = vmatpush.msrb.mxu0 %v4933_v49  ;;  %2371 = vmatpush.msrb.mxu1 %v4935_v52 }
 0x8ef   : > { %3755 = vmatpush.msk.msrb.mxu0 %vm4300_vm5, %v2104_v35  ;;  %3765 = vmatpush.msk.msrb.mxu1 %vm4304_vm6, %v2101_v34  ;;  %v2423_v35 = vld [vmem:[%s5908_s2] sm:$0xff]  ;;  %s5915_s2 = sld [smem:[#allocation14_spill]] }
 0x8f1   : > { %3756 = vmatpush.msk.msrb.mxu0 %vm4284_vm3, %v2089_v37  ;;  %3766 = vmatpush.msk.msrb.mxu1 %vm4288_vm4, %v2093_v38 }
 0x8f3   : > { %3758 = vmatpush.msk.msrb.mxu0 %vm4331_vm8, %v4961_v3  ;;  %2374 = vmatpush.msrb.mxu1 %v4975_v8 }
 0x8f5   : > { %3759 = vmatpush.msk.msrb.mxu0 %vm4300_vm5, %v2082_v44  ;;  %3767 = vmatpush.msk.msrb.mxu1 %vm4304_vm6, %v2079_v43 }
 0x8f6   : > { %3760 = vmatmul.msk.f32.vlgmr.msrb.gmra.mxu0 %vm1237_vm9, %v2336_v19  ;;  %3768 = vmatmul.msk.f32.vlgmr.msrb.gmra.mxu1 %vm1237_vm9, %v2336_v19 }
 0x8f8   : > { %v2214_v45 = vpop.f32.mrf.mxu2  ;;  %v2234_v46 = vpop.f32.mrf.mxu3 }
 0x906   : > { %v2400_v40 = vpop.f32.mrf.mxu2  ;;  %v2420_v42 = vpop.f32.mrf.mxu3 }
 0x961   : > { %v2171_v47 = vpop.f32.mrf.mxu0  ;;  %v2191_v48 = vpop.f32.mrf.mxu1 }
 0x962   : > { %v2215_v49 = vadd.f32 %v2214_v45, %v2171_v47  ;;  %v2235_v52 = vadd.f32 %v2234_v46, %v2191_v48 }
 0x964   : > { %v2243_v61 = vadd.f32 %v2241_v60, %v2215_v49  ;;  %v2244_v63 = vadd.f32 %v2241_v60, %v2235_v52 }
 0x966   : > { %v2245_v1 = vmul.f32 0.2, %v2243_v61  ;;  %v2246_v4 = vmul.f32 0.2, %v2244_v63 }
 0x968   : > { %v2247_v3 = vmax.f32 %v2243_v61, %v2245_v1  ;;  %v2248_v5 = vmax.f32 %v2244_v63, %v2246_v4 }
 0x96a   : > { %2251 = vrot.lane.b32.xlu2 %v2247_v3, %s4042_s10  ;;  %2304 = vrot.lane.b32.xlu0 %v2247_v3, %s4041_s7 }
 0x96b   : > { %2306 = vrot.lane.b32.xlu1 %v2248_v5, %s4041_s7 }
 0x972   : > { %2293 = vrot.lane.b32.xlu2 %v2247_v3, %s4043_s11  ;;  %2253 = vrot.lane.b32.xlu0 %v2248_v5, %s4042_s10 }
 0x973   : > { %2282 = vrot.lane.b32.xlu1 %v2248_v5, %s4044_s15  ;;  %v2357_v38 = vpop.f32.mrf.mxu0  ;;  %v2377_v39 = vpop.f32.mrf.mxu1 }
 0x974   : > { %v2401_v43 = vadd.f32 %v2400_v40, %v2357_v38  ;;  %v2421_v44 = vadd.f32 %v2420_v42, %v2377_v39 }
 0x97a   : > { %2295 = vrot.lane.b32.xlu0 %v2248_v5, %s4043_s11 }
 0x9c4   : > { %v2252_v11 = vpop.permute.xlu2 %2251 }
 0x9c5   : > { %v2258_v12 = vsel %vm1138_vm1, 0.0, %v2252_v11 }
 0x9cc   : > { %v2294_v56 = vpop.permute.xlu2 %2293 }
 0x9dc   : > { %v2305_v6 = vpop.permute.xlu0 %2304 }
 0x9dd   : > { %v2307_v8 = vpop.permute.xlu1 %2306 }
 0x9de   : > { %v2311_v9 = vsel %vm1202_vm0, %v2307_v8, 0.0  ;;  %v2308_v10 = vsel %vm1202_vm0, %v2305_v6, %v2307_v8 }
 0x9df   : > { %2313 = vrot.lane.b32.xlu0 %v2311_v9, %s4044_s15  ;;  %2326 = vrot.lane.b32.xlu2 %v2311_v9, %s4043_s11 }
 0x9e0   : > { %2324 = vrot.lane.b32.xlu1 %v2308_v10, %s4043_s11 }
 0x9e4   : > { %v2254_v53 = vpop.permute.xlu0 %2253 }
 0x9e5   : > { %v2255_v7 = vsel %vm1138_vm1, %v2252_v11, %v2254_v53  ;;  %v2283_v59 = vpop.permute.xlu1 %2282 }
 0x9e7   : > { %2271 = vrot.lane.b32.xlu0 %v2258_v12, %s4043_s11  ;;  %2285 = vrot.lane.b32.xlu2 %v2247_v3, %s4044_s15 }
 0x9e8   : > { %2316 = vrot.lane.b32.xlu1 %v2308_v10, %s4044_s15 }
 0x9ec   : > { %v2296_v55 = vpop.permute.xlu0 %2295 }
 0x9ed   : > { %v2297_v24 = vsel %vm1164_vm2, %v2294_v56, %v2296_v55  ;;  %v2301_v25 = vsel %vm1164_vm2, %v2296_v55, %v2294_v56 }
 0x9ef   : > { %2263 = vrot.lane.b32.xlu0 %v2258_v12, %s4044_s15  ;;  %2259 = vrot.lane.b32.xlu2 %v2255_v7, %s4044_s15 }
 0x9f0   : > { %2273 = vrot.lane.b32.xlu1 %v2255_v7, %s4043_s11 }
 0x9f8   : > { %2472 = vperm.xlu1 %3994, %v2469_v15   ;;  %v2572_v15 = vld [vmem:[%s5909_s16] sm:$0xff]  ;;  %s5916_s16 = sld [smem:[#allocation15_spill]] }
 0xa39   : > { %v2327_v21 = vpop.permute.xlu2 %2326 }
 0xa41   : > { %v2286_v2 = vpop.permute.xlu2 %2285 }
 0xa42   : > { %v2287_v28 = vsel %vm1149_vm7, %v2286_v2, %v2283_v59  ;;  %v2290_v29 = vsel %vm1149_vm7, %v2283_v59, %v2286_v2 }
 0xa49   : > { %v2260_v34 = vpop.permute.xlu2 %2259 }
 0xa51   : > { %v2314_v20 = vpop.permute.xlu0 %2313 }
 0xa52   : > { %v2325_v58 = vpop.permute.xlu1 %2324 }
 0xa53   : > { %v2328_v0 = vsel %vm1164_vm2, %v2325_v58, %v2327_v21  ;;  %v2332_v13 = vsel %vm1164_vm2, %v2327_v21, %v2325_v58 }
 0xa54   : > { %3786 = vmatpush.msk.msra.mxu0 %vm4284_vm3, %v2328_v0  ;;  %3795 = vmatpush.msk.msra.mxu1 %vm4288_vm4, %v2332_v13 }
 0xa56   : > { %2435 = vmatpush.msra.mxu0 %v2308_v10  ;;  %3796 = vmatpush.msk.msra.mxu1 %vm1202_vm0, %v2307_v8 }
 0xa59   : > { %v2272_v14 = vpop.permute.xlu0 %2271 }
 0xa5a   : > { %v2317_v22 = vpop.permute.xlu1 %2316 }
 0xa5b   : > { %v2318_v23 = vsel %vm1149_vm7, %v2317_v22, %v2314_v20  ;;  %v2321_v62 = vsel %vm1149_vm7, %v2314_v20, %v2317_v22 }
 0xa5c   : > { %3787 = vmatpush.msk.msra.mxu0 %vm4300_vm5, %v2321_v62  ;;  %3797 = vmatpush.msk.msra.mxu1 %vm4304_vm6, %v2318_v23 }
 0xa5e   : > { %3788 = vmatpush.msk.msra.mxu0 %vm4284_vm3, %v2297_v24  ;;  %3798 = vmatpush.msk.msra.mxu1 %vm4288_vm4, %v2301_v25 }
 0xa60   : > { %2438 = vmatpush.msra.mxu0 %v2247_v3  ;;  %2458 = vmatpush.msra.mxu1 %v2248_v5 }
 0xa61   : > { %v2264_v33 = vpop.permute.xlu0 %2263 }
 0xa62   : > { %3789 = vmatpush.msk.msra.mxu0 %vm4300_vm5, %v2290_v29  ;;  %3799 = vmatpush.msk.msra.mxu1 %vm4304_vm6, %v2287_v28  ;;  %v2274_v30 = vpop.permute.xlu1 %2273  ;;  %v2265_v36 = vsel %vm1149_vm7, %v2264_v33, %v2260_v34  ;;  %v2268_v37 = vsel %vm1149_vm7, %v2260_v34, %v2264_v33 }
 0xa63   : > { %v2275_v31 = vsel %vm1164_vm2, %v2272_v14, %v2274_v30  ;;  %v2279_v32 = vsel %vm1164_vm2, %v2274_v30, %v2272_v14 }
 0xa64   : > { %3790 = vmatpush.msk.msra.mxu0 %vm4284_vm3, %v2275_v31  ;;  %3800 = vmatpush.msk.msra.mxu1 %vm4288_vm4, %v2279_v32 }
 0xa66   : > { %3792 = vmatpush.msk.msra.mxu0 %vm4331_vm8, %v2252_v11  ;;  %2461 = vmatpush.msra.mxu1 %v2255_v7 }
 0xa68   : > { %3793 = vmatpush.msk.msra.mxu0 %vm4300_vm5, %v2268_v37  ;;  %3801 = vmatpush.msk.msra.mxu1 %vm4304_vm6, %v2265_v36 }
 0xa69   : > { %3794 = vmatmul.msk.f32.vlgmr.msra.gmra.mxu0 %vm1237_vm9, %v2423_v35  ;;  %3802 = vmatmul.msk.f32.vlgmr.msra.gmra.mxu1 %vm1237_vm9, %v2423_v35 }
 0xa6a   : > { %v2473_v49 = vpop.permute.xlu1 %2472 }
 0xae6   : > { %v2444_v45 = vpop.f32.mrf.mxu0  ;;  %v2464_v46 = vpop.f32.mrf.mxu1 }
 0xae7   : > { %v2467_v47 = vadd.f32 %v2444_v45, %v2401_v43  ;;  %v2468_v48 = vadd.f32 %v2464_v46, %v2421_v44  ;;  %v2571_v46 = vld [vmem:[%s5910_s18] sm:$0xff]  ;;  %s5917_s18 = sld [smem:[#allocation16_spill]] }
 0xae9   : > { %v2475_v52 = vadd.f32 %v2473_v49, %v2467_v47  ;;  %v2476_v60 = vadd.f32 %v2473_v49, %v2468_v48 }
 0xaeb   : > { %v2477_v61 = vmul.f32 0.2, %v2475_v52  ;;  %v2478_v63 = vmul.f32 0.2, %v2476_v60 }
 0xaed   : > { %v2479_v1 = vmax.f32 %v2475_v52, %v2477_v61  ;;  %v2480_v4 = vmax.f32 %v2476_v60, %v2478_v63 }
 0xaef   : > { %v2481_v3 = vmul.f32 0.4, %v2479_v1  ;;  %v2482_v5 = vmul.f32 0.4, %v2480_v4 }
 0xaf1   : > { %v5234_v6 = vadd.f32 %v2481_v3, %v4795_v54  ;;  %v5237_v8 = vadd.f32 %v2482_v5, %v4798_v57 }
 0xaf3   : > { %2542 = vrot.lane.b32.xlu0 %v5237_v8, %s4041_s7  ;;  %2487 = vrot.lane.b32.xlu1 %v5234_v6, %s4042_s10 }
 0xaf4   : > { %2540 = vrot.lane.b32.xlu2 %v5234_v6, %s4041_s7 }
 0xafb   : > { %2518 = vrot.lane.b32.xlu0 %v5237_v8, %s4044_s15  ;;  %2529 = vrot.lane.b32.xlu1 %v5234_v6, %s4043_s11 }
 0xafc   : > { %2489 = vrot.lane.b32.xlu2 %v5237_v8, %s4042_s10 }
 0xb04   : > { %2531 = vrot.lane.b32.xlu2 %v5237_v8, %s4043_s11 }
 0xb4e   : > { %v2541_v54 = vpop.permute.xlu2 %2540 }
 0xb56   : > { %v2490_v53 = vpop.permute.xlu2 %2489 }
 0xb5e   : > { %v2532_v16 = vpop.permute.xlu2 %2531 }
 0xb65   : > { %v5253_v57 = vpop.permute.xlu0 %2542  ;;  %v5266_v11 = vpop.permute.xlu1 %2487 }
 0xb66   : > { %v5257_v9 = vsel %vm1202_vm0, %v2541_v54, %v5253_v57  ;;  %v2547_v10 = vsel %vm1202_vm0, %v5253_v57, %v5237_v8  ;;  %v5271_v12 = vsel %vm1138_vm1, %v5234_v6, %v5266_v11  ;;  %v5281_v7 = vsel %vm1138_vm1, %v5266_v11, %v2490_v53 }
 0xb67   : > { %2562 = vrot.lane.b32.xlu1 %v2547_v10, %s4043_s11  ;;  %2549 = vrot.lane.b32.xlu2 %v2547_v10, %s4044_s15  ;;  %v2647_v54 = vsel %vm1202_vm0, %v5253_v57, 0.0 }
 0xb68   : > { %2560 = vrot.lane.b32.xlu0 %v5257_v9, %s4043_s11 }
 0xb6d   : > { %v2530_v19 = vpop.permute.xlu1 %2529  ;;  %v2519_v55 = vpop.permute.xlu0 %2518 }
 0xb6e   : > { %v5305_v62 = vsel %vm1164_vm2, %v2530_v19, %v2532_v16  ;;  %v5308_v2 = vsel %vm1164_vm2, %v2532_v16, %v2530_v19 }
 0xb6f   : > { %2521 = vrot.lane.b32.xlu1 %v5234_v6, %s4044_s15  ;;  %2507 = vrot.lane.b32.xlu2 %v5271_v12, %s4043_s11  ;;  %v2538_v30 = vsel %vm4284_vm3, %v5305_v62, %v5234_v6  ;;  %v2539_v31 = vsel %vm4288_vm4, %v5308_v2, %v5237_v8 }
 0xb70   : > { %2552 = vrot.lane.b32.xlu0 %v5257_v9, %s4044_s15 }
 0xb77   : > { %2499 = vrot.lane.b32.xlu2 %v5271_v12, %s4044_s15  ;;  %2495 = vrot.lane.b32.xlu1 %v5281_v7, %s4044_s15 }
 0xb78   : > { %2509 = vrot.lane.b32.xlu0 %v5281_v7, %s4043_s11 }
 0xb80   : > { %2575 = vperm.xlu0 %3995, %v2572_v15  }
 0xbc1   : > { %v2550_v56 = vpop.permute.xlu2 %2549 }
 0xbc9   : > { %v2508_v22 = vpop.permute.xlu2 %2507 }
 0xbd1   : > { %v2500_v40 = vpop.permute.xlu2 %2499 }
 0xbd9   : > { %v2563_v59 = vpop.permute.xlu1 %2562 }
 0xbda   : > { %v5290_v20 = vpop.permute.xlu0 %2560 }
 0xbdb   : > { %v2564_v21 = vsel %vm1164_vm2, %v5290_v20, %v2563_v59  ;;  %v2568_v58 = vsel %vm1164_vm2, %v2563_v59, %v5290_v20 }
 0xbdc   : > { %v2569_v0 = vsel %vm4284_vm3, %v2564_v21, %v5257_v9  ;;  %v2570_v13 = vsel %vm4288_vm4, %v2568_v58, %v2547_v10 }
 0xbdd   : > { %2588 = vmatpush.msra.mxu2 %v2569_v0  ;;  %2608 = vmatpush.msra.mxu3 %v2570_v13 }
 0xbdf   : > { %2589 = vmatpush.msra.mxu2 %v5257_v9  ;;  %2609 = vmatpush.msra.mxu3 %v2547_v10 }
 0xbe1   : > { %v2522_v14 = vpop.permute.xlu1 %2521 }
 0xbe2   : > { %v5302_v23 = vpop.permute.xlu0 %2552  ;;  %v5328_v32 = vsel %vm1149_vm7, %v2522_v14, %v2519_v55  ;;  %v5331_v33 = vsel %vm1149_vm7, %v2519_v55, %v2522_v14 }
 0xbe3   : > { %v2557_v24 = vsel %vm1149_vm7, %v2550_v56, %v5302_v23  ;;  %v2554_v25 = vsel %vm1149_vm7, %v5302_v23, %v2550_v56  ;;  %v2527_v36 = vsel %vm4300_vm5, %v5331_v33, %v5234_v6  ;;  %v2528_v37 = vsel %vm4304_vm6, %v5328_v32, %v5237_v8 }
 0xbe4   : > { %v2558_v28 = vsel %vm4300_vm5, %v2557_v24, %v5257_v9  ;;  %v2559_v29 = vsel %vm4304_vm6, %v2554_v25, %v2547_v10  ;;  %v2625_v10 = vsel %vm1138_vm1, 0.0, %v5266_v11 }
 0xbe5   : > { %2590 = vmatpush.msra.mxu2 %v2558_v28  ;;  %2610 = vmatpush.msra.mxu3 %v2559_v29 }
 0xbe7   : > { %2591 = vmatpush.msra.mxu2 %v2538_v30  ;;  %2611 = vmatpush.msra.mxu3 %v2539_v31 }
 0xbe9   : > { %2592 = vmatpush.msra.mxu2 %v5234_v6  ;;  %2612 = vmatpush.msra.mxu3 %v5237_v8  ;;  %v5335_v34 = vpop.permute.xlu1 %2495 }
 0xbea   : > { %v5337_v35 = vpop.permute.xlu0 %2509  ;;  %v2504_v44 = vsel %vm1149_vm7, %v5335_v34, %v2500_v40  ;;  %v2501_v45 = vsel %vm1149_vm7, %v2500_v40, %v5335_v34 }
 0xbeb   : > { %2593 = vmatpush.msra.mxu2 %v2527_v36  ;;  %2613 = vmatpush.msra.mxu3 %v2528_v37  ;;  %v2511_v38 = vsel %vm1164_vm2, %v2508_v22, %v5337_v35  ;;  %v2515_v39 = vsel %vm1164_vm2, %v5337_v35, %v2508_v22  ;;  %v2505_v47 = vsel %vm4300_vm5, %v2504_v44, %v5271_v12 }
 0xbec   : > { %v2516_v42 = vsel %vm4284_vm3, %v2511_v38, %v5271_v12  ;;  %v2517_v43 = vsel %vm4288_vm4, %v2515_v39, %v5281_v7  ;;  %v2506_v48 = vsel %vm4304_vm6, %v2501_v45, %v5281_v7 }
 0xbed   : > { %2594 = vmatpush.msra.mxu2 %v2516_v42  ;;  %2614 = vmatpush.msra.mxu3 %v2517_v43 }
 0xbef   : > { %2595 = vmatpush.msra.mxu2 %v5271_v12  ;;  %2615 = vmatpush.msra.mxu3 %v5281_v7 }
 0xbf1   : > { %2596 = vmatpush.msra.mxu2 %v2505_v47  ;;  %2616 = vmatpush.msra.mxu3 %v2506_v48 }
 0xbf2   : > { %3803 = vmatmul.msk.f32.vlgmr.msra.gmra.mxu2 %vm1237_vm9, %v2571_v46  ;;  %3804 = vmatmul.msk.f32.vlgmr.msra.gmra.mxu3 %vm1237_vm9, %v2571_v46  ;;  %v2576_v49 = vpop.permute.xlu0 %2575 }
 0xc75   : > { %v2598_v52 = vpop.f32.mrf.mxu2  ;;  %v2618_v60 = vpop.f32.mrf.mxu3 }
 0xc76   : > { %v2599_v61 = vadd.f32 %v2598_v52, %v2576_v49  ;;  %v2619_v63 = vadd.f32 %v2618_v60, %v2576_v49  ;;  %v2752_v49 = vld [vmem:[%s5913_s26] sm:$0xff]  ;;  %s5920_s26 = sld [smem:[#allocation20_spill]] }
 0xc78   : > { %v2621_v1 = vmul.f32 0.2, %v2599_v61  ;;  %v2622_v4 = vmul.f32 0.2, %v2619_v63 }
 0xc7a   : > { %v5372_v3 = vmax.f32 %v2599_v61, %v2621_v1  ;;  %v5374_v5 = vmax.f32 %v2619_v63, %v2622_v4 }
 0xc7c   : > { %2667 = vrot.lane.b32.xlu0 %v5372_v3, %s4042_s10  ;;  %2720 = vrot.lane.b32.xlu1 %v5372_v3, %s4041_s7 }
 0xc7d   : > { %2722 = vrot.lane.b32.xlu2 %v5374_v5, %s4041_s7 }
 0xc84   : > { %2649 = vrot.lane.b32.xlu0 %v2647_v54, %s4044_s15  ;;  %2669 = vrot.lane.b32.xlu1 %v5374_v5, %s4042_s10 }
 0xc85   : > { %2657 = vrot.lane.b32.xlu2 %v2647_v54, %s4043_s11 }
 0xc8c   : > { %2709 = vrot.lane.b32.xlu0 %v5372_v3, %s4043_s11  ;;  %2711 = vrot.lane.b32.xlu1 %v5374_v5, %s4043_s11 }
 0xc8d   : > { %2635 = vrot.lane.b32.xlu2 %v2625_v10, %s4043_s11 }
 0xc94   : > { %2698 = vrot.lane.b32.xlu0 %v5374_v5, %s4044_s15 }
 0xc95   : > { %2627 = vrot.lane.b32.xlu2 %v2625_v10, %s4044_s15 }
 0xcd7   : > { %v5398_v12 = vpop.permute.xlu2 %2722 }
 0xcd8   : > { %v2727_v53 = vsel %vm1202_vm0, %v5398_v12, 0.0 }
 0xcd9   : > { %2729 = vrot.lane.b32.xlu0 %v2727_v53, %s4044_s15  ;;  %2742 = vrot.lane.b32.xlu2 %v2727_v53, %s4043_s11 }
 0xcdf   : > { %v2658_v15 = vpop.permute.xlu2 %2657 }
 0xce0   : > { %v2659_v16 = vsel %vm1164_vm2, %v5290_v20, %v2658_v15  ;;  %v2662_v19 = vsel %vm1164_vm2, %v2658_v15, %v5290_v20 }
 0xce1   : > { %3822 = vmatpush.msk.msrb.mxu2 %vm4284_vm3, %v2659_v16  ;;  %3831 = vmatpush.msk.msrb.mxu3 %vm4288_vm4, %v2662_v19 }
 0xce3   : > { %2807 = vmatpush.msrb.mxu2 %v5257_v9  ;;  %3832 = vmatpush.msk.msrb.mxu3 %vm1202_vm0, %v5253_v57 }
 0xce7   : > { %v2636_v0 = vpop.permute.xlu2 %2635 }
 0xce8   : > { %v2637_v24 = vsel %vm1164_vm2, %v2636_v0, %v5337_v35  ;;  %v2640_v25 = vsel %vm1164_vm2, %v5337_v35, %v2636_v0 }
 0xcee   : > { %v5415_v55 = vpop.permute.xlu0 %2667  ;;  %v2721_v56 = vpop.permute.xlu1 %2720 }
 0xcef   : > { %v5419_v59 = vsel %vm1202_vm0, %v2721_v56, %v5398_v12  ;;  %v2674_v20 = vsel %vm1138_vm1, 0.0, %v5415_v55  ;;  %v2628_v28 = vpop.permute.xlu2 %2627 }
 0xcf0   : > { %2687 = vrot.lane.b32.xlu2 %v2674_v20, %s4043_s11  ;;  %2740 = vrot.lane.b32.xlu1 %v5419_v59, %s4043_s11  ;;  %v2632_v29 = vsel %vm1149_vm7, %v5335_v34, %v2628_v28  ;;  %v2629_v30 = vsel %vm1149_vm7, %v2628_v28, %v5335_v34 }
 0xcf6   : > { %v2650_v21 = vpop.permute.xlu0 %2649  ;;  %v2670_v58 = vpop.permute.xlu1 %2669 }
 0xcf7   : > { %v2652_v13 = vsel %vm1149_vm7, %v5302_v23, %v2650_v21  ;;  %v2654_v14 = vsel %vm1149_vm7, %v2650_v21, %v5302_v23  ;;  %v5432_v22 = vsel %vm1138_vm1, %v5415_v55, %v2670_v58  ;;  %v2839_v23 = vld [vmem:[%s5911_s22] sm:$0xff]  ;;  %s5918_s22 = sld [smem:[#allocation19_spill]] }
 0xcf8   : > { %2689 = vrot.lane.b32.xlu0 %v5432_v22, %s4043_s11  ;;  %2679 = vrot.lane.b32.xlu2 %v2674_v20, %s4044_s15 }
 0xcf9   : > { %2732 = vrot.lane.b32.xlu1 %v5419_v59, %s4044_s15  ;;  %3823 = vmatpush.msk.msrb.mxu2 %vm4300_vm5, %v2654_v14 }
 0xcfa   : > { %3833 = vmatpush.msk.msrb.mxu3 %vm4304_vm6, %v2652_v13 }
 0xcfb   : > { %3824 = vmatpush.msk.msrb.mxu2 %vm4284_vm3, %v5305_v62 }
 0xcfc   : > { %3834 = vmatpush.msk.msrb.mxu3 %vm4288_vm4, %v5308_v2 }
 0xcfd   : > { %2810 = vmatpush.msrb.mxu2 %v5234_v6 }
 0xcfe   : > { %2830 = vmatpush.msrb.mxu3 %v5237_v8 }
 0xcff   : > { %3825 = vmatpush.msk.msrb.mxu2 %vm4300_vm5, %v5331_v33 }
 0xd00   : > { %3835 = vmatpush.msk.msrb.mxu3 %vm4304_vm6, %v5328_v32  ;;  %2842 = vperm.xlu0 %3995, %v2839_v23  }
 0xd01   : > { %2701 = vrot.lane.b32.xlu1 %v5372_v3, %s4044_s15  ;;  %3826 = vmatpush.msk.msrb.mxu2 %vm4284_vm3, %v2637_v24 }
 0xd02   : > { %3836 = vmatpush.msk.msrb.mxu3 %vm4288_vm4, %v2640_v25 }
 0xd03   : > { %3828 = vmatpush.msk.msrb.mxu2 %vm4331_vm8, %v5266_v11 }
 0xd04   : > { %2833 = vmatpush.msrb.mxu3 %v5281_v7 }
 0xd05   : > { %3829 = vmatpush.msk.msrb.mxu2 %vm4300_vm5, %v2632_v29 }
 0xd06   : > { %3837 = vmatpush.msk.msrb.mxu3 %vm4304_vm6, %v2629_v30 }
 0xd07   : > { %3856 = vmatpush.msk.msra.mxu2 %vm4284_vm3, %v2659_v16 }
 0xd08   : > { %3865 = vmatpush.msk.msra.mxu3 %vm4288_vm4, %v2662_v19 }
 0xd09   : > { %2993 = vmatpush.msra.mxu2 %v5257_v9  ;;  %2675 = vrot.lane.b32.xlu1 %v5432_v22, %s4044_s15  ;;  %v2710_v9 = vpop.permute.xlu0 %2709 }
 0xd0a   : > { %3866 = vmatpush.msk.msra.mxu3 %vm1202_vm0, %v5253_v57  ;;  %v2751_v57 = vld [vmem:[%s5912_s23] sm:$0xff]  ;;  %s5919_s23 = sld [smem:[#allocation18_spill]] }
 0xd0b   : > { %3857 = vmatpush.msk.msra.mxu2 %vm4300_vm5, %v2654_v14  ;;  %3838 = vmatmul.msk.f32.vlgmr.msrb.gmra.mxu3 %vm1237_vm9, %v2751_v57  ;;  %v3071_v14 = vld [vmem:[%s5914_s0] sm:$0xff] }
 0xd0c   : > { %3867 = vmatpush.msk.msra.mxu3 %vm4304_vm6, %v2652_v13  ;;  %3830 = vmatmul.msk.f32.vlgmr.msrb.gmra.mxu2 %vm1237_vm9, %v2751_v57 }
 0xd0d   : > { %3858 = vmatpush.msk.msra.mxu2 %vm4284_vm3, %v5305_v62  ;;  %v2712_v62 = vpop.permute.xlu1 %2711 }
 0xd0e   : > { %3868 = vmatpush.msk.msra.mxu3 %vm4288_vm4, %v5308_v2  ;;  %v2713_v37 = vsel %vm1164_vm2, %v2710_v9, %v2712_v62  ;;  %v2717_v38 = vsel %vm1164_vm2, %v2712_v62, %v2710_v9 }
 0xd0f   : > { %2996 = vmatpush.msra.mxu2 %v5234_v6 }
 0xd10   : > { %3016 = vmatpush.msra.mxu3 %v5237_v8 }
 0xd11   : > { %3859 = vmatpush.msk.msra.mxu2 %vm4300_vm5, %v5331_v33 }
 0xd12   : > { %3869 = vmatpush.msk.msra.mxu3 %vm4304_vm6, %v5328_v32  ;;  %v2699_v32 = vpop.permute.xlu0 %2698 }
 0xd13   : > { %3860 = vmatpush.msk.msra.mxu2 %vm4284_vm3, %v2637_v24 }
 0xd14   : > { %3870 = vmatpush.msk.msra.mxu3 %vm4288_vm4, %v2640_v25  ;;  %v2938_v25 = vld [vmem:[%s5916_s16] sm:$0xff] }
 0xd15   : > { %3862 = vmatpush.msk.msra.mxu2 %vm4331_vm8, %v5266_v11 }
 0xd16   : > { %3019 = vmatpush.msra.mxu3 %v5281_v7 }
 0xd17   : > { %3863 = vmatpush.msk.msra.mxu2 %vm4300_vm5, %v2632_v29 }
 0xd18   : > { %3871 = vmatpush.msk.msra.mxu3 %vm4304_vm6, %v2629_v30 }
 0xd33   : > { %v2743_v2 = vpop.permute.xlu2 %2742 }
 0xd4a   : > { %v2688_v39 = vpop.permute.xlu2 %2687 }
 0xd4b   : > { %v2730_v33 = vpop.permute.xlu0 %2729 }
 0xd52   : > { %v2680_v47 = vpop.permute.xlu2 %2679 }
 0xd62   : > { %v2741_v31 = vpop.permute.xlu1 %2740 }
 0xd63   : > { %v2744_v11 = vsel %vm1164_vm2, %v2741_v31, %v2743_v2  ;;  %v2748_v7 = vsel %vm1164_vm2, %v2743_v2, %v2741_v31 }
 0xd64   : > { %3805 = vmatpush.msk.msrb.mxu0 %vm4284_vm3, %v2744_v11  ;;  %3814 = vmatpush.msk.msrb.mxu1 %vm4288_vm4, %v2748_v7 }
 0xd66   : > { %2764 = vmatpush.msrb.mxu0 %v5419_v59  ;;  %3815 = vmatpush.msk.msrb.mxu1 %vm1202_vm0, %v5398_v12 }
 0xd6a   : > { %v2690_v40 = vpop.permute.xlu0 %2689 }
 0xd6b   : > { %v2733_v34 = vpop.permute.xlu1 %2732  ;;  %v2691_v45 = vsel %vm1164_vm2, %v2688_v39, %v2690_v40  ;;  %v2695_v46 = vsel %vm1164_vm2, %v2690_v40, %v2688_v39 }
 0xd6c   : > { %v2734_v35 = vsel %vm1149_vm7, %v2733_v34, %v2730_v33  ;;  %v2737_v36 = vsel %vm1149_vm7, %v2730_v33, %v2733_v34 }
 0xd6d   : > { %3806 = vmatpush.msk.msrb.mxu0 %vm4300_vm5, %v2737_v36  ;;  %3816 = vmatpush.msk.msrb.mxu1 %vm4304_vm6, %v2734_v35 }
 0xd6f   : > { %3807 = vmatpush.msk.msrb.mxu0 %vm4284_vm3, %v2713_v37  ;;  %3817 = vmatpush.msk.msrb.mxu1 %vm4288_vm4, %v2717_v38 }
 0xd71   : > { %2767 = vmatpush.msrb.mxu0 %v5372_v3  ;;  %2787 = vmatpush.msrb.mxu1 %v5374_v5 }
 0xd72   : > { %v2843_v54 = vpop.permute.xlu0 %2842 }
 0xd73   : > { %v2702_v42 = vpop.permute.xlu1 %2701 }
 0xd74   : > { %v2703_v43 = vsel %vm1149_vm7, %v2702_v42, %v2699_v32  ;;  %v2706_v44 = vsel %vm1149_vm7, %v2699_v32, %v2702_v42 }
 0xd75   : > { %3808 = vmatpush.msk.msrb.mxu0 %vm4300_vm5, %v2706_v44  ;;  %3818 = vmatpush.msk.msrb.mxu1 %vm4304_vm6, %v2703_v43 }
 0xd77   : > { %3809 = vmatpush.msk.msrb.mxu0 %vm4284_vm3, %v2691_v45  ;;  %3819 = vmatpush.msk.msrb.mxu1 %vm4288_vm4, %v2695_v46 }
 0xd79   : > { %3811 = vmatpush.msk.msrb.mxu0 %vm4331_vm8, %v5415_v55  ;;  %2790 = vmatpush.msrb.mxu1 %v5432_v22 }
 0xd7b   : > { %v2676_v48 = vpop.permute.xlu1 %2675 }
 0xd7c   : > { %v2681_v52 = vsel %vm1149_vm7, %v2680_v47, %v2676_v48  ;;  %v2684_v60 = vsel %vm1149_vm7, %v2676_v48, %v2680_v47 }
 0xd7d   : > { %3812 = vmatpush.msk.msrb.mxu0 %vm4300_vm5, %v2684_v60  ;;  %3820 = vmatpush.msk.msrb.mxu1 %vm4304_vm6, %v2681_v52 }
 0xd7e   : > { %3813 = vmatmul.msk.f32.vlgmr.msrb.gmra.mxu0 %vm1237_vm9, %v2752_v49  ;;  %3821 = vmatmul.msk.f32.vlgmr.msrb.gmra.mxu1 %vm1237_vm9, %v2752_v49 }
 0xd7f   : > { %3839 = vmatpush.msk.msra.mxu0 %vm4284_vm3, %v2744_v11  ;;  %3848 = vmatpush.msk.msra.mxu1 %vm4288_vm4, %v2748_v7 }
 0xd81   : > { %2950 = vmatpush.msra.mxu0 %v5419_v59  ;;  %3849 = vmatpush.msk.msra.mxu1 %vm1202_vm0, %v5398_v12 }
 0xd83   : > { %3840 = vmatpush.msk.msra.mxu0 %vm4300_vm5, %v2737_v36  ;;  %3850 = vmatpush.msk.msra.mxu1 %vm4304_vm6, %v2734_v35 }
 0xd85   : > { %3841 = vmatpush.msk.msra.mxu0 %vm4284_vm3, %v2713_v37  ;;  %3851 = vmatpush.msk.msra.mxu1 %vm4288_vm4, %v2717_v38 }
 0xd87   : > { %2953 = vmatpush.msra.mxu0 %v5372_v3  ;;  %2973 = vmatpush.msra.mxu1 %v5374_v5 }
 0xd89   : > { %3842 = vmatpush.msk.msra.mxu0 %vm4300_vm5, %v2706_v44  ;;  %3852 = vmatpush.msk.msra.mxu1 %vm4304_vm6, %v2703_v43  ;;  %v3025_v43 = vld [vmem:[%s5917_s18] sm:$0xff] }
 0xd8b   : > { %3843 = vmatpush.msk.msra.mxu0 %vm4284_vm3, %v2691_v45  ;;  %3853 = vmatpush.msk.msra.mxu1 %vm4288_vm4, %v2695_v46 }
 0xd8d   : > { %3845 = vmatpush.msk.msra.mxu0 %vm4331_vm8, %v5415_v55  ;;  %2976 = vmatpush.msra.mxu1 %v5432_v22  ;;  %v2937_v22 = vld [vmem:[%s5915_s2] sm:$0xff] }
 0xd8e   : > { %v2836_v63 = vpop.f32.mrf.mxu3  ;;  %3864 = vmatmul.msk.f32.vlgmr.msra.gmra.mxu2 %vm1237_vm9, %v2937_v22  ;;  %3872 = vmatmul.msk.f32.vlgmr.msra.gmra.mxu3 %vm1237_vm9, %v2937_v22 }
 0xd8f   : > { %3846 = vmatpush.msk.msra.mxu0 %vm4300_vm5, %v2684_v60  ;;  %3854 = vmatpush.msk.msra.mxu1 %vm4304_vm6, %v2681_v52  ;;  %v2816_v61 = vpop.f32.mrf.mxu2 }
 0xd90   : > { %3847 = vmatmul.msk.f32.vlgmr.msra.gmra.mxu0 %vm1237_vm9, %v2938_v25  ;;  %3855 = vmatmul.msk.f32.vlgmr.msra.gmra.mxu1 %vm1237_vm9, %v2938_v25  ;;  %v3178_v25 = vld [vmem:[%s5918_s22] sm:$0xff] }
 0xdfb   : > { %v2773_v1 = vpop.f32.mrf.mxu0  ;;  %v2793_v4 = vpop.f32.mrf.mxu1 }
 0xdfc   : > { %v2817_v3 = vadd.f32 %v2816_v61, %v2773_v1  ;;  %v2837_v5 = vadd.f32 %v2836_v63, %v2793_v4 }
 0xdfe   : > { %v2845_v10 = vadd.f32 %v2843_v54, %v2817_v3  ;;  %v2846_v12 = vadd.f32 %v2843_v54, %v2837_v5 }
 0xe00   : > { %v2847_v53 = vmul.f32 0.2, %v2845_v10  ;;  %v2848_v15 = vmul.f32 0.2, %v2846_v12 }
 0xe02   : > { %v2849_v16 = vmax.f32 %v2845_v10, %v2847_v53  ;;  %v2850_v19 = vmax.f32 %v2846_v12, %v2848_v15 }
 0xe04   : > { %2853 = vrot.lane.b32.xlu0 %v2849_v16, %s4042_s10  ;;  %2906 = vrot.lane.b32.xlu1 %v2849_v16, %s4041_s7 }
 0xe05   : > { %2908 = vrot.lane.b32.xlu2 %v2850_v19, %s4041_s7 }
 0xe0c   : > { %2895 = vrot.lane.b32.xlu0 %v2849_v16, %s4043_s11  ;;  %2855 = vrot.lane.b32.xlu1 %v2850_v19, %s4042_s10 }
 0xe0d   : > { %2884 = vrot.lane.b32.xlu2 %v2850_v19, %s4044_s15  ;;  %v2959_v46 = vpop.f32.mrf.mxu0  ;;  %v2979_v47 = vpop.f32.mrf.mxu1 }
 0xe11   : > { %v3002_v48 = vpop.f32.mrf.mxu2  ;;  %v3022_v49 = vpop.f32.mrf.mxu3 }
 0xe12   : > { %v3003_v52 = vadd.f32 %v3002_v48, %v2959_v46  ;;  %v3023_v60 = vadd.f32 %v3022_v49, %v2979_v47 }
 0xe14   : > { %2897 = vrot.lane.b32.xlu1 %v2850_v19, %s4043_s11 }
 0xe5f   : > { %v2909_v55 = vpop.permute.xlu2 %2908 }
 0xe60   : > { %v2913_v56 = vsel %vm1202_vm0, %v2909_v55, 0.0 }
 0xe61   : > { %2915 = vrot.lane.b32.xlu1 %v2913_v56, %s4044_s15  ;;  %2928 = vrot.lane.b32.xlu0 %v2913_v56, %s4043_s11 }
 0xe67   : > { %v2885_v23 = vpop.permute.xlu2 %2884 }
 0xe69   : > { %2887 = vrot.lane.b32.xlu0 %v2849_v16, %s4044_s15 }
 0xe76   : > { %v2854_v59 = vpop.permute.xlu0 %2853  ;;  %v2907_v20 = vpop.permute.xlu1 %2906 }
 0xe77   : > { %v2910_v21 = vsel %vm1202_vm0, %v2907_v20, %v2909_v55  ;;  %v2860_v58 = vsel %vm1138_vm1, 0.0, %v2854_v59 }
 0xe78   : > { %2873 = vrot.lane.b32.xlu1 %v2860_v58, %s4043_s11  ;;  %2926 = vrot.lane.b32.xlu2 %v2910_v21, %s4043_s11 }
 0xe7e   : > { %v2856_v0 = vpop.permute.xlu1 %2855  ;;  %v2896_v24 = vpop.permute.xlu0 %2895 }
 0xe7f   : > { %v2857_v13 = vsel %vm1138_vm1, %v2854_v59, %v2856_v0 }
 0xe80   : > { %2865 = vrot.lane.b32.xlu1 %v2860_v58, %s4044_s15  ;;  %2861 = vrot.lane.b32.xlu0 %v2857_v13, %s4044_s15 }
 0xe81   : > { %2918 = vrot.lane.b32.xlu2 %v2910_v21, %s4044_s15 }
 0xe86   : > { %v2898_v29 = vpop.permute.xlu1 %2897 }
 0xe87   : > { %v2899_v11 = vsel %vm1164_vm2, %v2896_v24, %v2898_v29  ;;  %v2903_v7 = vsel %vm1164_vm2, %v2898_v29, %v2896_v24 }
 0xe89   : > { %2875 = vrot.lane.b32.xlu2 %v2857_v13, %s4043_s11 }
 0xe91   : > { %3074 = vperm.xlu2 %3996, %v3071_v14  }
 0xed2   : > { %v2927_v28 = vpop.permute.xlu2 %2926 }
 0xed3   : > { %v2929_v30 = vpop.permute.xlu0 %2928  ;;  %v2916_v62 = vpop.permute.xlu1 %2915 }
 0xed4   : > { %v2930_v57 = vsel %vm1164_vm2, %v2927_v28, %v2929_v30  ;;  %v2934_v9 = vsel %vm1164_vm2, %v2929_v30, %v2927_v28 }
 0xed5   : > { %3873 = vmatpush.msk.msrb.mxu0 %vm4284_vm3, %v2930_v57  ;;  %3882 = vmatpush.msk.msrb.mxu1 %vm4288_vm4, %v2934_v9 }
 0xed7   : > { %3037 = vmatpush.msrb.mxu0 %v2910_v21  ;;  %3883 = vmatpush.msk.msrb.mxu1 %vm1202_vm0, %v2909_v55 }
 0xedb   : > { %v2919_v2 = vpop.permute.xlu2 %2918  ;;  %v2888_v33 = vpop.permute.xlu0 %2887 }
 0xedc   : > { %v2920_v31 = vsel %vm1149_vm7, %v2919_v2, %v2916_v62  ;;  %v2923_v32 = vsel %vm1149_vm7, %v2916_v62, %v2919_v2  ;;  %v2889_v34 = vsel %vm1149_vm7, %v2888_v33, %v2885_v23  ;;  %v2892_v35 = vsel %vm1149_vm7, %v2885_v23, %v2888_v33 }
 0xedd   : > { %3874 = vmatpush.msk.msrb.mxu0 %vm4300_vm5, %v2923_v32  ;;  %3884 = vmatpush.msk.msrb.mxu1 %vm4304_vm6, %v2920_v31 }
 0xedf   : > { %3875 = vmatpush.msk.msrb.mxu0 %vm4284_vm3, %v2899_v11  ;;  %3885 = vmatpush.msk.msrb.mxu1 %vm4288_vm4, %v2903_v7 }
 0xee1   : > { %3040 = vmatpush.msrb.mxu0 %v2849_v16  ;;  %3060 = vmatpush.msrb.mxu1 %v2850_v19 }
 0xee3   : > { %3876 = vmatpush.msk.msrb.mxu0 %vm4300_vm5, %v2892_v35  ;;  %3886 = vmatpush.msk.msrb.mxu1 %vm4304_vm6, %v2889_v34  ;;  %v2876_v36 = vpop.permute.xlu2 %2875 }
 0xeea   : > { %v2874_v37 = vpop.permute.xlu1 %2873 }
 0xeeb   : > { %v2877_v38 = vsel %vm1164_vm2, %v2874_v37, %v2876_v36  ;;  %v2881_v39 = vsel %vm1164_vm2, %v2876_v36, %v2874_v37  ;;  %v3075_v3 = vpop.permute.xlu2 %3074 }
 0xeec   : > { %3877 = vmatpush.msk.msrb.mxu0 %vm4284_vm3, %v2877_v38  ;;  %3887 = vmatpush.msk.msrb.mxu1 %vm4288_vm4, %v2881_v39 }
 0xeee   : > { %3879 = vmatpush.msk.msrb.mxu0 %vm4331_vm8, %v2854_v59  ;;  %3063 = vmatpush.msrb.mxu1 %v2857_v13 }
 0xef2   : > { %v2866_v40 = vpop.permute.xlu1 %2865  ;;  %v2862_v42 = vpop.permute.xlu0 %2861 }
 0xef3   : > { %v2867_v44 = vsel %vm1149_vm7, %v2866_v40, %v2862_v42  ;;  %v2870_v45 = vsel %vm1149_vm7, %v2862_v42, %v2866_v40 }
 0xef4   : > { %3880 = vmatpush.msk.msrb.mxu0 %vm4300_vm5, %v2870_v45  ;;  %3888 = vmatpush.msk.msrb.mxu1 %vm4304_vm6, %v2867_v44  ;;  %v3177_v45 = vld [vmem:[%s5919_s23] sm:$0xff] }
 0xef5   : > { %3881 = vmatmul.msk.f32.vlgmr.msrb.gmra.mxu0 %vm1237_vm9, %v3025_v43  ;;  %3889 = vmatmul.msk.f32.vlgmr.msrb.gmra.mxu1 %vm1237_vm9, %v3025_v43 }
 0xf72   : > { %v3046_v61 = vpop.f32.mrf.mxu0  ;;  %v3066_v63 = vpop.f32.mrf.mxu1 }
 0xf73   : > { %v3069_v1 = vadd.f32 %v3046_v61, %v3003_v52  ;;  %v3070_v4 = vadd.f32 %v3066_v63, %v3023_v60 }
 0xf75   : > { %v3077_v5 = vadd.f32 %v3075_v3, %v3069_v1  ;;  %v3078_v54 = vadd.f32 %v3075_v3, %v3070_v4 }
 0xf77   : > { %v3079_v10 = vmul.f32 0.2, %v3077_v5  ;;  %v3080_v12 = vmul.f32 0.2, %v3078_v54 }
 0xf79   : > { %v3081_v53 = vmax.f32 %v3077_v5, %v3079_v10  ;;  %v3082_v15 = vmax.f32 %v3078_v54, %v3080_v12 }
 0xf7b   : > { %v3083_v16 = vmul.f32 0.4, %v3081_v53  ;;  %v3084_v19 = vmul.f32 0.4, %v3082_v15  ;;  %v3316_v53 = vld [vmem:[%s4219_s4] sm:$0xff] }
 0xf7d   : > { %v3085_v55 = vadd.f32 %v3083_v16, %v5234_v6  ;;  %v3086_v56 = vadd.f32 %v3084_v19, %v5237_v8 }
 0xf7f   : > { %v3087_v59 = vmul.f32 0.2, %v3085_v55  ;;  %v3088_v20 = vmul.f32 0.2, %v3086_v56 }
 0xf81   : > { %v3089_v21 = vadd.f32 %v3087_v59, %v4351_v50  ;;  %v3090_v58 = vadd.f32 %v3088_v20, %v4353_v51 }
 0xf83   : > { %3148 = vrot.lane.b32.xlu1 %v3090_v58, %s4041_s7  ;;  %3093 = vrot.lane.b32.xlu2 %v3089_v21, %s4042_s10 }
 0xf84   : > { %3146 = vrot.lane.b32.xlu0 %v3089_v21, %s4041_s7 }
 0xf8b   : > { %3124 = vrot.lane.b32.xlu1 %v3090_v58, %s4044_s15  ;;  %3135 = vrot.lane.b32.xlu2 %v3089_v21, %s4043_s11 }
 0xf8c   : > { %3095 = vrot.lane.b32.xlu0 %v3090_v58, %s4042_s10 }
 0xf94   : > { %3137 = vrot.lane.b32.xlu0 %v3090_v58, %s4043_s11 }
 0xfdd   : > { %v3094_v14 = vpop.permute.xlu2 %3093 }
 0xfde   : > { %v3100_v22 = vsel %vm1138_vm1, 0.0, %v3094_v14 }
 0xfe5   : > { %v3136_v29 = vpop.permute.xlu2 %3135 }
 0xff5   : > { %v3149_v6 = vpop.permute.xlu1 %3148 }
 0xff6   : > { %v3147_v8 = vpop.permute.xlu0 %3146  ;;  %v3153_v0 = vsel %vm1202_vm0, %v3149_v6, 0.0 }
 0xff7   : > { %v3150_v13 = vsel %vm1202_vm0, %v3147_v8, %v3149_v6  ;;  %3168 = vrot.lane.b32.xlu2 %v3153_v0, %s4043_s11  ;;  %3155 = vrot.lane.b32.xlu0 %v3153_v0, %s4044_s15 }
 0xff8   : > { %3166 = vrot.lane.b32.xlu1 %v3150_v13, %s4043_s11 }
 0xffd   : > { %v3125_v30 = vpop.permute.xlu1 %3124 }
 0xffe   : > { %v3096_v23 = vpop.permute.xlu0 %3095 }
 0xfff   : > { %3127 = vrot.lane.b32.xlu2 %v3089_v21, %s4044_s15  ;;  %3113 = vrot.lane.b32.xlu0 %v3100_v22, %s4043_s11  ;;  %v3097_v24 = vsel %vm1138_vm1, %v3094_v14, %v3096_v23 }
0x1000   : > { %3158 = vrot.lane.b32.xlu1 %v3150_v13, %s4044_s15 }
0x1006   : > { %v3138_v28 = vpop.permute.xlu0 %3137 }
0x1007   : > { %3105 = vrot.lane.b32.xlu0 %v3100_v22, %s4044_s15  ;;  %3101 = vrot.lane.b32.xlu2 %v3097_v24, %s4044_s15  ;;  %v3139_v35 = vsel %vm1164_vm2, %v3136_v29, %v3138_v28  ;;  %v3143_v36 = vsel %vm1164_vm2, %v3138_v28, %v3136_v29 }
0x1008   : > { %3115 = vrot.lane.b32.xlu1 %v3097_v24, %s4043_s11 }
0x1010   : > { %3181 = vperm.xlu1 %3994, %v3178_v25  }
0x1051   : > { %v3169_v9 = vpop.permute.xlu2 %3168 }
0x1059   : > { %v3128_v34 = vpop.permute.xlu2 %3127 }
0x105a   : > { %v3129_v37 = vsel %vm1149_vm7, %v3128_v34, %v3125_v30  ;;  %v3132_v38 = vsel %vm1149_vm7, %v3125_v30, %v3128_v34 }
0x1061   : > { %v3102_v44 = vpop.permute.xlu2 %3101 }
0x1069   : > { %v3156_v57 = vpop.permute.xlu0 %3155 }
0x106a   : > { %v3167_v62 = vpop.permute.xlu1 %3166 }
0x106b   : > { %v3170_v2 = vsel %vm1164_vm2, %v3167_v62, %v3169_v9  ;;  %v3174_v31 = vsel %vm1164_vm2, %v3169_v9, %v3167_v62  ;;  %v3315_v9 = vld [vmem:[%s5920_s26] sm:$0xff] }
0x106c   : > { %3890 = vmatpush.msk.msrb.mxu2 %vm4284_vm3, %v3170_v2  ;;  %3899 = vmatpush.msk.msrb.mxu3 %vm4288_vm4, %v3174_v31 }
0x106e   : > { %3195 = vmatpush.msrb.mxu2 %v3150_v13  ;;  %3900 = vmatpush.msk.msrb.mxu3 %vm1202_vm0, %v3149_v6 }
0x1071   : > { %v3114_v11 = vpop.permute.xlu0 %3113 }
0x1072   : > { %v3159_v32 = vpop.permute.xlu1 %3158 }
0x1073   : > { %v3160_v7 = vsel %vm1149_vm7, %v3159_v32, %v3156_v57  ;;  %v3163_v33 = vsel %vm1149_vm7, %v3156_v57, %v3159_v32 }
0x1074   : > { %3891 = vmatpush.msk.msrb.mxu2 %vm4300_vm5, %v3163_v33  ;;  %3901 = vmatpush.msk.msrb.mxu3 %vm4304_vm6, %v3160_v7 }
0x1076   : > { %3892 = vmatpush.msk.msrb.mxu2 %vm4284_vm3, %v3139_v35  ;;  %3902 = vmatpush.msk.msrb.mxu3 %vm4288_vm4, %v3143_v36 }
0x1078   : > { %3198 = vmatpush.msrb.mxu2 %v3089_v21  ;;  %3218 = vmatpush.msrb.mxu3 %v3090_v58 }
0x1079   : > { %v3106_v43 = vpop.permute.xlu0 %3105 }
0x107a   : > { %v3116_v39 = vpop.permute.xlu1 %3115  ;;  %3893 = vmatpush.msk.msrb.mxu2 %vm4300_vm5, %v3132_v38  ;;  %3903 = vmatpush.msk.msrb.mxu3 %vm4304_vm6, %v3129_v37  ;;  %v3107_v46 = vsel %vm1149_vm7, %v3106_v43, %v3102_v44  ;;  %v3110_v47 = vsel %vm1149_vm7, %v3102_v44, %v3106_v43 }
0x107b   : > { %v3117_v40 = vsel %vm1164_vm2, %v3114_v11, %v3116_v39  ;;  %v3121_v42 = vsel %vm1164_vm2, %v3116_v39, %v3114_v11 }
0x107c   : > { %3894 = vmatpush.msk.msrb.mxu2 %vm4284_vm3, %v3117_v40  ;;  %3904 = vmatpush.msk.msrb.mxu3 %vm4288_vm4, %v3121_v42 }
0x107e   : > { %3896 = vmatpush.msk.msrb.mxu2 %vm4331_vm8, %v3094_v14  ;;  %3221 = vmatpush.msrb.mxu3 %v3097_v24 }
0x1080   : > { %3897 = vmatpush.msk.msrb.mxu2 %vm4300_vm5, %v3110_v47  ;;  %3905 = vmatpush.msk.msrb.mxu3 %vm4304_vm6, %v3107_v46  ;;  %v3456_v47 = vld [vmem:[%s4229_s20] sm:$0xf] }
0x1081   : > { %3898 = vmatmul.msk.f32.vlgmr.msrb.gmra.mxu2 %vm1237_vm9, %v3177_v45  ;;  %3906 = vmatmul.msk.f32.vlgmr.msrb.gmra.mxu3 %vm1237_vm9, %v3177_v45 }
0x1082   : > { %v3182_v48 = vpop.permute.xlu1 %3181 }
0x1104   : > { %v3204_v49 = vpop.f32.mrf.mxu2  ;;  %v3224_v52 = vpop.f32.mrf.mxu3 }
0x1105   : > { %v3205_v60 = vadd.f32 %v3204_v49, %v3182_v48  ;;  %v3225_v61 = vadd.f32 %v3224_v52, %v3182_v48 }
0x1107   : > { %v3227_v63 = vadd.f32 %v3205_v60, %v4351_v50  ;;  %v3228_v1 = vadd.f32 %v3225_v61, %v4353_v51 }
0x1109   : > { %3231 = vrot.lane.b32.xlu1 %v3227_v63, %s4042_s10  ;;  %3284 = vrot.lane.b32.xlu2 %v3227_v63, %s4041_s7 }
0x110a   : > { %3286 = vrot.lane.b32.xlu0 %v3228_v1, %s4041_s7 }
0x1111   : > { %3273 = vrot.lane.b32.xlu1 %v3227_v63, %s4043_s11  ;;  %3233 = vrot.lane.b32.xlu2 %v3228_v1, %s4042_s10 }
0x1112   : > { %3262 = vrot.lane.b32.xlu0 %v3228_v1, %s4044_s15 }
0x1119   : > { %3275 = vrot.lane.b32.xlu2 %v3228_v1, %s4043_s11 }
0x1163   : > { %v3285_v4 = vpop.permute.xlu2 %3284 }
0x116b   : > { %v3234_v10 = vpop.permute.xlu2 %3233 }
0x1173   : > { %v3276_v16 = vpop.permute.xlu2 %3275 }
0x117b   : > { %v3232_v5 = vpop.permute.xlu1 %3231 }
0x117c   : > { %v3287_v3 = vpop.permute.xlu0 %3286  ;;  %v3238_v54 = vsel %vm1138_vm1, 0.0, %v3232_v5  ;;  %v3235_v12 = vsel %vm1138_vm1, %v3232_v5, %v3234_v10 }
0x117d   : > { %v3291_v50 = vsel %vm1202_vm0, %v3287_v3, 0.0  ;;  %v3288_v51 = vsel %vm1202_vm0, %v3285_v4, %v3287_v3 }
0x117e   : > { %3293 = vrot.lane.b32.xlu2 %v3291_v50, %s4044_s15  ;;  %3306 = vrot.lane.b32.xlu1 %v3291_v50, %s4043_s11 }
0x117f   : > { %3304 = vrot.lane.b32.xlu0 %v3288_v51, %s4043_s11 }
0x1183   : > { %v3274_v15 = vpop.permute.xlu1 %3273 }
0x1184   : > { %v3263_v19 = vpop.permute.xlu0 %3262  ;;  %v3277_v14 = vsel %vm1164_vm2, %v3274_v15, %v3276_v16  ;;  %v3281_v22 = vsel %vm1164_vm2, %v3276_v16, %v3274_v15 }
0x1186   : > { %3251 = vrot.lane.b32.xlu2 %v3238_v54, %s4043_s11  ;;  %3265 = vrot.lane.b32.xlu1 %v3227_v63, %s4044_s15 }
0x1187   : > { %3296 = vrot.lane.b32.xlu0 %v3288_v51, %s4044_s15 }
0x118e   : > { %3243 = vrot.lane.b32.xlu2 %v3238_v54, %s4044_s15  ;;  %3239 = vrot.lane.b32.xlu1 %v3235_v12, %s4044_s15 }
0x118f   : > { %3253 = vrot.lane.b32.xlu0 %v3235_v12, %s4043_s11 }
0x1197   : > { %3319 = vperm.xlu0 %3995, %v3316_v53  }
0x11d8   : > { %v3294_v56 = vpop.permute.xlu2 %3293 }
0x11e0   : > { %v3252_v13 = vpop.permute.xlu2 %3251 }
0x11e8   : > { %v3244_v57 = vpop.permute.xlu2 %3243 }
0x11f0   : > { %v3307_v55 = vpop.permute.xlu1 %3306 }
0x11f1   : > { %v3305_v59 = vpop.permute.xlu0 %3304 }
0x11f2   : > { %v3308_v20 = vsel %vm1164_vm2, %v3305_v59, %v3307_v55  ;;  %v3312_v21 = vsel %vm1164_vm2, %v3307_v55, %v3305_v59 }
0x11f3   : > { %3907 = vmatpush.msk.msra.mxu0 %vm4284_vm3, %v3308_v20  ;;  %3916 = vmatpush.msk.msra.mxu1 %vm4288_vm4, %v3312_v21  ;;  %v3455_v20 = vld [vmem:[%s4224_s12] sm:$0xf] }
0x11f5   : > { %3333 = vmatpush.msra.mxu0 %v3288_v51  ;;  %3917 = vmatpush.msk.msra.mxu1 %vm1202_vm0, %v3287_v3 }
0x11f8   : > { %v3266_v58 = vpop.permute.xlu1 %3265 }
0x11f9   : > { %v3297_v6 = vpop.permute.xlu0 %3296  ;;  %v3267_v23 = vsel %vm1149_vm7, %v3266_v58, %v3263_v19  ;;  %v3270_v24 = vsel %vm1149_vm7, %v3263_v19, %v3266_v58 }
0x11fa   : > { %v3298_v8 = vsel %vm1149_vm7, %v3297_v6, %v3294_v56  ;;  %v3301_v0 = vsel %vm1149_vm7, %v3294_v56, %v3297_v6 }
0x11fb   : > { %3908 = vmatpush.msk.msra.mxu0 %vm4300_vm5, %v3301_v0  ;;  %3918 = vmatpush.msk.msra.mxu1 %vm4304_vm6, %v3298_v8 }
0x11fd   : > { %3909 = vmatpush.msk.msra.mxu0 %vm4284_vm3, %v3277_v14  ;;  %3919 = vmatpush.msk.msra.mxu1 %vm4288_vm4, %v3281_v22 }
0x11ff   : > { %3336 = vmatpush.msra.mxu0 %v3227_v63  ;;  %3356 = vmatpush.msra.mxu1 %v3228_v1 }
0x1200   : > { %v3240_v30 = vpop.permute.xlu1 %3239 }
0x1201   : > { %3910 = vmatpush.msk.msra.mxu0 %vm4300_vm5, %v3270_v24  ;;  %3920 = vmatpush.msk.msra.mxu1 %vm4304_vm6, %v3267_v23  ;;  %v3254_v25 = vpop.permute.xlu0 %3253  ;;  %v3245_v62 = vsel %vm1149_vm7, %v3244_v57, %v3240_v30  ;;  %v3248_v2 = vsel %vm1149_vm7, %v3240_v30, %v3244_v57 }
0x1202   : > { %v3255_v28 = vsel %vm1164_vm2, %v3252_v13, %v3254_v25  ;;  %v3259_v29 = vsel %vm1164_vm2, %v3254_v25, %v3252_v13 }
0x1203   : > { %3911 = vmatpush.msk.msra.mxu0 %vm4284_vm3, %v3255_v28  ;;  %3921 = vmatpush.msk.msra.mxu1 %vm4288_vm4, %v3259_v29 }
0x1205   : > { %3913 = vmatpush.msk.msra.mxu0 %vm4331_vm8, %v3232_v5  ;;  %3359 = vmatpush.msra.mxu1 %v3235_v12 }
0x1207   : > { %3914 = vmatpush.msk.msra.mxu0 %vm4300_vm5, %v3248_v2  ;;  %3922 = vmatpush.msk.msra.mxu1 %vm4304_vm6, %v3245_v62 }
0x1208   : > { %3915 = vmatmul.msk.f32.vlgmr.msra.gmra.mxu0 %vm1237_vm9, %v3315_v9  ;;  %3923 = vmatmul.msk.f32.vlgmr.msra.gmra.mxu1 %vm1237_vm9, %v3315_v9 }
0x1209   : > { %v3320_v31 = vpop.permute.xlu0 %3319 }
0x1285   : > { %v3342_v32 = vpop.f32.mrf.mxu0  ;;  %v3362_v11 = vpop.f32.mrf.mxu1 }
0x1286   : > { %v3343_v7 = vadd.f32 %v3342_v32, %v3320_v31  ;;  %v3363_v33 = vadd.f32 %v3362_v11, %v3320_v31 }
0x1288   : > { %v3365_v34 = vmul.f32 0.2, %v3343_v7  ;;  %v3366_v35 = vmul.f32 0.2, %v3363_v33 }
0x128a   : > { %v3367_v36 = vmax.f32 %v3343_v7, %v3365_v34  ;;  %v3368_v37 = vmax.f32 %v3363_v33, %v3366_v35 }
0x128c   : > { %3426 = vrot.lane.b32.xlu2 %v3368_v37, %s4041_s7  ;;  %3371 = vrot.lane.b32.xlu0 %v3367_v36, %s4042_s10 }
0x128d   : > { %3424 = vrot.lane.b32.xlu1 %v3367_v36, %s4041_s7  ;;  %s3944_s7 = sshll.u32 %s5922_s1, 3 }
0x1294   : > { %3402 = vrot.lane.b32.xlu2 %v3368_v37, %s4044_s15  ;;  %3413 = vrot.lane.b32.xlu0 %v3367_v36, %s4043_s11 }
0x1295   : > { %3373 = vrot.lane.b32.xlu1 %v3368_v37, %s4042_s10  ;;  %s1098_s10 = scalar_lea.vmem %s4234_s27, %s3944_s7 }
0x129d   : > { %3415 = vrot.lane.b32.xlu1 %v3368_v37, %s4043_s11 }
0x12e6   : > { %v3427_v38 = vpop.permute.xlu2 %3426 }
0x12e7   : > { %v3431_v39 = vsel %vm1202_vm0, %v3427_v38, 0.0 }
0x12e8   : > { %3446 = vrot.lane.b32.xlu0 %v3431_v39, %s4043_s11  ;;  %3433 = vrot.lane.b32.xlu1 %v3431_v39, %s4044_s15 }
0x12ee   : > { %v3403_v49 = vpop.permute.xlu2 %3402 }
0x12f0   : > { %3405 = vrot.lane.b32.xlu0 %v3367_v36, %s4044_s15 }
0x12fe   : > { %v3372_v40 = vpop.permute.xlu0 %3371 }
0x12ff   : > { %v3425_v42 = vpop.permute.xlu1 %3424  ;;  %v3378_v43 = vsel %vm1138_vm1, 0.0, %v3372_v40 }
0x1300   : > { %v3428_v44 = vsel %vm1202_vm0, %v3425_v42, %v3427_v38  ;;  %3391 = vrot.lane.b32.xlu1 %v3378_v43, %s4043_s11 }
0x1301   : > { %3444 = vrot.lane.b32.xlu2 %v3428_v44, %s4043_s11 }
0x1306   : > { %v3414_v48 = vpop.permute.xlu0 %3413 }
0x1307   : > { %v3374_v45 = vpop.permute.xlu1 %3373 }
0x1308   : > { %v3375_v46 = vsel %vm1138_vm1, %v3372_v40, %v3374_v45  ;;  %3383 = vrot.lane.b32.xlu1 %v3378_v43, %s4044_s15 }
0x1309   : > { %3436 = vrot.lane.b32.xlu2 %v3428_v44, %s4044_s15  ;;  %3379 = vrot.lane.b32.xlu0 %v3375_v46, %s4044_s15 }
0x130f   : > { %v3416_v60 = vpop.permute.xlu1 %3415 }
0x1310   : > { %v3417_v5 = vsel %vm1164_vm2, %v3414_v48, %v3416_v60  ;;  %v3421_v54 = vsel %vm1164_vm2, %v3416_v60, %v3414_v48 }
0x1311   : > { %3393 = vrot.lane.b32.xlu2 %v3375_v46, %s4043_s11 }
0x1319   : > { %3459 = vperm.xlu2 %3996, %v3456_v47  }
0x135a   : > { %v3447_v52 = vpop.permute.xlu0 %3446  ;;  %v3434_v4 = vpop.permute.xlu1 %3433 }
0x135b   : > { %v3445_v61 = vpop.permute.xlu2 %3444 }
0x135c   : > { %v3448_v63 = vsel %vm1164_vm2, %v3445_v61, %v3447_v52  ;;  %v3452_v1 = vsel %vm1164_vm2, %v3447_v52, %v3445_v61 }
0x135d   : > { %3924 = vmatpush.msk.msra.mxu2 %vm4284_vm3, %v3448_v63  ;;  %3933 = vmatpush.msk.msra.mxu3 %vm4288_vm4, %v3452_v1 }
0x135f   : > { %3473 = vmatpush.msra.mxu2 %v3428_v44  ;;  %3934 = vmatpush.msk.msra.mxu3 %vm1202_vm0, %v3427_v38 }
0x1362   : > { %v3406_v10 = vpop.permute.xlu0 %3405 }
0x1363   : > { %v3437_v3 = vpop.permute.xlu2 %3436  ;;  %v3407_v12 = vsel %vm1149_vm7, %v3406_v10, %v3403_v49  ;;  %v3410_v53 = vsel %vm1149_vm7, %v3403_v49, %v3406_v10 }
0x1364   : > { %v3438_v50 = vsel %vm1149_vm7, %v3437_v3, %v3434_v4  ;;  %v3441_v51 = vsel %vm1149_vm7, %v3434_v4, %v3437_v3 }
0x1365   : > { %3925 = vmatpush.msk.msra.mxu2 %vm4300_vm5, %v3441_v51  ;;  %3935 = vmatpush.msk.msra.mxu3 %vm4304_vm6, %v3438_v50 }
0x1367   : > { %3926 = vmatpush.msk.msra.mxu2 %vm4284_vm3, %v3417_v5  ;;  %3936 = vmatpush.msk.msra.mxu3 %vm4288_vm4, %v3421_v54 }
0x1369   : > { %3476 = vmatpush.msra.mxu2 %v3367_v36  ;;  %3496 = vmatpush.msra.mxu3 %v3368_v37 }
0x136b   : > { %3927 = vmatpush.msk.msra.mxu2 %vm4300_vm5, %v3410_v53  ;;  %3937 = vmatpush.msk.msra.mxu3 %vm4304_vm6, %v3407_v12  ;;  %v3394_v15 = vpop.permute.xlu2 %3393 }
0x1372   : > { %v3392_v16 = vpop.permute.xlu1 %3391 }
0x1373   : > { %v3395_v19 = vsel %vm1164_vm2, %v3392_v16, %v3394_v15  ;;  %v3399_v55 = vsel %vm1164_vm2, %v3394_v15, %v3392_v16  ;;  %v3460_v17 = vpop.permute.xlu2 %3459 }
0x1374   : > { %3928 = vmatpush.msk.msra.mxu2 %vm4284_vm3, %v3395_v19  ;;  %3938 = vmatpush.msk.msra.mxu3 %vm4288_vm4, %v3399_v55 }
0x1376   : > { %3930 = vmatpush.msk.msra.mxu2 %vm4331_vm8, %v3372_v40  ;;  %3499 = vmatpush.msra.mxu3 %v3375_v46 }
0x137a   : > { %v3384_v56 = vpop.permute.xlu1 %3383 }
0x137b   : > { %v3380_v59 = vpop.permute.xlu0 %3379 }
0x137c   : > { %v3385_v21 = vsel %vm1149_vm7, %v3384_v56, %v3380_v59  ;;  %v3388_v58 = vsel %vm1149_vm7, %v3380_v59, %v3384_v56 }
0x137d   : > { %3931 = vmatpush.msk.msra.mxu2 %vm4300_vm5, %v3388_v58  ;;  %3939 = vmatpush.msk.msra.mxu3 %vm4304_vm6, %v3385_v21 }
0x137e   : > { %3932 = vmatmul.msk.f32.vlgmr.msra.gmra.mxu2 %vm1237_vm9, %v3455_v20  ;;  %3940 = vmatmul.msk.f32.vlgmr.msra.gmra.mxu3 %vm1237_vm9, %v3455_v20 }
0x1401   : > { %v3482_v18 = vpop.f32.mrf.mxu2  ;;  %v3502_v41 = vpop.f32.mrf.mxu3 }
0x1402   : > { %v3503_v6 = vadd.f32 %v3502_v41, %v3460_v17  ;;  %v3483_v8 = vadd.f32 %v3482_v18, %v3460_v17 }
0x1404   : > { %v3507_v0 = vrot.slane %v3503_v6, 4 }
0x1406   : > { %v3509_v13 = vsel %vm3508_vm10, %v3483_v8, %v3507_v0 }
0x1407   : > { %3511 = vst [vmem:[%s1098_s10] sm:$0xff] %v3509_v13 }
0x1408 PF: > { %s83_s28 = sadd.s32 1, %s4003_s28  }
0x1409   : > { %p80_p4 = scmp.ge.s32.totalorder %s83_s28, 4  }
0x140b   :  { %82 = sbr.rel (!%p80_p4) target bundleno = 67 (0x43), region = 230 }

</bundles_post_ra>
